<compile_context>
chip_gen: v7x
topology: tpu7x:2x2x1
jax: 0.10.0
libtpu: 0.0.40
codegen_flags: <defaults>
</compile_context>

<pallas_src>
import functools

import numpy as np
import jax
import jax.numpy as jnp
from jax import lax
from jax.experimental import pallas as pl
from jax.experimental.pallas import tpu as pltpu


# ---------------------------------------------------------------------------
# Pallas kernels
# ---------------------------------------------------------------------------
def _conv3x3x3_kernel(x0_ref, x1_ref, x2_ref, w_ref, b_ref, m_ref, o_ref,
                      *, G, S, Wp, apply_relu):
    """One (n, t) output time-slice of a 'same' 3x3x3 conv.

    x{0,1,2}_ref: (Cin, G + S + G)   padded input slices at t, t+1, t+2
    w_ref:        (27, Cout, Cin)    per-tap transposed weights, k = dt*9+dh*3+dw
    b_ref:        (Cout, 1)
    m_ref:        (1, S)             interior mask (zeros the padded border)
    o_ref:        (Cout, S)          padded-flat spatial output (lane-dense)
    """
    cout = o_ref.shape[0]
    acc = jnp.zeros((cout, S), jnp.float32)
    x_refs = (x0_ref, x1_ref, x2_ref)
    for dt in range(3):
        xsl = x_refs[dt][...]                        # (Cin, G+S+G)
        for dh in range(3):
            for dw in range(3):
                off = G + (dh - 1) * Wp + (dw - 1)   # static lane offset
                patch = xsl[:, off:off + S]          # (Cin, S)
                k = (dt * 3 + dh) * 3 + dw
                acc = acc + jnp.dot(w_ref[k], patch,
                                    preferred_element_type=jnp.float32)
    out = acc + b_ref[...]
    if apply_relu:
        out = jnp.maximum(out, 0.0)
    # mask AFTER bias/relu so border positions are exact zeros (they serve as
    # the zero padding of the next conv).
    o_ref[...] = (out * m_ref[...]).astype(o_ref.dtype)


def conv3x3x3(xg, wT, b, mask, *, apply_relu, N, T, Hp, Wp):
    """3x3x3 stride-1 'same' conv over guarded/padded channels-on-sublane layout.

    xg: (N, T+2, Cin, G + Hp*Wp + G) zero-padded input (G = Wp + 1 guard lanes)
    returns (N, T, Cout, Hp*Wp) with the padded border forced to zero.
    """
    Np, Tp, Cin, Lg = xg.shape
    Cout = wT.shape[1]
    S = Hp * Wp
    G = Wp + 1
    assert Np == N and Tp == T + 2 and Lg == S + 2 * G

    def x_spec(dt):
        return pl.BlockSpec((None, None, Cin, Lg),
                            lambda n, t, dt=dt: (n, t + dt, 0, 0))

    kernel = functools.partial(_conv3x3x3_kernel, G=G, S=S, Wp=Wp,
                               apply_relu=apply_relu)
    return pl.pallas_call(
        kernel,
        out_shape=jax.ShapeDtypeStruct((N, T, Cout, S), jnp.float32),
        grid_spec=pltpu.PrefetchScalarGridSpec(
            num_scalar_prefetch=0,
            grid=(N, T),
            in_specs=[x_spec(0), x_spec(1), x_spec(2),
                      pl.BlockSpec((27, Cout, Cin), lambda n, t: (0, 0, 0)),
                      pl.BlockSpec((Cout, 1), lambda n, t: (0, 0)),
                      pl.BlockSpec((1, S), lambda n, t: (0, 0))],
            out_specs=pl.BlockSpec((None, None, Cout, S),
                                   lambda n, t: (n, t, 0, 0)),
        ),
        compiler_params=pltpu.CompilerParams(
            dimension_semantics=("parallel", "parallel")),
    )(xg, xg, xg, wT, b, mask)


def _pool_add_conv1_kernel(y2_ref, xp_ref, w1_ref, b1_ref, o_ref):
    """out = avgpool(y2) + (W1 @ avgpool(x) + b1), transposed/lane-dense.

    y2_ref: (8, Cout, tn)  8 pool taps of branch-2 on the leading axis
    xp_ref: (Cin, tn)      pooled raw input (branch 1, pool commuted with conv1)
    w1_ref: (Cout, Cin), b1_ref: (Cout, 1)
    o_ref : (Cout, tn)
    """
    s = y2_ref[0]
    for k in range(1, 8):
        s = s + y2_ref[k]
    y1 = jnp.dot(w1_ref[...], xp_ref[...], preferred_element_type=jnp.float32)
    o_ref[...] = (s * 0.125 + y1 + b1_ref[...]).astype(o_ref.dtype)


def _pick_lane_tile(M2):
    # prefer >=4 blocks (megacore balance) with a lane-aligned tile
    for tn in (1024, 512, 256, 128):
        if M2 % tn == 0 and M2 // tn >= 4:
            return tn
    for tn in (1024, 512, 256, 128):
        if M2 % tn == 0:
            return tn
    return M2


def pool_add_conv1(y2taps, xpT, w1T, b1):
    _, Cout, M2 = y2taps.shape
    Cin = xpT.shape[0]
    tn = _pick_lane_tile(M2)
    return pl.pallas_call(
        _pool_add_conv1_kernel,
        out_shape=jax.ShapeDtypeStruct((Cout, M2), jnp.float32),
        grid_spec=pltpu.PrefetchScalarGridSpec(
            num_scalar_prefetch=0,
            grid=(M2 // tn,),
            in_specs=[pl.BlockSpec((8, Cout, tn), lambda i: (0, 0, i)),
                      pl.BlockSpec((Cin, tn), lambda i: (0, i)),
                      pl.BlockSpec((Cout, Cin), lambda i: (0, 0)),
                      pl.BlockSpec((Cout, 1), lambda i: (0, 0))],
            out_specs=pl.BlockSpec((Cout, tn), lambda i: (0, i)),
        ),
        compiler_params=pltpu.CompilerParams(
            dimension_semantics=("parallel",)),
    )(y2taps, xpT, w1T, b1)


# ---------------------------------------------------------------------------
# Weight preparation (hoisted out of the per-call forward)
# ---------------------------------------------------------------------------
def spectral_normalize(w, n_iter=30):
    """Power-iteration spectral norm of w.reshape(out_channels, -1); divide.

    NOTE: PyTorch's spectral_norm runs 1 iteration per forward with a
    persistent u buffer; here we run the iteration to (near) convergence once.
    """
    wm = w.reshape(w.shape[0], -1).astype(jnp.float32)
    v = jnp.ones((wm.shape[1],), jnp.float32) / jnp.sqrt(float(wm.shape[1]))
    u = None
    for _ in range(n_iter):
        u = jnp.dot(wm, v, precision=lax.Precision.HIGHEST)
        u = u / (jnp.linalg.norm(u) + 1e-12)
        v = jnp.dot(wm.T, u, precision=lax.Precision.HIGHEST)
        v = v / (jnp.linalg.norm(v) + 1e-12)
    sigma = jnp.dot(u, jnp.dot(wm, v, precision=lax.Precision.HIGHEST),
                    precision=lax.Precision.HIGHEST)
    return w / sigma


def prepare_params(params):
    """One-time: spectral-normalize and pre-transpose weights to kernel layout."""
    C_out, C_in = params["w1"].shape[0], params["w1"].shape[1]
    w31 = spectral_normalize(params["w31"])
    w32 = spectral_normalize(params["w32"])
    return {
        # 1x1x1 conv as (Cout, Cin) for the transposed/lane-dense matmul
        "w1T": params["w1"].reshape(C_out, C_in).astype(jnp.float32),
        "b1": params["b1"].reshape(C_out, 1).astype(jnp.float32),
        # 3x3x3 convs as per-tap transposed (27, Cout, Cin), k = dt*9+dh*3+dw
        "w31T": jnp.transpose(w31, (2, 3, 4, 0, 1)).reshape(27, C_in, C_in)
                   .astype(jnp.float32),
        "b31": params["b31"].reshape(C_in, 1).astype(jnp.float32),
        "w32T": jnp.transpose(w32, (2, 3, 4, 0, 1)).reshape(27, C_out, C_in)
                   .astype(jnp.float32),
        "b32": params["b32"].reshape(C_out, 1).astype(jnp.float32),
    }


# ---------------------------------------------------------------------------
# Forward pass
# ---------------------------------------------------------------------------
def d3block_forward(x, prep):
    """x: (N, T, C_in, H, W)  ->  (N, T//2, C_out, H//2, W//2)."""
    N, T, C_in, H, W = x.shape
    C_out = prep["w1T"].shape[0]
    assert T % 2 == 0 and H % 2 == 0 and W % 2 == 0
    T2, H2, W2 = T // 2, H // 2, W // 2
    Tp, Hp, Wp = T + 2, H + 2, W + 2
    S = Hp * Wp
    G = Wp + 1                       # guard lanes so every tap slice is in range
    M2 = N * T2 * H2 * W2

    x = x.astype(jnp.float32)

    # interior mask over padded-flat spatial positions
    mask = (jnp.zeros((Hp, Wp), jnp.float32)
            .at[1:H + 1, 1:W + 1].set(1.0).reshape(1, S))

    # --- branch 2: conv3x3x3 -> relu -> conv3x3x3 (27-tap accumulation) ------
    # (relu3_1(x) is discarded in the reference forward; conv3_1 sees raw x)
    xg = jnp.pad(x, ((0, 0), (1, 1), (0, 0), (1, 1), (1, 1)))
    xg = xg.reshape(N, Tp, C_in, S)
    xg = jnp.pad(xg, ((0, 0), (0, 0), (0, 0), (G, G)))          # (N,Tp,Cin,Lg)

    h1 = conv3x3x3(xg, prep["w31T"], prep["b31"], mask, apply_relu=True,
                   N=N, T=T, Hp=Hp, Wp=Wp)                      # (N,T,Cin,S)
    h1g = jnp.pad(h1, ((0, 0), (1, 1), (0, 0), (G, G)))         # (N,Tp,Cin,Lg)
    y2 = conv3x3x3(h1g, prep["w32T"], prep["b32"], mask, apply_relu=False,
                   N=N, T=T, Hp=Hp, Wp=Wp)                      # (N,T,Cout,S)

    # rearrange y2 interior so the 8 pool taps sit on a leading axis and the
    # big voxel axis maps to lanes
    y2i = y2.reshape(N, T, C_out, Hp, Wp)[:, :, :, 1:H + 1, 1:W + 1]
    y2i = y2i.reshape(N, T2, 2, C_out, H2, 2, W2, 2)
    y2taps = jnp.transpose(y2i, (2, 5, 7, 3, 0, 1, 4, 6)).reshape(8, C_out, M2)

    # --- branch 1: pool x first (pool and 1x1 conv commute exactly), then fuse
    # the 1x1 conv + bias + residual add + branch-2 pooling in one kernel ------
    xp = x.reshape(N, T2, 2, C_in, H2, 2, W2, 2).mean(axis=(2, 5, 7))
    xpT = jnp.transpose(xp, (2, 0, 1, 3, 4)).reshape(C_in, M2)

    outT = pool_add_conv1(y2taps, xpT, prep["w1T"], prep["b1"])  # (Cout, M2)
    out = outT.reshape(C_out, N, T2, H2, W2)
    return jnp.transpose(out, (1, 2, 0, 3, 4))                   # (N,T2,Cout,H2,W2)


# ---------------------------------------------------------------------------
# Pure-JAX reference (for correctness check)
# ---------------------------------------------------------------------------
def d3block_reference(x, params):
    xt = jnp.transpose(x, (0, 2, 1, 3, 4)).astype(jnp.float32)   # (N,Cin,T,H,W)

    def conv3d(z, w, b, pad):
        y = lax.conv_general_dilated(
            z, w, window_strides=(1, 1, 1), padding=[(pad, pad)] * 3,
            dimension_numbers=("NCDHW", "OIDHW", "NCDHW"),
            precision=lax.Precision.HIGHEST)
        return y + b.reshape(1, -1, 1, 1, 1)

    def avgpool(z):
        return lax.reduce_window(z, 0.0, lax.add,
                                 (1, 1, 2, 2, 2), (1, 1, 2, 2, 2), "VALID") / 8.0

    w31 = spectral_normalize(params["w31"])
    w32 = spectral_normalize(params["w32"])

    x1 = avgpool(conv3d(xt, params["w1"], params["b1"], 0))
    x2 = conv3d(xt, w31, params["b31"], 1)        # relu3_1 result discarded
    x2 = jnp.maximum(x2, 0.0)
    x2 = avgpool(conv3d(x2, w32, params["b32"], 1))
    out = x1 + x2
    return jnp.transpose(out, (0, 2, 1, 3, 4))


# ---------------------------------------------------------------------------
if __name__ == "__main__":
    N, T, C_in, H, W, C_out = 2, 8, 4, 16, 16, 8

    key = jax.random.PRNGKey(0)
    kx, k1, k2, k3, k4, k5, k6 = jax.random.split(key, 7)
    x = jax.random.normal(kx, (N, T, C_in, H, W), dtype=jnp.float32)
    params = {
        "w1": jax.random.normal(k1, (C_out, C_in, 1, 1, 1), jnp.float32) * 0.3,
        "b1": jax.random.normal(k2, (C_out,), jnp.float32) * 0.1,
        "w31": jax.random.normal(k3, (C_in, C_in, 3, 3, 3), jnp.float32) * 0.2,
        "b31": jax.random.normal(k4, (C_in,), jnp.float32) * 0.1,
        "w32": jax.random.normal(k5, (C_out, C_in, 3, 3, 3), jnp.float32) * 0.2,
        "b32": jax.random.normal(k6, (C_out,), jnp.float32) * 0.1,
    }

    prep = prepare_params(params)                 # hoisted weight prep (once)
    fwd = jax.jit(d3block_forward)
    out = jax.block_until_ready(fwd(x, prep))
    assert out.shape == (N, T // 2, C_out, H // 2, W // 2), out.shape

    ref = jax.block_until_ready(d3block_reference(x, params))
    np.testing.assert_allclose(np.asarray(out), np.asarray(ref),
                               rtol=1e-3, atol=1e-3)
    print("KERNEL_OK")
</pallas_src>

<mosaic_0001>
module attributes {stable_mosaic.version = 11 : i64} {
  func.func @_conv3x3x3_kernel(%arg0: i32, %arg1: i32, %arg2: memref<1x1x4x362xf32, #tpu.memory_space<vmem>>, %arg3: memref<1x1x4x362xf32, #tpu.memory_space<vmem>>, %arg4: memref<1x1x4x362xf32, #tpu.memory_space<vmem>>, %arg5: memref<27x4x4xf32, #tpu.memory_space<vmem>>, %arg6: memref<4x1xf32, #tpu.memory_space<vmem>>, %arg7: memref<1x324xf32, #tpu.memory_space<vmem>>, %arg8: memref<1x1x4x324xf32, #tpu.memory_space<vmem>>) attributes {dimension_semantics = [#tpu.dimension_semantics<parallel>, #tpu.dimension_semantics<parallel>], iteration_bounds = array<i64: 2, 8>, scalar_prefetch = 0 : i64, scratch_operands = 0 : i64, tpu.core_type = #tpu.core_type<tc>, window_params = [{transform_indices = @transform_0, window_bounds = array<i64: 1, 1, 4, 362>}, {transform_indices = @transform_1, window_bounds = array<i64: 1, 1, 4, 362>}, {transform_indices = @transform_2, window_bounds = array<i64: 1, 1, 4, 362>}, {pipeline_mode = #tpu.pipeline_mode<synchronous>, transform_indices = @transform_3, window_bounds = array<i64: 27, 4, 4>}, {pipeline_mode = #tpu.pipeline_mode<synchronous>, transform_indices = @transform_4, window_bounds = array<i64: 4, 1>}, {pipeline_mode = #tpu.pipeline_mode<synchronous>, transform_indices = @transform_5, window_bounds = array<i64: 1, 324>}, {transform_indices = @transform_6, window_bounds = array<i64: 1, 1, 4, 324>}]} {
    %cst = arith.constant 0.000000e+00 : f32
    %0 = vector.broadcast %cst : f32 to vector<4x324xf32>
    %c0 = arith.constant 0 : index
    %c0_0 = arith.constant 0 : index
    %c0_1 = arith.constant 0 : index
    %c0_2 = arith.constant 0 : index
    %1 = vector.load %arg2[%c0, %c0_0, %c0_1, %c0_2] : memref<1x1x4x362xf32, #tpu.memory_space<vmem>>, vector<1x1x4x362xf32>
    %2 = vector.shape_cast %1 : vector<1x1x4x362xf32> to vector<4x362xf32>
    %3 = vector.extract_strided_slice %2 {offsets = [0, 0], sizes = [4, 324], strides = [1, 1]} : vector<4x362xf32> to vector<4x324xf32>
    %c0_3 = arith.constant 0 : index
    %c0_4 = arith.constant 0 : index
    %c0_5 = arith.constant 0 : index
    %4 = vector.load %arg5[%c0_3, %c0_4, %c0_5] : memref<27x4x4xf32, #tpu.memory_space<vmem>>, vector<1x4x4xf32>
    %5 = vector.shape_cast %4 : vector<1x4x4xf32> to vector<4x4xf32>
    %cst_6 = arith.constant dense<0.000000e+00> : vector<4x324xf32>
    %6 = tpu.matmul %5, %3, %cst_6 {dimension_numbers = #tpu.dot_dimension_numbers<[1], [0], [0], [1], [0, 0, 1, 1], [], []>} : vector<4x4xf32>, vector<4x324xf32>, vector<4x324xf32> -> vector<4x324xf32>
    %7 = arith.addf %0, %6 : vector<4x324xf32>
    %8 = vector.extract_strided_slice %2 {offsets = [0, 1], sizes = [4, 324], strides = [1, 1]} : vector<4x362xf32> to vector<4x324xf32>
    %c1 = arith.constant 1 : index
    %c0_7 = arith.constant 0 : index
    %c0_8 = arith.constant 0 : index
    %9 = vector.load %arg5[%c1, %c0_7, %c0_8] : memref<27x4x4xf32, #tpu.memory_space<vmem>>, vector<1x4x4xf32>
    %10 = vector.shape_cast %9 : vector<1x4x4xf32> to vector<4x4xf32>
    %cst_9 = arith.constant dense<0.000000e+00> : vector<4x324xf32>
    %11 = tpu.matmul %10, %8, %cst_9 {dimension_numbers = #tpu.dot_dimension_numbers<[1], [0], [0], [1], [0, 0, 1, 1], [], []>} : vector<4x4xf32>, vector<4x324xf32>, vector<4x324xf32> -> vector<4x324xf32>
    %12 = arith.addf %7, %11 : vector<4x324xf32>
    %13 = vector.extract_strided_slice %2 {offsets = [0, 2], sizes = [4, 324], strides = [1, 1]} : vector<4x362xf32> to vector<4x324xf32>
    %c2 = arith.constant 2 : index
    %c0_10 = arith.constant 0 : index
    %c0_11 = arith.constant 0 : index
    %14 = vector.load %arg5[%c2, %c0_10, %c0_11] : memref<27x4x4xf32, #tpu.memory_space<vmem>>, vector<1x4x4xf32>
    %15 = vector.shape_cast %14 : vector<1x4x4xf32> to vector<4x4xf32>
    %cst_12 = arith.constant dense<0.000000e+00> : vector<4x324xf32>
    %16 = tpu.matmul %15, %13, %cst_12 {dimension_numbers = #tpu.dot_dimension_numbers<[1], [0], [0], [1], [0, 0, 1, 1], [], []>} : vector<4x4xf32>, vector<4x324xf32>, vector<4x324xf32> -> vector<4x324xf32>
    %17 = arith.addf %12, %16 : vector<4x324xf32>
    %18 = vector.extract_strided_slice %2 {offsets = [0, 18], sizes = [4, 324], strides = [1, 1]} : vector<4x362xf32> to vector<4x324xf32>
    %c3 = arith.constant 3 : index
    %c0_13 = arith.constant 0 : index
    %c0_14 = arith.constant 0 : index
    %19 = vector.load %arg5[%c3, %c0_13, %c0_14] : memref<27x4x4xf32, #tpu.memory_space<vmem>>, vector<1x4x4xf32>
    %20 = vector.shape_cast %19 : vector<1x4x4xf32> to vector<4x4xf32>
    %cst_15 = arith.constant dense<0.000000e+00> : vector<4x324xf32>
    %21 = tpu.matmul %20, %18, %cst_15 {dimension_numbers = #tpu.dot_dimension_numbers<[1], [0], [0], [1], [0, 0, 1, 1], [], []>} : vector<4x4xf32>, vector<4x324xf32>, vector<4x324xf32> -> vector<4x324xf32>
    %22 = arith.addf %17, %21 : vector<4x324xf32>
    %23 = vector.extract_strided_slice %2 {offsets = [0, 19], sizes = [4, 324], strides = [1, 1]} : vector<4x362xf32> to vector<4x324xf32>
    %c4 = arith.constant 4 : index
    %c0_16 = arith.constant 0 : index
    %c0_17 = arith.constant 0 : index
    %24 = vector.load %arg5[%c4, %c0_16, %c0_17] : memref<27x4x4xf32, #tpu.memory_space<vmem>>, vector<1x4x4xf32>
    %25 = vector.shape_cast %24 : vector<1x4x4xf32> to vector<4x4xf32>
    %cst_18 = arith.constant dense<0.000000e+00> : vector<4x324xf32>
    %26 = tpu.matmul %25, %23, %cst_18 {dimension_numbers = #tpu.dot_dimension_numbers<[1], [0], [0], [1], [0, 0, 1, 1], [], []>} : vector<4x4xf32>, vector<4x324xf32>, vector<4x324xf32> -> vector<4x324xf32>
    %27 = arith.addf %22, %26 : vector<4x324xf32>
    %28 = vector.extract_strided_slice %2 {offsets = [0, 20], sizes = [4, 324], strides = [1, 1]} : vector<4x362xf32> to vector<4x324xf32>
    %c5 = arith.constant 5 : index
    %c0_19 = arith.constant 0 : index
    %c0_20 = arith.constant 0 : index
    %29 = vector.load %arg5[%c5, %c0_19, %c0_20] : memref<27x4x4xf32, #tpu.memory_space<vmem>>, vector<1x4x4xf32>
    %30 = vector.shape_cast %29 : vector<1x4x4xf32> to vector<4x4xf32>
    %cst_21 = arith.constant dense<0.000000e+00> : vector<4x324xf32>
    %31 = tpu.matmul %30, %28, %cst_21 {dimension_numbers = #tpu.dot_dimension_numbers<[1], [0], [0], [1], [0, 0, 1, 1], [], []>} : vector<4x4xf32>, vector<4x324xf32>, vector<4x324xf32> -> vector<4x324xf32>
    %32 = arith.addf %27, %31 : vector<4x324xf32>
    %33 = vector.extract_strided_slice %2 {offsets = [0, 36], sizes = [4, 324], strides = [1, 1]} : vector<4x362xf32> to vector<4x324xf32>
    %c6 = arith.constant 6 : index
    %c0_22 = arith.constant 0 : index
    %c0_23 = arith.constant 0 : index
    %34 = vector.load %arg5[%c6, %c0_22, %c0_23] : memref<27x4x4xf32, #tpu.memory_space<vmem>>, vector<1x4x4xf32>
    %35 = vector.shape_cast %34 : vector<1x4x4xf32> to vector<4x4xf32>
    %cst_24 = arith.constant dense<0.000000e+00> : vector<4x324xf32>
    %36 = tpu.matmul %35, %33, %cst_24 {dimension_numbers = #tpu.dot_dimension_numbers<[1], [0], [0], [1], [0, 0, 1, 1], [], []>} : vector<4x4xf32>, vector<4x324xf32>, vector<4x324xf32> -> vector<4x324xf32>
    %37 = arith.addf %32, %36 : vector<4x324xf32>
    %38 = vector.extract_strided_slice %2 {offsets = [0, 37], sizes = [4, 324], strides = [1, 1]} : vector<4x362xf32> to vector<4x324xf32>
    %c7 = arith.constant 7 : index
    %c0_25 = arith.constant 0 : index
    %c0_26 = arith.constant 0 : index
    %39 = vector.load %arg5[%c7, %c0_25, %c0_26] : memref<27x4x4xf32, #tpu.memory_space<vmem>>, vector<1x4x4xf32>
    %40 = vector.shape_cast %39 : vector<1x4x4xf32> to vector<4x4xf32>
    %cst_27 = arith.constant dense<0.000000e+00> : vector<4x324xf32>
    %41 = tpu.matmul %40, %38, %cst_27 {dimension_numbers = #tpu.dot_dimension_numbers<[1], [0], [0], [1], [0, 0, 1, 1], [], []>} : vector<4x4xf32>, vector<4x324xf32>, vector<4x324xf32> -> vector<4x324xf32>
    %42 = arith.addf %37, %41 : vector<4x324xf32>
    %43 = vector.extract_strided_slice %2 {offsets = [0, 38], sizes = [4, 324], strides = [1, 1]} : vector<4x362xf32> to vector<4x324xf32>
    %c8 = arith.constant 8 : index
    %c0_28 = arith.constant 0 : index
    %c0_29 = arith.constant 0 : index
    %44 = vector.load %arg5[%c8, %c0_28, %c0_29] : memref<27x4x4xf32, #tpu.memory_space<vmem>>, vector<1x4x4xf32>
    %45 = vector.shape_cast %44 : vector<1x4x4xf32> to vector<4x4xf32>
    %cst_30 = arith.constant dense<0.000000e+00> : vector<4x324xf32>
    %46 = tpu.matmul %45, %43, %cst_30 {dimension_numbers = #tpu.dot_dimension_numbers<[1], [0], [0], [1], [0, 0, 1, 1], [], []>} : vector<4x4xf32>, vector<4x324xf32>, vector<4x324xf32> -> vector<4x324xf32>
    %47 = arith.addf %42, %46 : vector<4x324xf32>
    %c0_31 = arith.constant 0 : index
    %c0_32 = arith.constant 0 : index
    %c0_33 = arith.constant 0 : index
    %c0_34 = arith.constant 0 : index
    %48 = vector.load %arg3[%c0_31, %c0_32, %c0_33, %c0_34] : memref<1x1x4x362xf32, #tpu.memory_space<vmem>>, vector<1x1x4x362xf32>
    %49 = vector.shape_cast %48 : vector<1x1x4x362xf32> to vector<4x362xf32>
    %50 = vector.extract_strided_slice %49 {offsets = [0, 0], sizes = [4, 324], strides = [1, 1]} : vector<4x362xf32> to vector<4x324xf32>
    %c9 = arith.constant 9 : index
    %c0_35 = arith.constant 0 : index
    %c0_36 = arith.constant 0 : index
    %51 = vector.load %arg5[%c9, %c0_35, %c0_36] : memref<27x4x4xf32, #tpu.memory_space<vmem>>, vector<1x4x4xf32>
    %52 = vector.shape_cast %51 : vector<1x4x4xf32> to vector<4x4xf32>
    %cst_37 = arith.constant dense<0.000000e+00> : vector<4x324xf32>
    %53 = tpu.matmul %52, %50, %cst_37 {dimension_numbers = #tpu.dot_dimension_numbers<[1], [0], [0], [1], [0, 0, 1, 1], [], []>} : vector<4x4xf32>, vector<4x324xf32>, vector<4x324xf32> -> vector<4x324xf32>
    %54 = arith.addf %47, %53 : vector<4x324xf32>
    %55 = vector.extract_strided_slice %49 {offsets = [0, 1], sizes = [4, 324], strides = [1, 1]} : vector<4x362xf32> to vector<4x324xf32>
    %c10 = arith.constant 10 : index
    %c0_38 = arith.constant 0 : index
    %c0_39 = arith.constant 0 : index
    %56 = vector.load %arg5[%c10, %c0_38, %c0_39] : memref<27x4x4xf32, #tpu.memory_space<vmem>>, vector<1x4x4xf32>
    %57 = vector.shape_cast %56 : vector<1x4x4xf32> to vector<4x4xf32>
    %cst_40 = arith.constant dense<0.000000e+00> : vector<4x324xf32>
    %58 = tpu.matmul %57, %55, %cst_40 {dimension_numbers = #tpu.dot_dimension_numbers<[1], [0], [0], [1], [0, 0, 1, 1], [], []>} : vector<4x4xf32>, vector<4x324xf32>, vector<4x324xf32> -> vector<4x324xf32>
    %59 = arith.addf %54, %58 : vector<4x324xf32>
    %60 = vector.extract_strided_slice %49 {offsets = [0, 2], sizes = [4, 324], strides = [1, 1]} : vector<4x362xf32> to vector<4x324xf32>
    %c11 = arith.constant 11 : index
    %c0_41 = arith.constant 0 : index
    %c0_42 = arith.constant 0 : index
    %61 = vector.load %arg5[%c11, %c0_41, %c0_42] : memref<27x4x4xf32, #tpu.memory_space<vmem>>, vector<1x4x4xf32>
    %62 = vector.shape_cast %61 : vector<1x4x4xf32> to vector<4x4xf32>
    %cst_43 = arith.constant dense<0.000000e+00> : vector<4x324xf32>
    %63 = tpu.matmul %62, %60, %cst_43 {dimension_numbers = #tpu.dot_dimension_numbers<[1], [0], [0], [1], [0, 0, 1, 1], [], []>} : vector<4x4xf32>, vector<4x324xf32>, vector<4x324xf32> -> vector<4x324xf32>
    %64 = arith.addf %59, %63 : vector<4x324xf32>
    %65 = vector.extract_strided_slice %49 {offsets = [0, 18], sizes = [4, 324], strides = [1, 1]} : vector<4x362xf32> to vector<4x324xf32>
    %c12 = arith.constant 12 : index
    %c0_44 = arith.constant 0 : index
    %c0_45 = arith.constant 0 : index
    %66 = vector.load %arg5[%c12, %c0_44, %c0_45] : memref<27x4x4xf32, #tpu.memory_space<vmem>>, vector<1x4x4xf32>
    %67 = vector.shape_cast %66 : vector<1x4x4xf32> to vector<4x4xf32>
    %cst_46 = arith.constant dense<0.000000e+00> : vector<4x324xf32>
    %68 = tpu.matmul %67, %65, %cst_46 {dimension_numbers = #tpu.dot_dimension_numbers<[1], [0], [0], [1], [0, 0, 1, 1], [], []>} : vector<4x4xf32>, vector<4x324xf32>, vector<4x324xf32> -> vector<4x324xf32>
    %69 = arith.addf %64, %68 : vector<4x324xf32>
    %70 = vector.extract_strided_slice %49 {offsets = [0, 19], sizes = [4, 324], strides = [1, 1]} : vector<4x362xf32> to vector<4x324xf32>
    %c13 = arith.constant 13 : index
    %c0_47 = arith.constant 0 : index
    %c0_48 = arith.constant 0 : index
    %71 = vector.load %arg5[%c13, %c0_47, %c0_48] : memref<27x4x4xf32, #tpu.memory_space<vmem>>, vector<1x4x4xf32>
    %72 = vector.shape_cast %71 : vector<1x4x4xf32> to vector<4x4xf32>
    %cst_49 = arith.constant dense<0.000000e+00> : vector<4x324xf32>
    %73 = tpu.matmul %72, %70, %cst_49 {dimension_numbers = #tpu.dot_dimension_numbers<[1], [0], [0], [1], [0, 0, 1, 1], [], []>} : vector<4x4xf32>, vector<4x324xf32>, vector<4x324xf32> -> vector<4x324xf32>
    %74 = arith.addf %69, %73 : vector<4x324xf32>
    %75 = vector.extract_strided_slice %49 {offsets = [0, 20], sizes = [4, 324], strides = [1, 1]} : vector<4x362xf32> to vector<4x324xf32>
    %c14 = arith.constant 14 : index
    %c0_50 = arith.constant 0 : index
    %c0_51 = arith.constant 0 : index
    %76 = vector.load %arg5[%c14, %c0_50, %c0_51] : memref<27x4x4xf32, #tpu.memory_space<vmem>>, vector<1x4x4xf32>
    %77 = vector.shape_cast %76 : vector<1x4x4xf32> to vector<4x4xf32>
    %cst_52 = arith.constant dense<0.000000e+00> : vector<4x324xf32>
    %78 = tpu.matmul %77, %75, %cst_52 {dimension_numbers = #tpu.dot_dimension_numbers<[1], [0], [0], [1], [0, 0, 1, 1], [], []>} : vector<4x4xf32>, vector<4x324xf32>, vector<4x324xf32> -> vector<4x324xf32>
    %79 = arith.addf %74, %78 : vector<4x324xf32>
    %80 = vector.extract_strided_slice %49 {offsets = [0, 36], sizes = [4, 324], strides = [1, 1]} : vector<4x362xf32> to vector<4x324xf32>
    %c15 = arith.constant 15 : index
    %c0_53 = arith.constant 0 : index
    %c0_54 = arith.constant 0 : index
    %81 = vector.load %arg5[%c15, %c0_53, %c0_54] : memref<27x4x4xf32, #tpu.memory_space<vmem>>, vector<1x4x4xf32>
    %82 = vector.shape_cast %81 : vector<1x4x4xf32> to vector<4x4xf32>
    %cst_55 = arith.constant dense<0.000000e+00> : vector<4x324xf32>
    %83 = tpu.matmul %82, %80, %cst_55 {dimension_numbers = #tpu.dot_dimension_numbers<[1], [0], [0], [1], [0, 0, 1, 1], [], []>} : vector<4x4xf32>, vector<4x324xf32>, vector<4x324xf32> -> vector<4x324xf32>
    %84 = arith.addf %79, %83 : vector<4x324xf32>
    %85 = vector.extract_strided_slice %49 {offsets = [0, 37], sizes = [4, 324], strides = [1, 1]} : vector<4x362xf32> to vector<4x324xf32>
    %c16 = arith.constant 16 : index
    %c0_56 = arith.constant 0 : index
    %c0_57 = arith.constant 0 : index
    %86 = vector.load %arg5[%c16, %c0_56, %c0_57] : memref<27x4x4xf32, #tpu.memory_space<vmem>>, vector<1x4x4xf32>
    %87 = vector.shape_cast %86 : vector<1x4x4xf32> to vector<4x4xf32>
    %cst_58 = arith.constant dense<0.000000e+00> : vector<4x324xf32>
    %88 = tpu.matmul %87, %85, %cst_58 {dimension_numbers = #tpu.dot_dimension_numbers<[1], [0], [0], [1], [0, 0, 1, 1], [], []>} : vector<4x4xf32>, vector<4x324xf32>, vector<4x324xf32> -> vector<4x324xf32>
    %89 = arith.addf %84, %88 : vector<4x324xf32>
    %90 = vector.extract_strided_slice %49 {offsets = [0, 38], sizes = [4, 324], strides = [1, 1]} : vector<4x362xf32> to vector<4x324xf32>
    %c17 = arith.constant 17 : index
    %c0_59 = arith.constant 0 : index
    %c0_60 = arith.constant 0 : index
    %91 = vector.load %arg5[%c17, %c0_59, %c0_60] : memref<27x4x4xf32, #tpu.memory_space<vmem>>, vector<1x4x4xf32>
    %92 = vector.shape_cast %91 : vector<1x4x4xf32> to vector<4x4xf32>
    %cst_61 = arith.constant dense<0.000000e+00> : vector<4x324xf32>
    %93 = tpu.matmul %92, %90, %cst_61 {dimension_numbers = #tpu.dot_dimension_numbers<[1], [0], [0], [1], [0, 0, 1, 1], [], []>} : vector<4x4xf32>, vector<4x324xf32>, vector<4x324xf32> -> vector<4x324xf32>
    %94 = arith.addf %89, %93 : vector<4x324xf32>
    %c0_62 = arith.constant 0 : index
    %c0_63 = arith.constant 0 : index
    %c0_64 = arith.constant 0 : index
    %c0_65 = arith.constant 0 : index
    %95 = vector.load %arg4[%c0_62, %c0_63, %c0_64, %c0_65] : memref<1x1x4x362xf32, #tpu.memory_space<vmem>>, vector<1x1x4x362xf32>
    %96 = vector.shape_cast %95 : vector<1x1x4x362xf32> to vector<4x362xf32>
    %97 = vector.extract_strided_slice %96 {offsets = [0, 0], sizes = [4, 324], strides = [1, 1]} : vector<4x362xf32> to vector<4x324xf32>
    %c18 = arith.constant 18 : index
    %c0_66 = arith.constant 0 : index
    %c0_67 = arith.constant 0 : index
    %98 = vector.load %arg5[%c18, %c0_66, %c0_67] : memref<27x4x4xf32, #tpu.memory_space<vmem>>, vector<1x4x4xf32>
    %99 = vector.shape_cast %98 : vector<1x4x4xf32> to vector<4x4xf32>
    %cst_68 = arith.constant dense<0.000000e+00> : vector<4x324xf32>
    %100 = tpu.matmul %99, %97, %cst_68 {dimension_numbers = #tpu.dot_dimension_numbers<[1], [0], [0], [1], [0, 0, 1, 1], [], []>} : vector<4x4xf32>, vector<4x324xf32>, vector<4x324xf32> -> vector<4x324xf32>
    %101 = arith.addf %94, %100 : vector<4x324xf32>
    %102 = vector.extract_strided_slice %96 {offsets = [0, 1], sizes = [4, 324], strides = [1, 1]} : vector<4x362xf32> to vector<4x324xf32>
    %c19 = arith.constant 19 : index
    %c0_69 = arith.constant 0 : index
    %c0_70 = arith.constant 0 : index
    %103 = vector.load %arg5[%c19, %c0_69, %c0_70] : memref<27x4x4xf32, #tpu.memory_space<vmem>>, vector<1x4x4xf32>
    %104 = vector.shape_cast %103 : vector<1x4x4xf32> to vector<4x4xf32>
    %cst_71 = arith.constant dense<0.000000e+00> : vector<4x324xf32>
    %105 = tpu.matmul %104, %102, %cst_71 {dimension_numbers = #tpu.dot_dimension_numbers<[1], [0], [0], [1], [0, 0, 1, 1], [], []>} : vector<4x4xf32>, vector<4x324xf32>, vector<4x324xf32> -> vector<4x324xf32>
    %106 = arith.addf %101, %105 : vector<4x324xf32>
    %107 = vector.extract_strided_slice %96 {offsets = [0, 2], sizes = [4, 324], strides = [1, 1]} : vector<4x362xf32> to vector<4x324xf32>
    %c20 = arith.constant 20 : index
    %c0_72 = arith.constant 0 : index
    %c0_73 = arith.constant 0 : index
    %108 = vector.load %arg5[%c20, %c0_72, %c0_73] : memref<27x4x4xf32, #tpu.memory_space<vmem>>, vector<1x4x4xf32>
    %109 = vector.shape_cast %108 : vector<1x4x4xf32> to vector<4x4xf32>
    %cst_74 = arith.constant dense<0.000000e+00> : vector<4x324xf32>
    %110 = tpu.matmul %109, %107, %cst_74 {dimension_numbers = #tpu.dot_dimension_numbers<[1], [0], [0], [1], [0, 0, 1, 1], [], []>} : vector<4x4xf32>, vector<4x324xf32>, vector<4x324xf32> -> vector<4x324xf32>
    %111 = arith.addf %106, %110 : vector<4x324xf32>
    %112 = vector.extract_strided_slice %96 {offsets = [0, 18], sizes = [4, 324], strides = [1, 1]} : vector<4x362xf32> to vector<4x324xf32>
    %c21 = arith.constant 21 : index
    %c0_75 = arith.constant 0 : index
    %c0_76 = arith.constant 0 : index
    %113 = vector.load %arg5[%c21, %c0_75, %c0_76] : memref<27x4x4xf32, #tpu.memory_space<vmem>>, vector<1x4x4xf32>
    %114 = vector.shape_cast %113 : vector<1x4x4xf32> to vector<4x4xf32>
    %cst_77 = arith.constant dense<0.000000e+00> : vector<4x324xf32>
    %115 = tpu.matmul %114, %112, %cst_77 {dimension_numbers = #tpu.dot_dimension_numbers<[1], [0], [0], [1], [0, 0, 1, 1], [], []>} : vector<4x4xf32>, vector<4x324xf32>, vector<4x324xf32> -> vector<4x324xf32>
    %116 = arith.addf %111, %115 : vector<4x324xf32>
    %117 = vector.extract_strided_slice %96 {offsets = [0, 19], sizes = [4, 324], strides = [1, 1]} : vector<4x362xf32> to vector<4x324xf32>
    %c22 = arith.constant 22 : index
    %c0_78 = arith.constant 0 : index
    %c0_79 = arith.constant 0 : index
    %118 = vector.load %arg5[%c22, %c0_78, %c0_79] : memref<27x4x4xf32, #tpu.memory_space<vmem>>, vector<1x4x4xf32>
    %119 = vector.shape_cast %118 : vector<1x4x4xf32> to vector<4x4xf32>
    %cst_80 = arith.constant dense<0.000000e+00> : vector<4x324xf32>
    %120 = tpu.matmul %119, %117, %cst_80 {dimension_numbers = #tpu.dot_dimension_numbers<[1], [0], [0], [1], [0, 0, 1, 1], [], []>} : vector<4x4xf32>, vector<4x324xf32>, vector<4x324xf32> -> vector<4x324xf32>
    %121 = arith.addf %116, %120 : vector<4x324xf32>
    %122 = vector.extract_strided_slice %96 {offsets = [0, 20], sizes = [4, 324], strides = [1, 1]} : vector<4x362xf32> to vector<4x324xf32>
    %c23 = arith.constant 23 : index
    %c0_81 = arith.constant 0 : index
    %c0_82 = arith.constant 0 : index
    %123 = vector.load %arg5[%c23, %c0_81, %c0_82] : memref<27x4x4xf32, #tpu.memory_space<vmem>>, vector<1x4x4xf32>
    %124 = vector.shape_cast %123 : vector<1x4x4xf32> to vector<4x4xf32>
    %cst_83 = arith.constant dense<0.000000e+00> : vector<4x324xf32>
    %125 = tpu.matmul %124, %122, %cst_83 {dimension_numbers = #tpu.dot_dimension_numbers<[1], [0], [0], [1], [0, 0, 1, 1], [], []>} : vector<4x4xf32>, vector<4x324xf32>, vector<4x324xf32> -> vector<4x324xf32>
    %126 = arith.addf %121, %125 : vector<4x324xf32>
    %127 = vector.extract_strided_slice %96 {offsets = [0, 36], sizes = [4, 324], strides = [1, 1]} : vector<4x362xf32> to vector<4x324xf32>
    %c24 = arith.constant 24 : index
    %c0_84 = arith.constant 0 : index
    %c0_85 = arith.constant 0 : index
    %128 = vector.load %arg5[%c24, %c0_84, %c0_85] : memref<27x4x4xf32, #tpu.memory_space<vmem>>, vector<1x4x4xf32>
    %129 = vector.shape_cast %128 : vector<1x4x4xf32> to vector<4x4xf32>
    %cst_86 = arith.constant dense<0.000000e+00> : vector<4x324xf32>
    %130 = tpu.matmul %129, %127, %cst_86 {dimension_numbers = #tpu.dot_dimension_numbers<[1], [0], [0], [1], [0, 0, 1, 1], [], []>} : vector<4x4xf32>, vector<4x324xf32>, vector<4x324xf32> -> vector<4x324xf32>
    %131 = arith.addf %126, %130 : vector<4x324xf32>
    %132 = vector.extract_strided_slice %96 {offsets = [0, 37], sizes = [4, 324], strides = [1, 1]} : vector<4x362xf32> to vector<4x324xf32>
    %c25 = arith.constant 25 : index
    %c0_87 = arith.constant 0 : index
    %c0_88 = arith.constant 0 : index
    %133 = vector.load %arg5[%c25, %c0_87, %c0_88] : memref<27x4x4xf32, #tpu.memory_space<vmem>>, vector<1x4x4xf32>
    %134 = vector.shape_cast %133 : vector<1x4x4xf32> to vector<4x4xf32>
    %cst_89 = arith.constant dense<0.000000e+00> : vector<4x324xf32>
    %135 = tpu.matmul %134, %132, %cst_89 {dimension_numbers = #tpu.dot_dimension_numbers<[1], [0], [0], [1], [0, 0, 1, 1], [], []>} : vector<4x4xf32>, vector<4x324xf32>, vector<4x324xf32> -> vector<4x324xf32>
    %136 = arith.addf %131, %135 : vector<4x324xf32>
    %137 = vector.extract_strided_slice %96 {offsets = [0, 38], sizes = [4, 324], strides = [1, 1]} : vector<4x362xf32> to vector<4x324xf32>
    %c26 = arith.constant 26 : index
    %c0_90 = arith.constant 0 : index
    %c0_91 = arith.constant 0 : index
    %138 = vector.load %arg5[%c26, %c0_90, %c0_91] : memref<27x4x4xf32, #tpu.memory_space<vmem>>, vector<1x4x4xf32>
    %139 = vector.shape_cast %138 : vector<1x4x4xf32> to vector<4x4xf32>
    %cst_92 = arith.constant dense<0.000000e+00> : vector<4x324xf32>
    %140 = tpu.matmul %139, %137, %cst_92 {dimension_numbers = #tpu.dot_dimension_numbers<[1], [0], [0], [1], [0, 0, 1, 1], [], []>} : vector<4x4xf32>, vector<4x324xf32>, vector<4x324xf32> -> vector<4x324xf32>
    %141 = arith.addf %136, %140 : vector<4x324xf32>
    %c0_93 = arith.constant 0 : index
    %c0_94 = arith.constant 0 : index
    %142 = vector.load %arg6[%c0_93, %c0_94] : memref<4x1xf32, #tpu.memory_space<vmem>>, vector<4x1xf32>
    %143 = vector.broadcast %142 : vector<4x1xf32> to vector<4x324xf32>
    %144 = arith.addf %141, %143 : vector<4x324xf32>
    %cst_95 = arith.constant 0.000000e+00 : f32
    %145 = vector.broadcast %cst_95 : f32 to vector<4x324xf32>
    %146 = arith.maximumf %144, %145 : vector<4x324xf32>
    %c0_96 = arith.constant 0 : index
    %c0_97 = arith.constant 0 : index
    %147 = vector.load %arg7[%c0_96, %c0_97] : memref<1x324xf32, #tpu.memory_space<vmem>>, vector<1x324xf32>
    %148 = vector.broadcast %147 : vector<1x324xf32> to vector<4x324xf32>
    %149 = arith.mulf %146, %148 : vector<4x324xf32>
    %c0_98 = arith.constant 0 : index
    %c0_99 = arith.constant 0 : index
    %c0_100 = arith.constant 0 : index
    %c0_101 = arith.constant 0 : index
    %150 = vector.load %arg8[%c0_98, %c0_99, %c0_100, %c0_101] : memref<1x1x4x324xf32, #tpu.memory_space<vmem>>, vector<1x1x4x324xf32>
    %151 = vector.shape_cast %150 : vector<1x1x4x324xf32> to vector<4x324xf32>
    %152 = vector.shape_cast %149 : vector<4x324xf32> to vector<1x1x4x324xf32>
    tpu.vector_store %arg8[%c0_98, %c0_99, %c0_100, %c0_101], %152 {strides = array<i32>} : memref<1x1x4x324xf32, #tpu.memory_space<vmem>>, vector<1x1x4x324xf32>,
    return
  }
  func.func @transform_0(%arg0: i32, %arg1: i32) -> (i32, i32, i32, i32) {
    %c0_i32 = arith.constant 0 : i32
    %0 = arith.addi %arg1, %c0_i32 : i32
    %c0_i32_0 = arith.constant 0 : i32
    %c0_i32_1 = arith.constant 0 : i32
    %c0_i32_2 = arith.constant 0 : i32
    return %arg0, %0, %c0_i32_0, %c0_i32_1 : i32, i32, i32, i32
  }
  func.func @transform_1(%arg0: i32, %arg1: i32) -> (i32, i32, i32, i32) {
    %c1_i32 = arith.constant 1 : i32
    %0 = arith.addi %arg1, %c1_i32 : i32
    %c0_i32 = arith.constant 0 : i32
    %c0_i32_0 = arith.constant 0 : i32
    %c0_i32_1 = arith.constant 0 : i32
    return %arg0, %0, %c0_i32, %c0_i32_0 : i32, i32, i32, i32
  }
  func.func @transform_2(%arg0: i32, %arg1: i32) -> (i32, i32, i32, i32) {
    %c2_i32 = arith.constant 2 : i32
    %0 = arith.addi %arg1, %c2_i32 : i32
    %c0_i32 = arith.constant 0 : i32
    %c0_i32_0 = arith.constant 0 : i32
    %c0_i32_1 = arith.constant 0 : i32
    return %arg0, %0, %c0_i32, %c0_i32_0 : i32, i32, i32, i32
  }
  func.func @transform_3(%arg0: i32, %arg1: i32) -> (i32, i32, i32) {
    %c0_i32 = arith.constant 0 : i32
    %c0_i32_0 = arith.constant 0 : i32
    %c0_i32_1 = arith.constant 0 : i32
    %c0_i32_2 = arith.constant 0 : i32
    return %c0_i32, %c0_i32_0, %c0_i32_1 : i32, i32, i32
  }
  func.func @transform_4(%arg0: i32, %arg1: i32) -> (i32, i32) {
    %c0_i32 = arith.constant 0 : i32
    %c0_i32_0 = arith.constant 0 : i32
    %c0_i32_1 = arith.constant 0 : i32
    return %c0_i32, %c0_i32_0 : i32, i32
  }
  func.func @transform_5(%arg0: i32, %arg1: i32) -> (i32, i32) {
    %c0_i32 = arith.constant 0 : i32
    %c0_i32_0 = arith.constant 0 : i32
    %c0_i32_1 = arith.constant 0 : i32
    return %c0_i32, %c0_i32_0 : i32, i32
  }
  func.func @transform_6(%arg0: i32, %arg1: i32) -> (i32, i32, i32, i32) {
    %c0_i32 = arith.constant 0 : i32
    %c0_i32_0 = arith.constant 0 : i32
    %c0_i32_1 = arith.constant 0 : i32
    return %arg0, %arg1, %c0_i32, %c0_i32_0 : i32, i32, i32, i32
  }
}

module attributes {stable_mosaic.version = 11 : i64} {
  func.func @_conv3x3x3_kernel(%arg0: i32, %arg1: i32, %arg2: memref<1x1x4x362xf32, #tpu.memory_space<vmem>>, %arg3: memref<1x1x4x362xf32, #tpu.memory_space<vmem>>, %arg4: memref<1x1x4x362xf32, #tpu.memory_space<vmem>>, %arg5: memref<27x8x4xf32, #tpu.memory_space<vmem>>, %arg6: memref<8x1xf32, #tpu.memory_space<vmem>>, %arg7: memref<1x324xf32, #tpu.memory_space<vmem>>, %arg8: memref<1x1x8x324xf32, #tpu.memory_space<vmem>>) attributes {dimension_semantics = [#tpu.dimension_semantics<parallel>, #tpu.dimension_semantics<parallel>], iteration_bounds = array<i64: 2, 8>, scalar_prefetch = 0 : i64, scratch_operands = 0 : i64, tpu.core_type = #tpu.core_type<tc>, window_params = [{transform_indices = @transform_0, window_bounds = array<i64: 1, 1, 4, 362>}, {transform_indices = @transform_1, window_bounds = array<i64: 1, 1, 4, 362>}, {transform_indices = @transform_2, window_bounds = array<i64: 1, 1, 4, 362>}, {pipeline_mode = #tpu.pipeline_mode<synchronous>, transform_indices = @transform_3, window_bounds = array<i64: 27, 8, 4>}, {pipeline_mode = #tpu.pipeline_mode<synchronous>, transform_indices = @transform_4, window_bounds = array<i64: 8, 1>}, {pipeline_mode = #tpu.pipeline_mode<synchronous>, transform_indices = @transform_5, window_bounds = array<i64: 1, 324>}, {transform_indices = @transform_6, window_bounds = array<i64: 1, 1, 8, 324>}]} {
    %cst = arith.constant 0.000000e+00 : f32
    %0 = vector.broadcast %cst : f32 to vector<8x324xf32>
    %c0 = arith.constant 0 : index
    %c0_0 = arith.constant 0 : index
    %c0_1 = arith.constant 0 : index
    %c0_2 = arith.constant 0 : index
    %1 = vector.load %arg2[%c0, %c0_0, %c0_1, %c0_2] : memref<1x1x4x362xf32, #tpu.memory_space<vmem>>, vector<1x1x4x362xf32>
    %2 = vector.shape_cast %1 : vector<1x1x4x362xf32> to vector<4x362xf32>
    %3 = vector.extract_strided_slice %2 {offsets = [0, 0], sizes = [4, 324], strides = [1, 1]} : vector<4x362xf32> to vector<4x324xf32>
    %c0_3 = arith.constant 0 : index
    %c0_4 = arith.constant 0 : index
    %c0_5 = arith.constant 0 : index
    %4 = vector.load %arg5[%c0_3, %c0_4, %c0_5] : memref<27x8x4xf32, #tpu.memory_space<vmem>>, vector<1x8x4xf32>
    %5 = vector.shape_cast %4 : vector<1x8x4xf32> to vector<8x4xf32>
    %cst_6 = arith.constant dense<0.000000e+00> : vector<8x324xf32>
    %6 = tpu.matmul %5, %3, %cst_6 {dimension_numbers = #tpu.dot_dimension_numbers<[1], [0], [0], [1], [0, 0, 1, 1], [], []>} : vector<8x4xf32>, vector<4x324xf32>, vector<8x324xf32> -> vector<8x324xf32>
    %7 = arith.addf %0, %6 : vector<8x324xf32>
    %8 = vector.extract_strided_slice %2 {offsets = [0, 1], sizes = [4, 324], strides = [1, 1]} : vector<4x362xf32> to vector<4x324xf32>
    %c1 = arith.constant 1 : index
    %c0_7 = arith.constant 0 : index
    %c0_8 = arith.constant 0 : index
    %9 = vector.load %arg5[%c1, %c0_7, %c0_8] : memref<27x8x4xf32, #tpu.memory_space<vmem>>, vector<1x8x4xf32>
    %10 = vector.shape_cast %9 : vector<1x8x4xf32> to vector<8x4xf32>
    %cst_9 = arith.constant dense<0.000000e+00> : vector<8x324xf32>
    %11 = tpu.matmul %10, %8, %cst_9 {dimension_numbers = #tpu.dot_dimension_numbers<[1], [0], [0], [1], [0, 0, 1, 1], [], []>} : vector<8x4xf32>, vector<4x324xf32>, vector<8x324xf32> -> vector<8x324xf32>
    %12 = arith.addf %7, %11 : vector<8x324xf32>
    %13 = vector.extract_strided_slice %2 {offsets = [0, 2], sizes = [4, 324], strides = [1, 1]} : vector<4x362xf32> to vector<4x324xf32>
    %c2 = arith.constant 2 : index
    %c0_10 = arith.constant 0 : index
    %c0_11 = arith.constant 0 : index
    %14 = vector.load %arg5[%c2, %c0_10, %c0_11] : memref<27x8x4xf32, #tpu.memory_space<vmem>>, vector<1x8x4xf32>
    %15 = vector.shape_cast %14 : vector<1x8x4xf32> to vector<8x4xf32>
    %cst_12 = arith.constant dense<0.000000e+00> : vector<8x324xf32>
    %16 = tpu.matmul %15, %13, %cst_12 {dimension_numbers = #tpu.dot_dimension_numbers<[1], [0], [0], [1], [0, 0, 1, 1], [], []>} : vector<8x4xf32>, vector<4x324xf32>, vector<8x324xf32> -> vector<8x324xf32>
    %17 = arith.addf %12, %16 : vector<8x324xf32>
    %18 = vector.extract_strided_slice %2 {offsets = [0, 18], sizes = [4, 324], strides = [1, 1]} : vector<4x362xf32> to vector<4x324xf32>
    %c3 = arith.constant 3 : index
    %c0_13 = arith.constant 0 : index
    %c0_14 = arith.constant 0 : index
    %19 = vector.load %arg5[%c3, %c0_13, %c0_14] : memref<27x8x4xf32, #tpu.memory_space<vmem>>, vector<1x8x4xf32>
    %20 = vector.shape_cast %19 : vector<1x8x4xf32> to vector<8x4xf32>
    %cst_15 = arith.constant dense<0.000000e+00> : vector<8x324xf32>
    %21 = tpu.matmul %20, %18, %cst_15 {dimension_numbers = #tpu.dot_dimension_numbers<[1], [0], [0], [1], [0, 0, 1, 1], [], []>} : vector<8x4xf32>, vector<4x324xf32>, vector<8x324xf32> -> vector<8x324xf32>
    %22 = arith.addf %17, %21 : vector<8x324xf32>
    %23 = vector.extract_strided_slice %2 {offsets = [0, 19], sizes = [4, 324], strides = [1, 1]} : vector<4x362xf32> to vector<4x324xf32>
    %c4 = arith.constant 4 : index
    %c0_16 = arith.constant 0 : index
    %c0_17 = arith.constant 0 : index
    %24 = vector.load %arg5[%c4, %c0_16, %c0_17] : memref<27x8x4xf32, #tpu.memory_space<vmem>>, vector<1x8x4xf32>
    %25 = vector.shape_cast %24 : vector<1x8x4xf32> to vector<8x4xf32>
    %cst_18 = arith.constant dense<0.000000e+00> : vector<8x324xf32>
    %26 = tpu.matmul %25, %23, %cst_18 {dimension_numbers = #tpu.dot_dimension_numbers<[1], [0], [0], [1], [0, 0, 1, 1], [], []>} : vector<8x4xf32>, vector<4x324xf32>, vector<8x324xf32> -> vector<8x324xf32>
    %27 = arith.addf %22, %26 : vector<8x324xf32>
    %28 = vector.extract_strided_slice %2 {offsets = [0, 20], sizes = [4, 324], strides = [1, 1]} : vector<4x362xf32> to vector<4x324xf32>
    %c5 = arith.constant 5 : index
    %c0_19 = arith.constant 0 : index
    %c0_20 = arith.constant 0 : index
    %29 = vector.load %arg5[%c5, %c0_19, %c0_20] : memref<27x8x4xf32, #tpu.memory_space<vmem>>, vector<1x8x4xf32>
    %30 = vector.shape_cast %29 : vector<1x8x4xf32> to vector<8x4xf32>
    %cst_21 = arith.constant dense<0.000000e+00> : vector<8x324xf32>
    %31 = tpu.matmul %30, %28, %cst_21 {dimension_numbers = #tpu.dot_dimension_numbers<[1], [0], [0], [1], [0, 0, 1, 1], [], []>} : vector<8x4xf32>, vector<4x324xf32>, vector<8x324xf32> -> vector<8x324xf32>
    %32 = arith.addf %27, %31 : vector<8x324xf32>
    %33 = vector.extract_strided_slice %2 {offsets = [0, 36], sizes = [4, 324], strides = [1, 1]} : vector<4x362xf32> to vector<4x324xf32>
    %c6 = arith.constant 6 : index
    %c0_22 = arith.constant 0 : index
    %c0_23 = arith.constant 0 : index
    %34 = vector.load %arg5[%c6, %c0_22, %c0_23] : memref<27x8x4xf32, #tpu.memory_space<vmem>>, vector<1x8x4xf32>
    %35 = vector.shape_cast %34 : vector<1x8x4xf32> to vector<8x4xf32>
    %cst_24 = arith.constant dense<0.000000e+00> : vector<8x324xf32>
    %36 = tpu.matmul %35, %33, %cst_24 {dimension_numbers = #tpu.dot_dimension_numbers<[1], [0], [0], [1], [0, 0, 1, 1], [], []>} : vector<8x4xf32>, vector<4x324xf32>, vector<8x324xf32> -> vector<8x324xf32>
    %37 = arith.addf %32, %36 : vector<8x324xf32>
    %38 = vector.extract_strided_slice %2 {offsets = [0, 37], sizes = [4, 324], strides = [1, 1]} : vector<4x362xf32> to vector<4x324xf32>
    %c7 = arith.constant 7 : index
    %c0_25 = arith.constant 0 : index
    %c0_26 = arith.constant 0 : index
    %39 = vector.load %arg5[%c7, %c0_25, %c0_26] : memref<27x8x4xf32, #tpu.memory_space<vmem>>, vector<1x8x4xf32>
    %40 = vector.shape_cast %39 : vector<1x8x4xf32> to vector<8x4xf32>
    %cst_27 = arith.constant dense<0.000000e+00> : vector<8x324xf32>
    %41 = tpu.matmul %40, %38, %cst_27 {dimension_numbers = #tpu.dot_dimension_numbers<[1], [0], [0], [1], [0, 0, 1, 1], [], []>} : vector<8x4xf32>, vector<4x324xf32>, vector<8x324xf32> -> vector<8x324xf32>
    %42 = arith.addf %37, %41 : vector<8x324xf32>
    %43 = vector.extract_strided_slice %2 {offsets = [0, 38], sizes = [4, 324], strides = [1, 1]} : vector<4x362xf32> to vector<4x324xf32>
    %c8 = arith.constant 8 : index
    %c0_28 = arith.constant 0 : index
    %c0_29 = arith.constant 0 : index
    %44 = vector.load %arg5[%c8, %c0_28, %c0_29] : memref<27x8x4xf32, #tpu.memory_space<vmem>>, vector<1x8x4xf32>
    %45 = vector.shape_cast %44 : vector<1x8x4xf32> to vector<8x4xf32>
    %cst_30 = arith.constant dense<0.000000e+00> : vector<8x324xf32>
    %46 = tpu.matmul %45, %43, %cst_30 {dimension_numbers = #tpu.dot_dimension_numbers<[1], [0], [0], [1], [0, 0, 1, 1], [], []>} : vector<8x4xf32>, vector<4x324xf32>, vector<8x324xf32> -> vector<8x324xf32>
    %47 = arith.addf %42, %46 : vector<8x324xf32>
    %c0_31 = arith.constant 0 : index
    %c0_32 = arith.constant 0 : index
    %c0_33 = arith.constant 0 : index
    %c0_34 = arith.constant 0 : index
    %48 = vector.load %arg3[%c0_31, %c0_32, %c0_33, %c0_34] : memref<1x1x4x362xf32, #tpu.memory_space<vmem>>, vector<1x1x4x362xf32>
    %49 = vector.shape_cast %48 : vector<1x1x4x362xf32> to vector<4x362xf32>
    %50 = vector.extract_strided_slice %49 {offsets = [0, 0], sizes = [4, 324], strides = [1, 1]} : vector<4x362xf32> to vector<4x324xf32>
    %c9 = arith.constant 9 : index
    %c0_35 = arith.constant 0 : index
    %c0_36 = arith.constant 0 : index
    %51 = vector.load %arg5[%c9, %c0_35, %c0_36] : memref<27x8x4xf32, #tpu.memory_space<vmem>>, vector<1x8x4xf32>
    %52 = vector.shape_cast %51 : vector<1x8x4xf32> to vector<8x4xf32>
    %cst_37 = arith.constant dense<0.000000e+00> : vector<8x324xf32>
    %53 = tpu.matmul %52, %50, %cst_37 {dimension_numbers = #tpu.dot_dimension_numbers<[1], [0], [0], [1], [0, 0, 1, 1], [], []>} : vector<8x4xf32>, vector<4x324xf32>, vector<8x324xf32> -> vector<8x324xf32>
    %54 = arith.addf %47, %53 : vector<8x324xf32>
    %55 = vector.extract_strided_slice %49 {offsets = [0, 1], sizes = [4, 324], strides = [1, 1]} : vector<4x362xf32> to vector<4x324xf32>
    %c10 = arith.constant 10 : index
    %c0_38 = arith.constant 0 : index
    %c0_39 = arith.constant 0 : index
    %56 = vector.load %arg5[%c10, %c0_38, %c0_39] : memref<27x8x4xf32, #tpu.memory_space<vmem>>, vector<1x8x4xf32>
    %57 = vector.shape_cast %56 : vector<1x8x4xf32> to vector<8x4xf32>
    %cst_40 = arith.constant dense<0.000000e+00> : vector<8x324xf32>
    %58 = tpu.matmul %57, %55, %cst_40 {dimension_numbers = #tpu.dot_dimension_numbers<[1], [0], [0], [1], [0, 0, 1, 1], [], []>} : vector<8x4xf32>, vector<4x324xf32>, vector<8x324xf32> -> vector<8x324xf32>
    %59 = arith.addf %54, %58 : vector<8x324xf32>
    %60 = vector.extract_strided_slice %49 {offsets = [0, 2], sizes = [4, 324], strides = [1, 1]} : vector<4x362xf32> to vector<4x324xf32>
    %c11 = arith.constant 11 : index
    %c0_41 = arith.constant 0 : index
    %c0_42 = arith.constant 0 : index
    %61 = vector.load %arg5[%c11, %c0_41, %c0_42] : memref<27x8x4xf32, #tpu.memory_space<vmem>>, vector<1x8x4xf32>
    %62 = vector.shape_cast %61 : vector<1x8x4xf32> to vector<8x4xf32>
    %cst_43 = arith.constant dense<0.000000e+00> : vector<8x324xf32>
    %63 = tpu.matmul %62, %60, %cst_43 {dimension_numbers = #tpu.dot_dimension_numbers<[1], [0], [0], [1], [0, 0, 1, 1], [], []>} : vector<8x4xf32>, vector<4x324xf32>, vector<8x324xf32> -> vector<8x324xf32>
    %64 = arith.addf %59, %63 : vector<8x324xf32>
    %65 = vector.extract_strided_slice %49 {offsets = [0, 18], sizes = [4, 324], strides = [1, 1]} : vector<4x362xf32> to vector<4x324xf32>
    %c12 = arith.constant 12 : index
    %c0_44 = arith.constant 0 : index
    %c0_45 = arith.constant 0 : index
    %66 = vector.load %arg5[%c12, %c0_44, %c0_45] : memref<27x8x4xf32, #tpu.memory_space<vmem>>, vector<1x8x4xf32>
    %67 = vector.shape_cast %66 : vector<1x8x4xf32> to vector<8x4xf32>
    %cst_46 = arith.constant dense<0.000000e+00> : vector<8x324xf32>
    %68 = tpu.matmul %67, %65, %cst_46 {dimension_numbers = #tpu.dot_dimension_numbers<[1], [0], [0], [1], [0, 0, 1, 1], [], []>} : vector<8x4xf32>, vector<4x324xf32>, vector<8x324xf32> -> vector<8x324xf32>
    %69 = arith.addf %64, %68 : vector<8x324xf32>
    %70 = vector.extract_strided_slice %49 {offsets = [0, 19], sizes = [4, 324], strides = [1, 1]} : vector<4x362xf32> to vector<4x324xf32>
    %c13 = arith.constant 13 : index
    %c0_47 = arith.constant 0 : index
    %c0_48 = arith.constant 0 : index
    %71 = vector.load %arg5[%c13, %c0_47, %c0_48] : memref<27x8x4xf32, #tpu.memory_space<vmem>>, vector<1x8x4xf32>
    %72 = vector.shape_cast %71 : vector<1x8x4xf32> to vector<8x4xf32>
    %cst_49 = arith.constant dense<0.000000e+00> : vector<8x324xf32>
    %73 = tpu.matmul %72, %70, %cst_49 {dimension_numbers = #tpu.dot_dimension_numbers<[1], [0], [0], [1], [0, 0, 1, 1], [], []>} : vector<8x4xf32>, vector<4x324xf32>, vector<8x324xf32> -> vector<8x324xf32>
    %74 = arith.addf %69, %73 : vector<8x324xf32>
    %75 = vector.extract_strided_slice %49 {offsets = [0, 20], sizes = [4, 324], strides = [1, 1]} : vector<4x362xf32> to vector<4x324xf32>
    %c14 = arith.constant 14 : index
    %c0_50 = arith.constant 0 : index
    %c0_51 = arith.constant 0 : index
    %76 = vector.load %arg5[%c14, %c0_50, %c0_51] : memref<27x8x4xf32, #tpu.memory_space<vmem>>, vector<1x8x4xf32>
    %77 = vector.shape_cast %76 : vector<1x8x4xf32> to vector<8x4xf32>
    %cst_52 = arith.constant dense<0.000000e+00> : vector<8x324xf32>
    %78 = tpu.matmul %77, %75, %cst_52 {dimension_numbers = #tpu.dot_dimension_numbers<[1], [0], [0], [1], [0, 0, 1, 1], [], []>} : vector<8x4xf32>, vector<4x324xf32>, vector<8x324xf32> -> vector<8x324xf32>
    %79 = arith.addf %74, %78 : vector<8x324xf32>
    %80 = vector.extract_strided_slice %49 {offsets = [0, 36], sizes = [4, 324], strides = [1, 1]} : vector<4x362xf32> to vector<4x324xf32>
    %c15 = arith.constant 15 : index
    %c0_53 = arith.constant 0 : index
    %c0_54 = arith.constant 0 : index
    %81 = vector.load %arg5[%c15, %c0_53, %c0_54] : memref<27x8x4xf32, #tpu.memory_space<vmem>>, vector<1x8x4xf32>
    %82 = vector.shape_cast %81 : vector<1x8x4xf32> to vector<8x4xf32>
    %cst_55 = arith.constant dense<0.000000e+00> : vector<8x324xf32>
    %83 = tpu.matmul %82, %80, %cst_55 {dimension_numbers = #tpu.dot_dimension_numbers<[1], [0], [0], [1], [0, 0, 1, 1], [], []>} : vector<8x4xf32>, vector<4x324xf32>, vector<8x324xf32> -> vector<8x324xf32>
    %84 = arith.addf %79, %83 : vector<8x324xf32>
    %85 = vector.extract_strided_slice %49 {offsets = [0, 37], sizes = [4, 324], strides = [1, 1]} : vector<4x362xf32> to vector<4x324xf32>
    %c16 = arith.constant 16 : index
    %c0_56 = arith.constant 0 : index
    %c0_57 = arith.constant 0 : index
    %86 = vector.load %arg5[%c16, %c0_56, %c0_57] : memref<27x8x4xf32, #tpu.memory_space<vmem>>, vector<1x8x4xf32>
    %87 = vector.shape_cast %86 : vector<1x8x4xf32> to vector<8x4xf32>
    %cst_58 = arith.constant dense<0.000000e+00> : vector<8x324xf32>
    %88 = tpu.matmul %87, %85, %cst_58 {dimension_numbers = #tpu.dot_dimension_numbers<[1], [0], [0], [1], [0, 0, 1, 1], [], []>} : vector<8x4xf32>, vector<4x324xf32>, vector<8x324xf32> -> vector<8x324xf32>
    %89 = arith.addf %84, %88 : vector<8x324xf32>
    %90 = vector.extract_strided_slice %49 {offsets = [0, 38], sizes = [4, 324], strides = [1, 1]} : vector<4x362xf32> to vector<4x324xf32>
    %c17 = arith.constant 17 : index
    %c0_59 = arith.constant 0 : index
    %c0_60 = arith.constant 0 : index
    %91 = vector.load %arg5[%c17, %c0_59, %c0_60] : memref<27x8x4xf32, #tpu.memory_space<vmem>>, vector<1x8x4xf32>
    %92 = vector.shape_cast %91 : vector<1x8x4xf32> to vector<8x4xf32>
    %cst_61 = arith.constant dense<0.000000e+00> : vector<8x324xf32>
    %93 = tpu.matmul %92, %90, %cst_61 {dimension_numbers = #tpu.dot_dimension_numbers<[1], [0], [0], [1], [0, 0, 1, 1], [], []>} : vector<8x4xf32>, vector<4x324xf32>, vector<8x324xf32> -> vector<8x324xf32>
    %94 = arith.addf %89, %93 : vector<8x324xf32>
    %c0_62 = arith.constant 0 : index
    %c0_63 = arith.constant 0 : index
    %c0_64 = arith.constant 0 : index
    %c0_65 = arith.constant 0 : index
    %95 = vector.load %arg4[%c0_62, %c0_63, %c0_64, %c0_65] : memref<1x1x4x362xf32, #tpu.memory_space<vmem>>, vector<1x1x4x362xf32>
    %96 = vector.shape_cast %95 : vector<1x1x4x362xf32> to vector<4x362xf32>
    %97 = vector.extract_strided_slice %96 {offsets = [0, 0], sizes = [4, 324], strides = [1, 1]} : vector<4x362xf32> to vector<4x324xf32>
    %c18 = arith.constant 18 : index
    %c0_66 = arith.constant 0 : index
    %c0_67 = arith.constant 0 : index
    %98 = vector.load %arg5[%c18, %c0_66, %c0_67] : memref<27x8x4xf32, #tpu.memory_space<vmem>>, vector<1x8x4xf32>
    %99 = vector.shape_cast %98 : vector<1x8x4xf32> to vector<8x4xf32>
    %cst_68 = arith.constant dense<0.000000e+00> : vector<8x324xf32>
    %100 = tpu.matmul %99, %97, %cst_68 {dimension_numbers = #tpu.dot_dimension_numbers<[1], [0], [0], [1], [0, 0, 1, 1], [], []>} : vector<8x4xf32>, vector<4x324xf32>, vector<8x324xf32> -> vector<8x324xf32>
    %101 = arith.addf %94, %100 : vector<8x324xf32>
    %102 = vector.extract_strided_slice %96 {offsets = [0, 1], sizes = [4, 324], strides = [1, 1]} : vector<4x362xf32> to vector<4x324xf32>
    %c19 = arith.constant 19 : index
    %c0_69 = arith.constant 0 : index
    %c0_70 = arith.constant 0 : index
    %103 = vector.load %arg5[%c19, %c0_69, %c0_70] : memref<27x8x4xf32, #tpu.memory_space<vmem>>, vector<1x8x4xf32>
    %104 = vector.shape_cast %103 : vector<1x8x4xf32> to vector<8x4xf32>
    %cst_71 = arith.constant dense<0.000000e+00> : vector<8x324xf32>
    %105 = tpu.matmul %104, %102, %cst_71 {dimension_numbers = #tpu.dot_dimension_numbers<[1], [0], [0], [1], [0, 0, 1, 1], [], []>} : vector<8x4xf32>, vector<4x324xf32>, vector<8x324xf32> -> vector<8x324xf32>
    %106 = arith.addf %101, %105 : vector<8x324xf32>
    %107 = vector.extract_strided_slice %96 {offsets = [0, 2], sizes = [4, 324], strides = [1, 1]} : vector<4x362xf32> to vector<4x324xf32>
    %c20 = arith.constant 20 : index
    %c0_72 = arith.constant 0 : index
    %c0_73 = arith.constant 0 : index
    %108 = vector.load %arg5[%c20, %c0_72, %c0_73] : memref<27x8x4xf32, #tpu.memory_space<vmem>>, vector<1x8x4xf32>
    %109 = vector.shape_cast %108 : vector<1x8x4xf32> to vector<8x4xf32>
    %cst_74 = arith.constant dense<0.000000e+00> : vector<8x324xf32>
    %110 = tpu.matmul %109, %107, %cst_74 {dimension_numbers = #tpu.dot_dimension_numbers<[1], [0], [0], [1], [0, 0, 1, 1], [], []>} : vector<8x4xf32>, vector<4x324xf32>, vector<8x324xf32> -> vector<8x324xf32>
    %111 = arith.addf %106, %110 : vector<8x324xf32>
    %112 = vector.extract_strided_slice %96 {offsets = [0, 18], sizes = [4, 324], strides = [1, 1]} : vector<4x362xf32> to vector<4x324xf32>
    %c21 = arith.constant 21 : index
    %c0_75 = arith.constant 0 : index
    %c0_76 = arith.constant 0 : index
    %113 = vector.load %arg5[%c21, %c0_75, %c0_76] : memref<27x8x4xf32, #tpu.memory_space<vmem>>, vector<1x8x4xf32>
    %114 = vector.shape_cast %113 : vector<1x8x4xf32> to vector<8x4xf32>
    %cst_77 = arith.constant dense<0.000000e+00> : vector<8x324xf32>
    %115 = tpu.matmul %114, %112, %cst_77 {dimension_numbers = #tpu.dot_dimension_numbers<[1], [0], [0], [1], [0, 0, 1, 1], [], []>} : vector<8x4xf32>, vector<4x324xf32>, vector<8x324xf32> -> vector<8x324xf32>
    %116 = arith.addf %111, %115 : vector<8x324xf32>
    %117 = vector.extract_strided_slice %96 {offsets = [0, 19], sizes = [4, 324], strides = [1, 1]} : vector<4x362xf32> to vector<4x324xf32>
    %c22 = arith.constant 22 : index
    %c0_78 = arith.constant 0 : index
    %c0_79 = arith.constant 0 : index
    %118 = vector.load %arg5[%c22, %c0_78, %c0_79] : memref<27x8x4xf32, #tpu.memory_space<vmem>>, vector<1x8x4xf32>
    %119 = vector.shape_cast %118 : vector<1x8x4xf32> to vector<8x4xf32>
    %cst_80 = arith.constant dense<0.000000e+00> : vector<8x324xf32>
    %120 = tpu.matmul %119, %117, %cst_80 {dimension_numbers = #tpu.dot_dimension_numbers<[1], [0], [0], [1], [0, 0, 1, 1], [], []>} : vector<8x4xf32>, vector<4x324xf32>, vector<8x324xf32> -> vector<8x324xf32>
    %121 = arith.addf %116, %120 : vector<8x324xf32>
    %122 = vector.extract_strided_slice %96 {offsets = [0, 20], sizes = [4, 324], strides = [1, 1]} : vector<4x362xf32> to vector<4x324xf32>
    %c23 = arith.constant 23 : index
    %c0_81 = arith.constant 0 : index
    %c0_82 = arith.constant 0 : index
    %123 = vector.load %arg5[%c23, %c0_81, %c0_82] : memref<27x8x4xf32, #tpu.memory_space<vmem>>, vector<1x8x4xf32>
    %124 = vector.shape_cast %123 : vector<1x8x4xf32> to vector<8x4xf32>
    %cst_83 = arith.constant dense<0.000000e+00> : vector<8x324xf32>
    %125 = tpu.matmul %124, %122, %cst_83 {dimension_numbers = #tpu.dot_dimension_numbers<[1], [0], [0], [1], [0, 0, 1, 1], [], []>} : vector<8x4xf32>, vector<4x324xf32>, vector<8x324xf32> -> vector<8x324xf32>
    %126 = arith.addf %121, %125 : vector<8x324xf32>
    %127 = vector.extract_strided_slice %96 {offsets = [0, 36], sizes = [4, 324], strides = [1, 1]} : vector<4x362xf32> to vector<4x324xf32>
    %c24 = arith.constant 24 : index
    %c0_84 = arith.constant 0 : index
    %c0_85 = arith.constant 0 : index
    %128 = vector.load %arg5[%c24, %c0_84, %c0_85] : memref<27x8x4xf32, #tpu.memory_space<vmem>>, vector<1x8x4xf32>
    %129 = vector.shape_cast %128 : vector<1x8x4xf32> to vector<8x4xf32>
    %cst_86 = arith.constant dense<0.000000e+00> : vector<8x324xf32>
    %130 = tpu.matmul %129, %127, %cst_86 {dimension_numbers = #tpu.dot_dimension_numbers<[1], [0], [0], [1], [0, 0, 1, 1], [], []>} : vector<8x4xf32>, vector<4x324xf32>, vector<8x324xf32> -> vector<8x324xf32>
    %131 = arith.addf %126, %130 : vector<8x324xf32>
    %132 = vector.extract_strided_slice %96 {offsets = [0, 37], sizes = [4, 324], strides = [1, 1]} : vector<4x362xf32> to vector<4x324xf32>
    %c25 = arith.constant 25 : index
    %c0_87 = arith.constant 0 : index
    %c0_88 = arith.constant 0 : index
    %133 = vector.load %arg5[%c25, %c0_87, %c0_88] : memref<27x8x4xf32, #tpu.memory_space<vmem>>, vector<1x8x4xf32>
    %134 = vector.shape_cast %133 : vector<1x8x4xf32> to vector<8x4xf32>
    %cst_89 = arith.constant dense<0.000000e+00> : vector<8x324xf32>
    %135 = tpu.matmul %134, %132, %cst_89 {dimension_numbers = #tpu.dot_dimension_numbers<[1], [0], [0], [1], [0, 0, 1, 1], [], []>} : vector<8x4xf32>, vector<4x324xf32>, vector<8x324xf32> -> vector<8x324xf32>
    %136 = arith.addf %131, %135 : vector<8x324xf32>
    %137 = vector.extract_strided_slice %96 {offsets = [0, 38], sizes = [4, 324], strides = [1, 1]} : vector<4x362xf32> to vector<4x324xf32>
    %c26 = arith.constant 26 : index
    %c0_90 = arith.constant 0 : index
    %c0_91 = arith.constant 0 : index
    %138 = vector.load %arg5[%c26, %c0_90, %c0_91] : memref<27x8x4xf32, #tpu.memory_space<vmem>>, vector<1x8x4xf32>
    %139 = vector.shape_cast %138 : vector<1x8x4xf32> to vector<8x4xf32>
    %cst_92 = arith.constant dense<0.000000e+00> : vector<8x324xf32>
    %140 = tpu.matmul %139, %137, %cst_92 {dimension_numbers = #tpu.dot_dimension_numbers<[1], [0], [0], [1], [0, 0, 1, 1], [], []>} : vector<8x4xf32>, vector<4x324xf32>, vector<8x324xf32> -> vector<8x324xf32>
    %141 = arith.addf %136, %140 : vector<8x324xf32>
    %c0_93 = arith.constant 0 : index
    %c0_94 = arith.constant 0 : index
    %142 = vector.load %arg6[%c0_93, %c0_94] : memref<8x1xf32, #tpu.memory_space<vmem>>, vector<8x1xf32>
    %143 = vector.broadcast %142 : vector<8x1xf32> to vector<8x324xf32>
    %144 = arith.addf %141, %143 : vector<8x324xf32>
    %c0_95 = arith.constant 0 : index
    %c0_96 = arith.constant 0 : index
    %145 = vector.load %arg7[%c0_95, %c0_96] : memref<1x324xf32, #tpu.memory_space<vmem>>, vector<1x324xf32>
    %146 = vector.broadcast %145 : vector<1x324xf32> to vector<8x324xf32>
    %147 = arith.mulf %144, %146 : vector<8x324xf32>
    %c0_97 = arith.constant 0 : index
    %c0_98 = arith.constant 0 : index
    %c0_99 = arith.constant 0 : index
    %c0_100 = arith.constant 0 : index
    %148 = vector.load %arg8[%c0_97, %c0_98, %c0_99, %c0_100] : memref<1x1x8x324xf32, #tpu.memory_space<vmem>>, vector<1x1x8x324xf32>
    %149 = vector.shape_cast %148 : vector<1x1x8x324xf32> to vector<8x324xf32>
    %150 = vector.shape_cast %147 : vector<8x324xf32> to vector<1x1x8x324xf32>
    tpu.vector_store %arg8[%c0_97, %c0_98, %c0_99, %c0_100], %150 {strides = array<i32>} : memref<1x1x8x324xf32, #tpu.memory_space<vmem>>, vector<1x1x8x324xf32>,
    return
  }
  func.func @transform_0(%arg0: i32, %arg1: i32) -> (i32, i32, i32, i32) {
    %c0_i32 = arith.constant 0 : i32
    %0 = arith.addi %arg1, %c0_i32 : i32
    %c0_i32_0 = arith.constant 0 : i32
    %c0_i32_1 = arith.constant 0 : i32
    %c0_i32_2 = arith.constant 0 : i32
    return %arg0, %0, %c0_i32_0, %c0_i32_1 : i32, i32, i32, i32
  }
  func.func @transform_1(%arg0: i32, %arg1: i32) -> (i32, i32, i32, i32) {
    %c1_i32 = arith.constant 1 : i32
    %0 = arith.addi %arg1, %c1_i32 : i32
    %c0_i32 = arith.constant 0 : i32
    %c0_i32_0 = arith.constant 0 : i32
    %c0_i32_1 = arith.constant 0 : i32
    return %arg0, %0, %c0_i32, %c0_i32_0 : i32, i32, i32, i32
  }
  func.func @transform_2(%arg0: i32, %arg1: i32) -> (i32, i32, i32, i32) {
    %c2_i32 = arith.constant 2 : i32
    %0 = arith.addi %arg1, %c2_i32 : i32
    %c0_i32 = arith.constant 0 : i32
    %c0_i32_0 = arith.constant 0 : i32
    %c0_i32_1 = arith.constant 0 : i32
    return %arg0, %0, %c0_i32, %c0_i32_0 : i32, i32, i32, i32
  }
  func.func @transform_3(%arg0: i32, %arg1: i32) -> (i32, i32, i32) {
    %c0_i32 = arith.constant 0 : i32
    %c0_i32_0 = arith.constant 0 : i32
    %c0_i32_1 = arith.constant 0 : i32
    %c0_i32_2 = arith.constant 0 : i32
    return %c0_i32, %c0_i32_0, %c0_i32_1 : i32, i32, i32
  }
  func.func @transform_4(%arg0: i32, %arg1: i32) -> (i32, i32) {
    %c0_i32 = arith.constant 0 : i32
    %c0_i32_0 = arith.constant 0 : i32
    %c0_i32_1 = arith.constant 0 : i32
    return %c0_i32, %c0_i32_0 : i32, i32
  }
  func.func @transform_5(%arg0: i32, %arg1: i32) -> (i32, i32) {
    %c0_i32 = arith.constant 0 : i32
    %c0_i32_0 = arith.constant 0 : i32
    %c0_i32_1 = arith.constant 0 : i32
    return %c0_i32, %c0_i32_0 : i32, i32
  }
  func.func @transform_6(%arg0: i32, %arg1: i32) -> (i32, i32, i32, i32) {
    %c0_i32 = arith.constant 0 : i32
    %c0_i32_0 = arith.constant 0 : i32
    %c0_i32_1 = arith.constant 0 : i32
    return %arg0, %arg1, %c0_i32, %c0_i32_0 : i32, i32, i32, i32
  }
}

module attributes {stable_mosaic.version = 11 : i64} {
  func.func @_pool_add_conv1_kernel(%arg0: i32, %arg1: memref<8x8x128xf32, #tpu.memory_space<vmem>>, %arg2: memref<4x128xf32, #tpu.memory_space<vmem>>, %arg3: memref<8x4xf32, #tpu.memory_space<vmem>>, %arg4: memref<8x1xf32, #tpu.memory_space<vmem>>, %arg5: memref<8x128xf32, #tpu.memory_space<vmem>>) attributes {dimension_semantics = [#tpu.dimension_semantics<parallel>], iteration_bounds = array<i64: 4>, scalar_prefetch = 0 : i64, scratch_operands = 0 : i64, tpu.core_type = #tpu.core_type<tc>, window_params = [{transform_indices = @transform_0, window_bounds = array<i64: 8, 8, 128>}, {transform_indices = @transform_1, window_bounds = array<i64: 4, 128>}, {pipeline_mode = #tpu.pipeline_mode<synchronous>, transform_indices = @transform_2, window_bounds = array<i64: 8, 4>}, {pipeline_mode = #tpu.pipeline_mode<synchronous>, transform_indices = @transform_3, window_bounds = array<i64: 8, 1>}, {transform_indices = @transform_4, window_bounds = array<i64: 8, 128>}]} {
    %c0 = arith.constant 0 : index
    %c0_0 = arith.constant 0 : index
    %c0_1 = arith.constant 0 : index
    %0 = vector.load %arg1[%c0, %c0_0, %c0_1] : memref<8x8x128xf32, #tpu.memory_space<vmem>>, vector<1x8x128xf32>
    %1 = vector.shape_cast %0 : vector<1x8x128xf32> to vector<8x128xf32>
    %c1 = arith.constant 1 : index
    %c0_2 = arith.constant 0 : index
    %c0_3 = arith.constant 0 : index
    %2 = vector.load %arg1[%c1, %c0_2, %c0_3] : memref<8x8x128xf32, #tpu.memory_space<vmem>>, vector<1x8x128xf32>
    %3 = vector.shape_cast %2 : vector<1x8x128xf32> to vector<8x128xf32>
    %4 = arith.addf %1, %3 : vector<8x128xf32>
    %c2 = arith.constant 2 : index
    %c0_4 = arith.constant 0 : index
    %c0_5 = arith.constant 0 : index
    %5 = vector.load %arg1[%c2, %c0_4, %c0_5] : memref<8x8x128xf32, #tpu.memory_space<vmem>>, vector<1x8x128xf32>
    %6 = vector.shape_cast %5 : vector<1x8x128xf32> to vector<8x128xf32>
    %7 = arith.addf %4, %6 : vector<8x128xf32>
    %c3 = arith.constant 3 : index
    %c0_6 = arith.constant 0 : index
    %c0_7 = arith.constant 0 : index
    %8 = vector.load %arg1[%c3, %c0_6, %c0_7] : memref<8x8x128xf32, #tpu.memory_space<vmem>>, vector<1x8x128xf32>
    %9 = vector.shape_cast %8 : vector<1x8x128xf32> to vector<8x128xf32>
    %10 = arith.addf %7, %9 : vector<8x128xf32>
    %c4 = arith.constant 4 : index
    %c0_8 = arith.constant 0 : index
    %c0_9 = arith.constant 0 : index
    %11 = vector.load %arg1[%c4, %c0_8, %c0_9] : memref<8x8x128xf32, #tpu.memory_space<vmem>>, vector<1x8x128xf32>
    %12 = vector.shape_cast %11 : vector<1x8x128xf32> to vector<8x128xf32>
    %13 = arith.addf %10, %12 : vector<8x128xf32>
    %c5 = arith.constant 5 : index
    %c0_10 = arith.constant 0 : index
    %c0_11 = arith.constant 0 : index
    %14 = vector.load %arg1[%c5, %c0_10, %c0_11] : memref<8x8x128xf32, #tpu.memory_space<vmem>>, vector<1x8x128xf32>
    %15 = vector.shape_cast %14 : vector<1x8x128xf32> to vector<8x128xf32>
    %16 = arith.addf %13, %15 : vector<8x128xf32>
    %c6 = arith.constant 6 : index
    %c0_12 = arith.constant 0 : index
    %c0_13 = arith.constant 0 : index
    %17 = vector.load %arg1[%c6, %c0_12, %c0_13] : memref<8x8x128xf32, #tpu.memory_space<vmem>>, vector<1x8x128xf32>
    %18 = vector.shape_cast %17 : vector<1x8x128xf32> to vector<8x128xf32>
    %19 = arith.addf %16, %18 : vector<8x128xf32>
    %c7 = arith.constant 7 : index
    %c0_14 = arith.constant 0 : index
    %c0_15 = arith.constant 0 : index
    %20 = vector.load %arg1[%c7, %c0_14, %c0_15] : memref<8x8x128xf32, #tpu.memory_space<vmem>>, vector<1x8x128xf32>
    %21 = vector.shape_cast %20 : vector<1x8x128xf32> to vector<8x128xf32>
    %22 = arith.addf %19, %21 : vector<8x128xf32>
    %c0_16 = arith.constant 0 : index
    %c0_17 = arith.constant 0 : index
    %23 = vector.load %arg3[%c0_16, %c0_17] : memref<8x4xf32, #tpu.memory_space<vmem>>, vector<8x4xf32>
    %c0_18 = arith.constant 0 : index
    %c0_19 = arith.constant 0 : index
    %24 = vector.load %arg2[%c0_18, %c0_19] : memref<4x128xf32, #tpu.memory_space<vmem>>, vector<4x128xf32>
    %cst = arith.constant dense<0.000000e+00> : vector<8x128xf32>
    %25 = tpu.matmul %23, %24, %cst {dimension_numbers = #tpu.dot_dimension_numbers<[1], [0], [0], [1], [0, 0, 1, 1], [], []>} : vector<8x4xf32>, vector<4x128xf32>, vector<8x128xf32> -> vector<8x128xf32>
    %cst_20 = arith.constant 1.250000e-01 : f32
    %26 = vector.broadcast %cst_20 : f32 to vector<8x128xf32>
    %27 = arith.mulf %22, %26 : vector<8x128xf32>
    %28 = arith.addf %27, %25 : vector<8x128xf32>
    %c0_21 = arith.constant 0 : index
    %c0_22 = arith.constant 0 : index
    %29 = vector.load %arg4[%c0_21, %c0_22] : memref<8x1xf32, #tpu.memory_space<vmem>>, vector<8x1xf32>
    %30 = vector.broadcast %29 : vector<8x1xf32> to vector<8x128xf32>
    %31 = arith.addf %28, %30 : vector<8x128xf32>
    %c0_23 = arith.constant 0 : index
    %c0_24 = arith.constant 0 : index
    %32 = vector.load %arg5[%c0_23, %c0_24] : memref<8x128xf32, #tpu.memory_space<vmem>>, vector<8x128xf32>
    tpu.vector_store %arg5[%c0_23, %c0_24], %31 {strides = array<i32>} : memref<8x128xf32, #tpu.memory_space<vmem>>, vector<8x128xf32>,
    return
  }
  func.func @transform_0(%arg0: i32) -> (i32, i32, i32) {
    %c0_i32 = arith.constant 0 : i32
    %c0_i32_0 = arith.constant 0 : i32
    %c0_i32_1 = arith.constant 0 : i32
    return %c0_i32, %c0_i32_0, %arg0 : i32, i32, i32
  }
  func.func @transform_1(%arg0: i32) -> (i32, i32) {
    %c0_i32 = arith.constant 0 : i32
    %c0_i32_0 = arith.constant 0 : i32
    return %c0_i32, %arg0 : i32, i32
  }
  func.func @transform_2(%arg0: i32) -> (i32, i32) {
    %c0_i32 = arith.constant 0 : i32
    %c0_i32_0 = arith.constant 0 : i32
    %c0_i32_1 = arith.constant 0 : i32
    return %c0_i32, %c0_i32_0 : i32, i32
  }
  func.func @transform_3(%arg0: i32) -> (i32, i32) {
    %c0_i32 = arith.constant 0 : i32
    %c0_i32_0 = arith.constant 0 : i32
    %c0_i32_1 = arith.constant 0 : i32
    return %c0_i32, %c0_i32_0 : i32, i32
  }
  func.func @transform_4(%arg0: i32) -> (i32, i32) {
    %c0_i32 = arith.constant 0 : i32
    %c0_i32_0 = arith.constant 0 : i32
    return %c0_i32, %arg0 : i32, i32
  }
}

</mosaic_0001>

<bundles_post_ra>
// kernel: d3block_forward.3
= control target key start
LH: loop header
LB: loop body
LE: loop exit
PB: predicated region body
PF: predicated region fallthrough
CT: control target
= control target key end

     0   :  { %s5501_s21 = smov 0   ;;  %s5503_s22 = smov 0   ;;  %s6315_s0 = inlined_call_operand.vmem [shape: f32[2,10,4,362], index: 0, kind: input, shape index: {}, may-alias: {0,1,2}]   ;;  %s6316_s1 = inlined_call_operand.vmem [shape: f32[2,10,4,362], index: 1, kind: input, shape index: {}, may-alias: {0,1,2}]   ;;  %s6317_s2 = inlined_call_operand.vmem [shape: f32[2,10,4,362], index: 2, kind: input, shape index: {}, may-alias: {0,1,2}]   ;;  %s6318_s3 = inlined_call_operand.vmem [shape: f32[27,4,4], index: 3, kind: input, shape index: {}]   ;;  %s6319_s4 = inlined_call_operand.vmem [shape: f32[4,1], index: 4, kind: input, shape index: {}]   ;;  %s6320_s5 = inlined_call_operand.vmem [shape: f32[1,324], index: 5, kind: input, shape index: {}]   ;;  %s6321_s6 = inlined_call_operand.vmem [shape: f32[2,8,4,324], index: 6, kind: output, shape index: {}]  }
   0x1   :  { %s5505_s23 = smov 0   ;;  %s5507_s24 = smov 0  }
   0x2   :  { %s5509_s25 = smov 0  }
   0x3 LB: > { %s25_s26 = sadd.s32 1, %s5445_s23  ;;  %s28_s27 = sadd.s32 1, %s5449_s24  ;;  %s5453_s25 = sphi %s5509_s25, %s16_s25   ;;  %s5449_s24 = sphi %s5507_s24, %s6325_s24   ;;  %s5445_s23 = sphi %s5505_s23, %s6324_s23   ;;  %s5441_s22 = sphi %s5503_s22, %s6323_s22   ;;  %s5437_s21 = sphi %s5501_s21, %s6322_s21  }
   0x4   : > { %p26_p0 = scmp.ge.s32.totalorder %s25_s26, 8  ;;  %p4945_p1 = scmp.ge.s32.totalorder %s5453_s25, 1 }
   0x5   : > { %p272_p2 = scmp.lt.s32.totalorder %s5453_s25, 17 }
   0x6   : > { %s6327_s26 = smov (%p26_p0, %s25_s26), 0  ;;  %s6329_s27 = smov (!%p26_p0, %s28_s27), %s5449_s24 }
   0x7   : > { %p273_p3 = pnand %p4945_p1, %p272_p2  ;;  %p30_p4 = scmp.ge.s32.totalorder %s6329_s27, 2 }
   0x8   : > { %p330_p5 = scmp.lt.s32.totalorder (!%p273_p3), %s5441_s22, 1  ;;  %p332_p6 = scmp.lt.s32.totalorder (!%p273_p3), %s5437_s21, 9  ;;  %v5455_v0 = vmov (!%p273_p3), 0.0   ;;  %vm5456_vm0 = vmmov (!%p273_p3), 0   ;;  %vm391_vm1 = vcmask (!%p273_p3), 1043456   ;;  %vm384_vm2 = vcmask (!%p273_p3), 1039360  }
   0x9   : > { %s6331_s27 = smov (%p30_p4, %s6329_s27), 0  ;;  %276 = sbr.rel (%p273_p3) target bundleno = 579 (0x243), region = 44 }
   0xa   : > { %5167 = vmatprep.subr.mxu1 (!%p273_p3), %v5455_v0  ;;  %462 = vmatprep.mubr.f32.mxu0 (!%p273_p3), %v5455_v0  ;;  %s5457_s12 = smov (!%p273_p3), 127   ;;  %s5458_s13 = smov (!%p273_p3), 126   ;;  %v4950_v15 = vld [vmem:[%s6318_s3 + $0x4] sm:$0xf] (!%p273_p3)  ;;  %vm387_vm3 = vcmask (!%p273_p3), 31744   ;;  %vm697_vm4 = vcmask (!%p273_p3), 1031168  }
   0xb   : > { %5169 = vmatprep.mubr.msk.f32.mxu1 (!%p273_p3), %vm5456_vm0, %v5455_v0  ;;  %s5459_s14 = smov (!%p273_p3), 110   ;;  %s5460_s15 = smov (!%p273_p3), 109   ;;  %v372_v21 = vld [vmem:[%s6318_s3] sm:$0xf] (!%p273_p3)  ;;  %vm861_vm5 = vcmask (!%p273_p3), 900096   ;;  %vm1025_vm6 = vcmask (!%p273_p3), 891904  }
   0xc   : > { %s339_s16 = sadd.s32 (!%p273_p3), 1, %s5437_s21  ;;  %s5461_s17 = smov (!%p273_p3), 108   ;;  %v4961_v26 = vld [vmem:[%s6318_s3 + $0x8] sm:$0xf] (!%p273_p3)  ;;  %v4967_v29 = vld [vmem:[%s6318_s3 + $0xc] sm:$0xf] (!%p273_p3) }
   0xd   : > { %p342_p7 = scmp.lt.s32.totalorder (!%p273_p3), %s339_s16, 9  ;;  %s5462_s18 = smov (!%p273_p3), 92   ;;  %v4973_v35 = vld [vmem:[%s6318_s3 + $0x10] sm:$0xf] (!%p273_p3)  ;;  %vm1189_vm7 = vcmask (!%p273_p3), 883712   ;;  %vm1353_vm8 = vcmask (!%p273_p3), 752640  }
   0xe   : > { %s5464_s10 = smov (!%p273_p3), 90   ;;  %v4979_v38 = vld [vmem:[%s6318_s3 + $0x14] sm:$0xf] (!%p273_p3)  ;;  %v4985_v44 = vld [vmem:[%s6318_s3 + $0x18] sm:$0xf] (!%p273_p3)  ;;  %vm1517_vm9 = vcmask (!%p273_p3), 744448  }
   0xf   : > { %v4991_v48 = vld [vmem:[%s6318_s3 + $0x1c] sm:$0xf] (!%p273_p3)  ;;  %v5831_v53 = vld [vmem:[%s6318_s3 + $0x20] sm:$0xf] (!%p273_p3)  ;;  %v5851_v58 = vld [vmem:[%s6318_s3 + $0x24] sm:$0xf] (!%p273_p3) }
  0x10   : > { %s6333_s22 = smov (!%p330_p5, %s5441_s22), 1  ;;  %s6335_s16 = smov (!%p342_p7, %s339_s16), 9  ;;  %vm1681_vm10 = vcmask 736256   ;;  %v5865_v61 = vld [vmem:[%s6318_s3 + $0x28] sm:$0xf]  ;;  %vm4802_vm11 = vcmask 551936  }
  0x11   : > { %s333_s28 = scalar_select %p332_p6, %s5437_s21, 9 }
  0x12   : > { %s5540_s29 = smul.u32 30, %s6333_s22  ;;  %p363_p9 = scmp.lt.s32.totalorder %s5437_s21, 7 }
  0x13   : > { %s5354_s30 = smul.u32 3, %s333_s28  ;;  %s5463_s28 = smov 91  }
  0x14   : > { %s5356_s19 = smul.u32 3, %s6335_s16 }
  0x15   : > { %s336_s7 = sadd.s32 %s5540_s29, %s5354_s30 }
  0x16   : > { %s4946_s8 = sshll.u32 %s336_s7, 2  ;;  %s346_s20 = sadd.s32 %s5356_s19, %s5540_s29 }
  0x17   : > { %s338_s11 = scalar_lea.vmem %s6315_s0, %s4946_s8  ;;  %s4947_s30 = sshll.u32 %s346_s20, 2 }
  0x18   : > { %v5548_v1 = vld [vmem:[%s338_s11] sm:$0xff]  ;;  %v5558_v3 = vld [vmem:[%s338_s11 + $0x8] sm:$0xf]  ;;  %s348_s9 = scalar_lea.vmem %s6316_s1, %s4947_s30  ;;  %s350_s11 = sadd.s32 2, %s5437_s21 }
  0x19   : > { %378 = vrot.lane.b32.xlu1 %v5548_v1, %s5457_s12  ;;  %v5554_v2 = vcombine.high %v5548_v1, %v5548_v1  ;;  %v5605_v4 = vld [vmem:[%s348_s9] sm:$0xff]  ;;  %v5609_v5 = vld [vmem:[%s348_s9 + $0x8] sm:$0xf]  ;;  %p353_p8 = scmp.lt.s32.totalorder %s350_s11, 9  ;;  %s6339_s21 = smov (!%p363_p9, %s5437_s21), 7 }
  0x1a   : > { %v5615_v6 = vcombine.high %v5605_v4, %v5605_v4  ;;  %s5358_s9 = smul.u32 3, %s6339_s21 }
  0x1b   : > { %380 = vrot.lane.b32.xlu0 %v5554_v2, %s5457_s12  ;;  %s6337_s11 = smov (!%p353_p8, %s350_s11), 9 }
  0x1c   : > { %s5357_s16 = smul.u32 3, %s6337_s11 }
  0x1d   : > { %693 = vrot.lane.b32.xlu1 %v5554_v2, %s5458_s13  ;;  %s5359_s11 = smul.u32 24, %s6333_s22 }
  0x1e   : > { %s357_s19 = sadd.s32 %s5357_s16, %s5540_s29 }
  0x1f   : > { %382 = vrot.lane.b32.xlu0 %v5558_v3, %s5457_s12  ;;  %s4948_s20 = sshll.u32 %s357_s19, 2  ;;  %s367_s19 = sadd.s32 %s5359_s11, %s5358_s9 }
  0x20   : > { %s359_s8 = scalar_lea.vmem %s6317_s2, %s4948_s20 }
  0x21   : > { %691 = vrot.lane.b32.xlu1 %v5548_v1, %s5458_s13  ;;  %v5666_v7 = vld [vmem:[%s359_s8] sm:$0xff]  ;;  %v5670_v8 = vld [vmem:[%s359_s8 + $0x8] sm:$0xf] }
  0x22   : > { %v5676_v9 = vcombine.high %v5666_v7, %v5666_v7 }
  0x23   : > { %695 = vrot.lane.b32.xlu0 %v5558_v3, %s5458_s13 }
  0x25   : > { %859 = vrot.lane.b32.xlu1 %v5558_v3, %s5459_s14 }
  0x27   : > { %857 = vrot.lane.b32.xlu0 %v5554_v2, %s5459_s14 }
  0x29   : > { %1021 = vrot.lane.b32.xlu1 %v5554_v2, %s5460_s15 }
  0x2b   : > { %855 = vrot.lane.b32.xlu0 %v5548_v1, %s5459_s14 }
  0x2d   : > { %1019 = vrot.lane.b32.xlu1 %v5548_v1, %s5460_s15 }
  0x2f   : > { %1023 = vrot.lane.b32.xlu0 %v5558_v3, %s5460_s15 }
  0x31   : > { %1187 = vrot.lane.b32.xlu1 %v5558_v3, %s5461_s17 }
  0x33   : > { %1185 = vrot.lane.b32.xlu0 %v5554_v2, %s5461_s17 }
  0x35   : > { %1349 = vrot.lane.b32.xlu1 %v5554_v2, %s5462_s18 }
  0x37   : > { %1183 = vrot.lane.b32.xlu0 %v5548_v1, %s5461_s17 }
  0x39   : > { %1347 = vrot.lane.b32.xlu1 %v5548_v1, %s5462_s18 }
  0x3b   : > { %1351 = vrot.lane.b32.xlu0 %v5558_v3, %s5462_s18 }
  0x3d   : > { %1515 = vrot.lane.b32.xlu1 %v5558_v3, %s5463_s28 }
  0x3f   : > { %1513 = vrot.lane.b32.xlu0 %v5554_v2, %s5463_s28 }
  0x41   : > { %1677 = vrot.lane.b32.xlu1 %v5554_v2, %s5464_s10 }
  0x43   : > { %1511 = vrot.lane.b32.xlu0 %v5548_v1, %s5463_s28 }
  0x45   : > { %1675 = vrot.lane.b32.xlu1 %v5548_v1, %s5464_s10 }
  0x47   : > { %1679 = vrot.lane.b32.xlu0 %v5558_v3, %s5464_s10 }
  0x49   : > { %2003 = vrot.lane.b32.xlu1 %v5609_v5, %s5457_s12 }
  0x4b   : > { %2001 = vrot.lane.b32.xlu0 %v5615_v6, %s5457_s12 }
  0x4d   : > { %2164 = vrot.lane.b32.xlu1 %v5615_v6, %s5458_s13 }
  0x4f   : > { %1999 = vrot.lane.b32.xlu0 %v5605_v4, %s5457_s12 }
  0x51   : > { %2162 = vrot.lane.b32.xlu1 %v5605_v4, %s5458_s13 }
  0x53   : > { %2166 = vrot.lane.b32.xlu0 %v5609_v5, %s5458_s13 }
  0x55   : > { %2329 = vrot.lane.b32.xlu1 %v5609_v5, %s5459_s14 }
  0x57   : > { %2327 = vrot.lane.b32.xlu0 %v5615_v6, %s5459_s14 }
  0x59   : > { %2490 = vrot.lane.b32.xlu1 %v5615_v6, %s5460_s15 }
  0x5b   : > { %2325 = vrot.lane.b32.xlu0 %v5605_v4, %s5459_s14 }
  0x5d   : > { %2488 = vrot.lane.b32.xlu1 %v5605_v4, %s5460_s15 }
  0x5f   : > { %2492 = vrot.lane.b32.xlu0 %v5609_v5, %s5460_s15 }
  0x61   : > { %2655 = vrot.lane.b32.xlu1 %v5609_v5, %s5461_s17 }
  0x63   : > { %2653 = vrot.lane.b32.xlu0 %v5615_v6, %s5461_s17 }
  0x65   : > { %2816 = vrot.lane.b32.xlu1 %v5615_v6, %s5462_s18 }
  0x67   : > { %2651 = vrot.lane.b32.xlu0 %v5605_v4, %s5461_s17 }
  0x69   : > { %2814 = vrot.lane.b32.xlu1 %v5605_v4, %s5462_s18 }
  0x6b   : > { %2818 = vrot.lane.b32.xlu0 %v5609_v5, %s5462_s18 }
  0x6d   : > { %2981 = vrot.lane.b32.xlu1 %v5609_v5, %s5463_s28 }
  0x6f   : > { %2979 = vrot.lane.b32.xlu0 %v5615_v6, %s5463_s28 }
  0x71   : > { %3142 = vrot.lane.b32.xlu1 %v5615_v6, %s5464_s10 }
  0x73   : > { %2977 = vrot.lane.b32.xlu0 %v5605_v4, %s5463_s28 }
  0x75   : > { %3140 = vrot.lane.b32.xlu1 %v5605_v4, %s5464_s10 }
  0x77   : > { %3144 = vrot.lane.b32.xlu0 %v5609_v5, %s5464_s10 }
  0x79   : > { %3467 = vrot.lane.b32.xlu1 %v5670_v8, %s5457_s12 }
  0x7b   : > { %3465 = vrot.lane.b32.xlu0 %v5676_v9, %s5457_s12 }
  0x7d   : > { %3628 = vrot.lane.b32.xlu1 %v5676_v9, %s5458_s13 }
  0x7f   : > { %3463 = vrot.lane.b32.xlu0 %v5666_v7, %s5457_s12 }
  0x81   : > { %3626 = vrot.lane.b32.xlu1 %v5666_v7, %s5458_s13 }
  0x83   : > { %3630 = vrot.lane.b32.xlu0 %v5670_v8, %s5458_s13 }
  0x85   : > { %3793 = vrot.lane.b32.xlu1 %v5670_v8, %s5459_s14 }
  0x87   : > { %3791 = vrot.lane.b32.xlu0 %v5676_v9, %s5459_s14 }
  0x89   : > { %3954 = vrot.lane.b32.xlu1 %v5676_v9, %s5460_s15 }
  0x8b   : > { %v379_v10 = vpop.permute.xlu1 %378  ;;  %3789 = vrot.lane.b32.xlu0 %v5666_v7, %s5459_s14 }
  0x8d   : > { %v381_v11 = vpop.permute.xlu0 %380  ;;  %3952 = vrot.lane.b32.xlu1 %v5666_v7, %s5460_s15 }
  0x8e   : > { %v385_v16 = vsel %vm384_vm2, %v379_v10, %v381_v11 }
  0x8f   : > { %v694_v12 = vpop.permute.xlu1 %693  ;;  %3956 = vrot.lane.b32.xlu0 %v5670_v8, %s5460_s15 }
  0x91   : > { %v383_v13 = vpop.permute.xlu0 %382  ;;  %4119 = vrot.lane.b32.xlu1 %v5670_v8, %s5461_s17 }
  0x92   : > { %5168 = vmatpush3.msk.msra.mxu1 %vm391_vm1, %v383_v13  ;;  %v386_v14 = vsel %vm384_vm2, %v381_v11, %v383_v13  ;;  %v5900_v13 = vld [vmem:[%s6318_s3 + $0x30] sm:$0xf] }
  0x93   : > { %4951 = vmatprep.subr.msk.mxu0 %vm391_vm1, %v386_v14  ;;  %v692_v17 = vpop.permute.xlu1 %691  ;;  %5170 = vmatmul.mubr.msk.f32.vlgmr.msra.gmra.mrb[0].mxu1 %vm387_vm3, %v4950_v15 }
  0x94   : > { %4952 = vmatpush1.msk.msra.mxu0 %vm391_vm1, %v385_v16  ;;  %5172 = vmatprep.subr.mxu1 %v5455_v0  ;;  %v698_v23 = vsel %vm697_vm4, %v692_v17, %v694_v12  ;;  %v5918_v16 = vld [vmem:[%s6318_s3 + $0x34] sm:$0xf] }
  0x95   : > { %4953 = vmatmul.mubr.msk.f32.vlgmr.msra.gmra.mrb[0].mxu0 %vm387_vm3, %v4950_v15  ;;  %4956 = vmatprep.subr.msk.mxu0 %vm391_vm1, %v5554_v2  ;;  %v696_v18 = vpop.permute.xlu0 %695 }
  0x96   : > { %4957 = vmatpush1.msk.msra.mxu0 %vm391_vm1, %v5548_v1  ;;  %v699_v19 = vsel %vm697_vm4, %v694_v12, %v696_v18  ;;  %5173 = vmatpush3.msk.msra.mxu1 %vm391_vm1, %v5558_v3 }
  0x97   : > { %4962 = vmatprep.subr.msk.mxu0 %vm391_vm1, %v699_v19  ;;  %5174 = vmatprep.mubr.msk.f32.mxu1 %vm5456_vm0, %v5455_v0  ;;  %v860_v20 = vpop.permute.xlu1 %859  ;;  %v5935_v19 = vld [vmem:[%s6318_s3 + $0x38] sm:$0xf] }
  0x98   : > { %5177 = vmatprep.subr.mxu1 %v5455_v0  ;;  %612 = vmatprep.mubr.f32.mxu0 %v5455_v0 }
  0x99   : > { %5175 = vmatmul.mubr.msk.f32.vlgmr.msra.gmra.mrb[2].mxu1 %vm387_vm3, %v372_v21  ;;  %v858_v22 = vpop.permute.xlu0 %857  ;;  %4117 = vrot.lane.b32.xlu0 %v5676_v9, %s5461_s17 }
  0x9a   : > { %5178 = vmatpush3.msk.msra.mxu1 %vm391_vm1, %v696_v18  ;;  %5179 = vmatprep.mubr.msk.f32.mxu1 %vm5456_vm0, %v5455_v0  ;;  %v863_v25 = vsel %vm861_vm5, %v858_v22, %v860_v20 }
  0x9b   : > { %5182 = vmatprep.subr.mxu1 %v5455_v0  ;;  %v1022_v24 = vpop.permute.xlu1 %1021  ;;  %4280 = vrot.lane.b32.xlu1 %v5676_v9, %s5462_s18 }
  0x9d   : > { %4958 = vmatmul.mubr.msk.f32.vlgmr.msra.gmra.mrb[0].mxu0 %vm387_vm3, %v372_v21  ;;  %v856_v27 = vpop.permute.xlu0 %855  ;;  %5180 = vmatmul.mubr.msk.f32.vlgmr.msra.gmra.mrb[4].mxu1 %vm387_vm3, %v4961_v26 }
  0x9e   : > { %4963 = vmatpush1.msk.msra.mxu0 %vm391_vm1, %v698_v23  ;;  %773 = vmatprep.mubr.f32.mxu0 %v5455_v0  ;;  %v862_v31 = vsel %vm861_vm5, %v856_v27, %v858_v22 }
  0x9f   : > { %4968 = vmatprep.subr.msk.mxu0 %vm391_vm1, %v863_v25  ;;  %5183 = vmatpush3.msk.msra.mxu1 %vm391_vm1, %v860_v20  ;;  %v1020_v28 = vpop.permute.xlu1 %1019 }
  0xa0   : > { %5184 = vmatprep.mubr.msk.f32.mxu1 %vm5456_vm0, %v5455_v0  ;;  %5187 = vmatprep.subr.mxu1 %v5455_v0  ;;  %v1026_v39 = vsel %vm1025_vm6, %v1020_v28, %v1022_v24 }
  0xa1   : > { %v1024_v30 = vpop.permute.xlu0 %1023  ;;  %5185 = vmatmul.mubr.msk.f32.vlgmr.msra.gmra.mrb[6].mxu1 %vm387_vm3, %v4967_v29  ;;  %4115 = vrot.lane.b32.xlu0 %v5666_v7, %s5461_s17 }
  0xa2   : > { %5188 = vmatpush3.msk.msra.mxu1 %vm391_vm1, %v1024_v30  ;;  %5189 = vmatprep.mubr.msk.f32.mxu1 %vm5456_vm0, %v5455_v0  ;;  %v1027_v33 = vsel %vm1025_vm6, %v1022_v24, %v1024_v30 }
  0xa3   : > { %v1188_v32 = vpop.permute.xlu1 %1187  ;;  %5192 = vmatprep.subr.mxu1 %v5455_v0  ;;  %4278 = vrot.lane.b32.xlu1 %v5666_v7, %s5462_s18 }
  0xa5   : > { %4964 = vmatmul.mubr.msk.f32.vlgmr.msra.gmra.mrb[0].mxu0 %vm387_vm3, %v4961_v26  ;;  %v1186_v34 = vpop.permute.xlu0 %1185  ;;  %4282 = vrot.lane.b32.xlu0 %v5670_v8, %s5462_s18  ;;  %v5967_v26 = vld [vmem:[%s6318_s3 + $0x3c] sm:$0xf]  ;;  %s4949_s18 = sshll.u32 %s367_s19, 2 }
  0xa6   : > { %4969 = vmatpush1.msk.msra.mxu0 %vm391_vm1, %v862_v31  ;;  %937 = vmatprep.mubr.f32.mxu0 %v5455_v0  ;;  %v1191_v41 = vsel %vm1189_vm7, %v1186_v34, %v1188_v32  ;;  %s369_s7 = scalar_lea.vmem %s6321_s6, %s4949_s18 }
  0xa7   : > { %4974 = vmatprep.subr.msk.mxu0 %vm391_vm1, %v1027_v33  ;;  %v1350_v36 = vpop.permute.xlu1 %1349  ;;  %5190 = vmatmul.mubr.msk.f32.vlgmr.msra.gmra.mrb[8].mxu1 %vm387_vm3, %v4973_v35 }
  0xa8   : > { %5193 = vmatpush3.msk.msra.mxu1 %vm391_vm1, %v1188_v32  ;;  %4445 = vrot.lane.b32.xlu1 %v5670_v8, %s5463_s28 }
  0xa9   : > { %v1184_v37 = vpop.permute.xlu0 %1183  ;;  %4443 = vrot.lane.b32.xlu0 %v5676_v9, %s5463_s28  ;;  %5194 = vmatprep.mubr.msk.f32.mxu1 %vm5456_vm0, %v5455_v0 }
  0xaa   : > { %5197 = vmatprep.subr.mxu1 %v5455_v0  ;;  %v1190_v46 = vsel %vm1189_vm7, %v1184_v37, %v1186_v34  ;;  %v4765_v34 = vld [vmem:[%s6319_s4] sm:$0xf]  ;;  %v6017_v37 = vld [vmem:[%s6318_s3 + $0x44] sm:$0xf] }
  0xab   : > { %v1348_v40 = vpop.permute.xlu1 %1347  ;;  %5195 = vmatmul.mubr.msk.f32.vlgmr.msra.gmra.mrb[10].mxu1 %vm387_vm3, %v4979_v38 }
  0xac   : > { %5199 = vmatprep.mubr.msk.f32.mxu1 %vm5456_vm0, %v5455_v0  ;;  %4606 = vrot.lane.b32.xlu1 %v5676_v9, %s5464_s10  ;;  %v1354_v54 = vsel %vm1353_vm8, %v1348_v40, %v1350_v36 }
  0xad   : > { %4970 = vmatmul.mubr.msk.f32.vlgmr.msra.gmra.mrb[0].mxu0 %vm387_vm3, %v4967_v29  ;;  %v1352_v42 = vpop.permute.xlu0 %1351  ;;  %4441 = vrot.lane.b32.xlu0 %v5666_v7, %s5463_s28  ;;  %v5988_v29 = vld [vmem:[%s6318_s3 + $0x40] sm:$0xf] }
  0xae   : > { %4975 = vmatpush1.msk.msra.mxu0 %vm391_vm1, %v1026_v39  ;;  %1101 = vmatprep.mubr.f32.mxu0 %v5455_v0  ;;  %v1355_v49 = vsel %vm1353_vm8, %v1350_v36, %v1352_v42  ;;  %v5465_v36 = vmov 0  }
  0xaf   : > { %4980 = vmatprep.subr.msk.mxu0 %vm391_vm1, %v1191_v41  ;;  %5198 = vmatpush3.msk.msra.mxu1 %vm391_vm1, %v1352_v42  ;;  %v1516_v43 = vpop.permute.xlu1 %1515  ;;  %v6040_v42 = vld [vmem:[%s6318_s3 + $0x48] sm:$0xf] }
  0xb0   : > { %5202 = vmatprep.subr.mxu1 %v5455_v0  ;;  %5200 = vmatmul.mubr.msk.f32.vlgmr.msra.gmra.mrb[12].mxu1 %vm387_vm3, %v4985_v44 }
  0xb1   : > { %v1514_v45 = vpop.permute.xlu0 %1513  ;;  %4608 = vrot.lane.b32.xlu0 %v5670_v8, %s5464_s10  ;;  %5203 = vmatpush3.msk.msra.mxu1 %vm391_vm1, %v1516_v43 }
  0xb2   : > { %5204 = vmatprep.mubr.msk.f32.mxu1 %vm5456_vm0, %v5455_v0  ;;  %5207 = vmatprep.subr.mxu1 %v5455_v0  ;;  %v1519_v56 = vsel %vm1517_vm9, %v1514_v45, %v1516_v43 }
  0xb3   : > { %v1678_v47 = vpop.permute.xlu1 %1677  ;;  %4604 = vrot.lane.b32.xlu1 %v5666_v7, %s5464_s10  ;;  %5411 = vset.pattern.permute.xlu0 %v5465_v36 }
  0xb4   : > { %5205 = vmatmul.mubr.msk.f32.vlgmr.msra.gmra.mrb[14].mxu1 %vm387_vm3, %v4991_v48 }
  0xb5   : > { %4976 = vmatmul.mubr.msk.f32.vlgmr.msra.gmra.mrb[0].mxu0 %vm387_vm3, %v4973_v35  ;;  %v1512_v50 = vpop.permute.xlu0 %1511  ;;  %5209 = vmatprep.mubr.msk.f32.mxu1 %vm5456_vm0, %v5455_v0 }
  0xb6   : > { %4981 = vmatpush1.msk.msra.mxu0 %vm391_vm1, %v1190_v46  ;;  %1265 = vmatprep.mubr.f32.mxu0 %v5455_v0  ;;  %v1518_v62 = vsel %vm1517_vm9, %v1512_v50, %v1514_v45  ;;  %v6085_v50 = vld [vmem:[%s6318_s3 + $0x50] sm:$0xf] }
  0xb7   : > { %4986 = vmatprep.subr.msk.mxu0 %vm391_vm1, %v1355_v49  ;;  %v1676_v51 = vpop.permute.xlu1 %1675  ;;  %4768 = vperm.xlu0 %5411, %v4765_v34  }
  0xb8   : > { %v1682_v11 = vsel %vm1681_vm10, %v1676_v51, %v1678_v47 }
  0xb9   : > { %v1680_v52 = vpop.permute.xlu0 %1679 }
  0xba   : > { %5208 = vmatpush3.msk.msra.mxu1 %vm391_vm1, %v1680_v52  ;;  %v1683_v1 = vsel %vm1681_vm10, %v1678_v47, %v1680_v52 }
  0xbb   : > { %v2004_v55 = vpop.permute.xlu1 %2003  ;;  %5210 = vmatmul.mubr.msk.f32.vlgmr.msra.gmra.mrb[16].mxu1 %vm387_vm3, %v5831_v53  ;;  %5212 = vmatprep.subr.mxu1 %v5455_v0 }
  0xbc   : > { %5213 = vmatpush3.msk.msra.mxu1 %vm391_vm1, %v5609_v5  ;;  %5214 = vmatprep.mubr.msk.f32.mxu1 %vm5456_vm0, %v5455_v0  ;;  %v5883_v5 = vld [vmem:[%s6318_s3 + $0x2c] sm:$0xf] }
  0xbd   : > { %4982 = vmatmul.mubr.msk.f32.vlgmr.msra.gmra.mrb[0].mxu0 %vm387_vm3, %v4979_v38  ;;  %v5843_v57 = vpop.permute.xlu0 %2001  ;;  %5217 = vmatprep.subr.mxu1 %v5455_v0 }
  0xbe   : > { %4987 = vmatpush1.msk.msra.mxu0 %vm391_vm1, %v1354_v54  ;;  %1429 = vmatprep.mubr.f32.mxu0 %v5455_v0 }
  0xbf   : > { %4992 = vmatprep.subr.msk.mxu0 %vm391_vm1, %v1519_v56  ;;  %v5854_v59 = vpop.permute.xlu1 %2164  ;;  %5215 = vmatmul.mubr.msk.f32.vlgmr.msra.gmra.mrb[18].mxu1 %vm387_vm3, %v5851_v58 }
  0xc0   : > { %5218 = vmatpush3.msk.msra.mxu1 %vm391_vm1, %v2004_v55  ;;  %5219 = vmatprep.mubr.msk.f32.mxu1 %vm5456_vm0, %v5455_v0 }
  0xc1   : > { %v2000_v60 = vpop.permute.xlu0 %1999  ;;  %5222 = vmatprep.subr.mxu1 %v5455_v0 }
  0xc2   : > { %v2005_v23 = vsel %vm384_vm2, %v2000_v60, %v5843_v57 }
  0xc3   : > { %v5868_v63 = vpop.permute.xlu1 %2162  ;;  %5220 = vmatmul.mubr.msk.f32.vlgmr.msra.gmra.mrb[20].mxu1 %vm387_vm3, %v5865_v61 }
  0xc4   : > { %5224 = vmatprep.mubr.msk.f32.mxu1 %vm5456_vm0, %v5455_v0  ;;  %v2168_v30 = vsel %vm697_vm4, %v5868_v63, %v5854_v59 }
  0xc5   : > { %4988 = vmatmul.mubr.msk.f32.vlgmr.msra.gmra.mrb[0].mxu0 %vm387_vm3, %v4985_v44  ;;  %v2167_v2 = vpop.permute.xlu0 %2166  ;;  %v6061_v44 = vld [vmem:[%s6318_s3 + $0x4c] sm:$0xf] }
  0xc6   : > { %4993 = vmatpush1.msk.msra.mxu0 %vm391_vm1, %v1518_v62  ;;  %1593 = vmatprep.mubr.f32.mxu0 %v5455_v0 }
  0xc7   : > { %4998 = vmatprep.subr.msk.mxu0 %vm391_vm1, %v1683_v1  ;;  %v2330_v3 = vpop.permute.xlu1 %2329  ;;  %5223 = vmatpush3.msk.msra.mxu1 %vm391_vm1, %v2167_v2  ;;  %v6157_v1 = vld [vmem:[%s6318_s3 + $0x5c] sm:$0xf] }
  0xc8   : > { %5227 = vmatprep.subr.mxu1 %v5455_v0  ;;  %5225 = vmatmul.mubr.msk.f32.vlgmr.msra.gmra.mrb[22].mxu1 %vm387_vm3, %v5883_v5 }
  0xc9   : > { %v5888_v10 = vpop.permute.xlu0 %2327  ;;  %5228 = vmatpush3.msk.msra.mxu1 %vm391_vm1, %v2330_v3  ;;  %5229 = vmatprep.mubr.msk.f32.mxu1 %vm5456_vm0, %v5455_v0 }
  0xca   : > { %5232 = vmatprep.subr.mxu1 %v5455_v0  ;;  %v2332_v32 = vsel %vm861_vm5, %v5888_v10, %v2330_v3 }
  0xcb   : > { %v5895_v12 = vpop.permute.xlu1 %2490 }
  0xcc   : > { %5230 = vmatmul.mubr.msk.f32.vlgmr.msra.gmra.mrb[24].mxu1 %vm387_vm3, %v5900_v13 }
  0xcd   : > { %4994 = vmatmul.mubr.msk.f32.vlgmr.msra.gmra.mrb[0].mxu0 %vm387_vm3, %v4991_v48  ;;  %v5905_v14 = vpop.permute.xlu0 %2325  ;;  %5234 = vmatprep.mubr.msk.f32.mxu1 %vm5456_vm0, %v5455_v0 }
  0xce   : > { %4999 = vmatpush1.msk.msra.mxu0 %vm391_vm1, %v1682_v11  ;;  %1757 = vmatprep.mubr.f32.mxu0 %v5455_v0  ;;  %v2331_v39 = vsel %vm861_vm5, %v5905_v14, %v5888_v10  ;;  %v6190_v14 = vld [vmem:[%s6318_s3 + $0x60] sm:$0xf] }
  0xcf   : > { %5004 = vmatprep.subr.msk.mxu0 %vm391_vm1, %v5615_v6  ;;  %v5913_v15 = vpop.permute.xlu1 %2488  ;;  %v2006_v6 = vsel %vm384_vm2, %v5843_v57, %v2004_v55 }
  0xd0   : > { %v2494_v46 = vsel %vm1025_vm6, %v5913_v15, %v5895_v12 }
  0xd1   : > { %v2493_v17 = vpop.permute.xlu0 %2492 }
  0xd2   : > { %5233 = vmatpush3.msk.msra.mxu1 %vm391_vm1, %v2493_v17  ;;  %v2495_v41 = vsel %vm1025_vm6, %v5895_v12, %v2493_v17  ;;  %v5099_v17 = vld [vmem:[%s6318_s3 + $0x64] sm:$0xf] }
  0xd3   : > { %v5921_v18 = vpop.permute.xlu1 %2655  ;;  %5237 = vmatprep.subr.mxu1 %v5455_v0  ;;  %5235 = vmatmul.mubr.msk.f32.vlgmr.msra.gmra.mrb[26].mxu1 %vm387_vm3, %v5918_v16 }
  0xd4   : > { %5238 = vmatpush3.msk.msra.mxu1 %vm391_vm1, %v5921_v18  ;;  %5239 = vmatprep.mubr.msk.f32.mxu1 %vm5456_vm0, %v5455_v0 }
  0xd5   : > { %5000 = vmatmul.mubr.msk.f32.vlgmr.msra.gmra.mrb[0].mxu0 %vm387_vm3, %v5831_v53  ;;  %v5939_v20 = vpop.permute.xlu0 %2653  ;;  %5242 = vmatprep.subr.mxu1 %v5455_v0  ;;  %v6106_v53 = vld [vmem:[%s6318_s3 + $0x54] sm:$0xf] }
  0xd6   : > { %5005 = vmatpush1.msk.msra.mxu0 %vm391_vm1, %v5605_v4  ;;  %1917 = vmatprep.mubr.f32.mxu0 %v5455_v0  ;;  %v2169_v4 = vsel %vm697_vm4, %v5854_v59, %v2167_v2  ;;  %v2658_v48 = vsel %vm1189_vm7, %v5939_v20, %v5921_v18  ;;  %v6133_v59 = vld [vmem:[%s6318_s3 + $0x58] sm:$0xf] }
  0xd7   : > { %5010 = vmatprep.subr.msk.mxu0 %vm391_vm1, %v2006_v6  ;;  %v5946_v21 = vpop.permute.xlu1 %2816  ;;  %5240 = vmatmul.mubr.msk.f32.vlgmr.msra.gmra.mrb[28].mxu1 %vm387_vm3, %v5935_v19 }
  0xd8   : > { %5244 = vmatprep.mubr.msk.f32.mxu1 %vm5456_vm0, %v5455_v0 }
  0xd9   : > { %v5952_v22 = vpop.permute.xlu0 %2651 }
  0xda   : > { %v2657_v54 = vsel %vm1189_vm7, %v5952_v22, %v5939_v20 }
  0xdb   : > { %v5956_v24 = vpop.permute.xlu1 %2814 }
  0xdd   : > { %5006 = vmatmul.mubr.msk.f32.vlgmr.msra.gmra.mrb[0].mxu0 %vm387_vm3, %v5851_v58  ;;  %v5962_v25 = vpop.permute.xlu0 %2818 }
  0xde   : > { %5011 = vmatpush1.msk.msra.mxu0 %vm391_vm1, %v2005_v23  ;;  %2080 = vmatprep.mubr.f32.mxu0 %v5455_v0  ;;  %v2821_v56 = vsel %vm1353_vm8, %v5946_v21, %v5962_v25 }
  0xdf   : > { %5016 = vmatprep.subr.msk.mxu0 %vm391_vm1, %v2169_v4  ;;  %v5972_v27 = vpop.permute.xlu1 %2981  ;;  %5243 = vmatpush3.msk.msra.mxu1 %vm391_vm1, %v5962_v25 }
  0xe0   : > { %5245 = vmatmul.mubr.msk.f32.vlgmr.msra.gmra.mrb[30].mxu1 %vm387_vm3, %v5967_v26  ;;  %5247 = vmatprep.subr.mxu1 %v5455_v0 }
  0xe1   : > { %v5979_v28 = vpop.permute.xlu0 %2979  ;;  %5248 = vmatpush3.msk.msra.mxu1 %vm391_vm1, %v5972_v27  ;;  %5249 = vmatprep.mubr.msk.f32.mxu1 %vm5456_vm0, %v5455_v0 }
  0xe2   : > { %5252 = vmatprep.subr.mxu1 %v5455_v0  ;;  %v2984_v63 = vsel %vm1517_vm9, %v5979_v28, %v5972_v27 }
  0xe3   : > { %v5994_v31 = vpop.permute.xlu1 %3142 }
  0xe4   : > { %5250 = vmatmul.mubr.msk.f32.vlgmr.msra.gmra.mrb[32].mxu1 %vm387_vm3, %v5988_v29 }
  0xe5   : > { %5012 = vmatmul.mubr.msk.f32.vlgmr.msra.gmra.mrb[0].mxu0 %vm387_vm3, %v5865_v61  ;;  %v6002_v33 = vpop.permute.xlu0 %2977  ;;  %5254 = vmatprep.mubr.msk.f32.mxu1 %vm5456_vm0, %v5455_v0  ;;  %v2820_v61 = vsel %vm1353_vm8, %v5956_v24, %v5946_v21 }
  0xe6   : > { %5017 = vmatpush1.msk.msra.mxu0 %vm391_vm1, %v2168_v30  ;;  %2243 = vmatprep.mubr.f32.mxu0 %v5455_v0  ;;  %v2983_v2 = vsel %vm1517_vm9, %v6002_v33, %v5979_v28 }
  0xe7   : > { %5022 = vmatprep.subr.msk.mxu0 %vm391_vm1, %v2332_v32  ;;  %v6012_v35 = vpop.permute.xlu1 %3140 }
  0xe8   : > { %v3146_v11 = vsel %vm1681_vm10, %v6012_v35, %v5994_v31 }
  0xe9   : > { %v6019_v38 = vpop.permute.xlu0 %3144 }
  0xea   : > { %5253 = vmatpush3.msk.msra.mxu1 %vm391_vm1, %v6019_v38  ;;  %v3147_v3 = vsel %vm1681_vm10, %v5994_v31, %v6019_v38 }
  0xeb   : > { %v6026_v40 = vpop.permute.xlu1 %3467  ;;  %5255 = vmatmul.mubr.msk.f32.vlgmr.msra.gmra.mrb[34].mxu1 %vm387_vm3, %v6017_v37  ;;  %5257 = vmatprep.subr.mxu1 %v5455_v0 }
  0xec   : > { %5258 = vmatpush3.msk.msra.mxu1 %vm391_vm1, %v5670_v8  ;;  %5259 = vmatprep.mubr.msk.f32.mxu1 %vm5456_vm0, %v5455_v0 }
  0xed   : > { %5018 = vmatmul.mubr.msk.f32.vlgmr.msra.gmra.mrb[0].mxu0 %vm387_vm3, %v5883_v5  ;;  %v6044_v43 = vpop.permute.xlu0 %3465  ;;  %5262 = vmatprep.subr.mxu1 %v5455_v0 }
  0xee   : > { %5023 = vmatpush1.msk.msra.mxu0 %vm391_vm1, %v2331_v39  ;;  %2406 = vmatprep.mubr.f32.mxu0 %v5455_v0 }
  0xef   : > { %5028 = vmatprep.subr.msk.mxu0 %vm391_vm1, %v2495_v41  ;;  %v6050_v8 = vpop.permute.xlu1 %3628  ;;  %5260 = vmatmul.mubr.msk.f32.vlgmr.msra.gmra.mrb[36].mxu1 %vm387_vm3, %v6040_v42 }
  0xf0   : > { %5263 = vmatpush3.msk.msra.mxu1 %vm391_vm1, %v6026_v40  ;;  %5264 = vmatprep.mubr.msk.f32.mxu1 %vm5456_vm0, %v5455_v0 }
  0xf1   : > { %v6063_v45 = vpop.permute.xlu0 %3463  ;;  %5267 = vmatprep.subr.mxu1 %v5455_v0 }
  0xf2   : > { %v3469_v20 = vsel %vm384_vm2, %v6063_v45, %v6044_v43 }
  0xf3   : > { %v6069_v47 = vpop.permute.xlu1 %3626  ;;  %5265 = vmatmul.mubr.msk.f32.vlgmr.msra.gmra.mrb[38].mxu1 %vm387_vm3, %v6061_v44 }
  0xf4   : > { %5269 = vmatprep.mubr.msk.f32.mxu1 %vm5456_vm0, %v5455_v0  ;;  %v3632_v22 = vsel %vm697_vm4, %v6069_v47, %v6050_v8 }
  0xf5   : > { %5024 = vmatmul.mubr.msk.f32.vlgmr.msra.gmra.mrb[0].mxu0 %vm387_vm3, %v5900_v13  ;;  %v6080_v49 = vpop.permute.xlu0 %3630 }
  0xf6   : > { %5029 = vmatpush1.msk.msra.mxu0 %vm391_vm1, %v2494_v46  ;;  %2569 = vmatprep.mubr.f32.mxu0 %v5455_v0 }
  0xf7   : > { %5034 = vmatprep.subr.msk.mxu0 %vm391_vm1, %v2658_v48  ;;  %v6090_v51 = vpop.permute.xlu1 %3793  ;;  %5268 = vmatpush3.msk.msra.mxu1 %vm391_vm1, %v6080_v49 }
  0xf8   : > { %5270 = vmatmul.mubr.msk.f32.vlgmr.msra.gmra.mrb[40].mxu1 %vm387_vm3, %v6085_v50  ;;  %5272 = vmatprep.subr.mxu1 %v5455_v0 }
  0xf9   : > { %v6097_v52 = vpop.permute.xlu0 %3791  ;;  %5273 = vmatpush3.msk.msra.mxu1 %vm391_vm1, %v6090_v51  ;;  %5274 = vmatprep.mubr.msk.f32.mxu1 %vm5456_vm0, %v5455_v0 }
  0xfa   : > { %5277 = vmatprep.subr.mxu1 %v5455_v0  ;;  %v3796_v23 = vsel %vm861_vm5, %v6097_v52, %v6090_v51 }
  0xfb   : > { %v6112_v55 = vpop.permute.xlu1 %3954 }
  0xfc   : > { %5275 = vmatmul.mubr.msk.f32.vlgmr.msra.gmra.mrb[42].mxu1 %vm387_vm3, %v6106_v53 }
  0xfd   : > { %5030 = vmatmul.mubr.msk.f32.vlgmr.msra.gmra.mrb[0].mxu0 %vm387_vm3, %v5918_v16  ;;  %v6121_v57 = vpop.permute.xlu0 %3789  ;;  %5279 = vmatprep.mubr.msk.f32.mxu1 %vm5456_vm0, %v5455_v0 }
  0xfe   : > { %5035 = vmatpush1.msk.msra.mxu0 %vm391_vm1, %v2657_v54  ;;  %2732 = vmatprep.mubr.f32.mxu0 %v5455_v0  ;;  %v3795_v24 = vsel %vm861_vm5, %v6121_v57, %v6097_v52 }
  0xff   : > { %5040 = vmatprep.subr.msk.mxu0 %vm391_vm1, %v2821_v56  ;;  %v6128_v58 = vpop.permute.xlu1 %3952 }
 0x100   : > { %v3958_v25 = vsel %vm1025_vm6, %v6128_v58, %v6112_v55 }
 0x101   : > { %v6135_v60 = vpop.permute.xlu0 %3956 }
 0x102   : > { %5278 = vmatpush3.msk.msra.mxu1 %vm391_vm1, %v6135_v60  ;;  %v3959_v4 = vsel %vm1025_vm6, %v6112_v55, %v6135_v60 }
 0x103   : > { %v6142_v62 = vpop.permute.xlu1 %4119  ;;  %5280 = vmatmul.mubr.msk.f32.vlgmr.msra.gmra.mrb[44].mxu1 %vm387_vm3, %v6133_v59  ;;  %5282 = vmatprep.subr.mxu1 %v5455_v0 }
 0x104   : > { %5283 = vmatpush3.msk.msra.mxu1 %vm391_vm1, %v6142_v62  ;;  %5284 = vmatprep.mubr.msk.f32.mxu1 %vm5456_vm0, %v5455_v0 }
 0x105   : > { %5036 = vmatmul.mubr.msk.f32.vlgmr.msra.gmra.mrb[0].mxu0 %vm387_vm3, %v5935_v19  ;;  %5287 = vmatprep.subr.mxu1 %v5455_v0  ;;  %v5105_v19 = vld [vmem:[%s6318_s3 + $0x68] sm:$0xf] }
 0x106   : > { %5041 = vmatpush1.msk.msra.mxu0 %vm391_vm1, %v2820_v61  ;;  %2895 = vmatprep.mubr.f32.mxu0 %v5455_v0 }
 0x107   : > { %5046 = vmatprep.subr.msk.mxu0 %vm391_vm1, %v2984_v63  ;;  %5285 = vmatmul.mubr.msk.f32.vlgmr.msra.gmra.mrb[46].mxu1 %vm387_vm3, %v6157_v1 }
 0x108   : > { %5289 = vmatprep.mubr.msk.f32.mxu1 %vm5456_vm0, %v5455_v0 }
 0x10b   : > { %v4118_v5 = vpop.permute.xlu0 %4117 }
 0x10d   : > { %5042 = vmatmul.mubr.msk.f32.vlgmr.msra.gmra.mrb[0].mxu0 %vm387_vm3, %v5967_v26  ;;  %v4281_v10 = vpop.permute.xlu1 %4280  ;;  %v4122_v26 = vsel %vm1189_vm7, %v4118_v5, %v6142_v62 }
 0x10e   : > { %5047 = vmatpush1.msk.msra.mxu0 %vm391_vm1, %v2983_v2  ;;  %3058 = vmatprep.mubr.f32.mxu0 %v5455_v0 }
 0x10f   : > { %5052 = vmatprep.subr.msk.mxu0 %vm391_vm1, %v3147_v3 }
 0x113   : > { %v4116_v12 = vpop.permute.xlu0 %4115 }
 0x114   : > { %v4121_v27 = vsel %vm1189_vm7, %v4116_v12, %v4118_v5 }
 0x115   : > { %5048 = vmatmul.mubr.msk.f32.vlgmr.msra.gmra.mrb[0].mxu0 %vm387_vm3, %v5988_v29  ;;  %v4279_v13 = vpop.permute.xlu1 %4278 }
 0x116   : > { %5053 = vmatpush1.msk.msra.mxu0 %vm391_vm1, %v3146_v11  ;;  %3221 = vmatprep.mubr.f32.mxu0 %v5455_v0  ;;  %v4284_v29 = vsel %vm1353_vm8, %v4279_v13, %v4281_v10 }
 0x117   : > { %5058 = vmatprep.subr.msk.mxu0 %vm391_vm1, %v5676_v9  ;;  %v4283_v15 = vpop.permute.xlu0 %4282  ;;  %v3470_v9 = vsel %vm384_vm2, %v6044_v43, %v6026_v40 }
 0x118   : > { %5288 = vmatpush3.msk.msra.mxu1 %vm391_vm1, %v4283_v15  ;;  %v4285_v28 = vsel %vm1353_vm8, %v4281_v10, %v4283_v15 }
 0x119   : > { %5290 = vmatmul.mubr.msk.f32.vlgmr.msra.gmra.mrb[48].mxu1 %vm387_vm3, %v6190_v14  ;;  %5292 = vmatprep.subr.mxu1 %v5455_v0 }
 0x11a   : > { %v4446_v16 = vpop.permute.xlu1 %4445  ;;  %5294 = vmatprep.mubr.msk.f32.mxu1 %vm5456_vm0, %v5455_v0 }
 0x11b   : > { %v4444_v18 = vpop.permute.xlu0 %4443  ;;  %5293 = vmatpush3.msk.msra.mxu1 %vm391_vm1, %v4446_v16 }
 0x11c   : > { %5297 = vmatprep.subr.mxu1 %v5455_v0  ;;  %v4448_v30 = vsel %vm1517_vm9, %v4444_v18, %v4446_v16 }
 0x11d   : > { %5054 = vmatmul.mubr.msk.f32.vlgmr.msra.gmra.mrb[0].mxu0 %vm387_vm3, %v6017_v37  ;;  %5295 = vmatmul.mubr.msk.f32.vlgmr.msra.gmra.mrb[50].mxu1 %vm387_vm3, %v5099_v17 }
 0x11e   : > { %5059 = vmatpush1.msk.msra.mxu0 %vm391_vm1, %v5666_v7  ;;  %3381 = vmatprep.mubr.f32.mxu0 %v5455_v0  ;;  %v3633_v7 = vsel %vm697_vm4, %v6050_v8, %v6080_v49  ;;  %v4607_v31 = vpop.permute.xlu1 %4606 }
 0x11f   : > { %5064 = vmatprep.subr.msk.mxu0 %vm391_vm1, %v3470_v9  ;;  %v4442_v6 = vpop.permute.xlu0 %4441  ;;  %5299 = vmatprep.mubr.msk.f32.mxu1 %vm5456_vm0, %v5455_v0 }
 0x120   : > { %v4447_v32 = vsel %vm1517_vm9, %v4442_v6, %v4444_v18 }
 0x123   : > { %v4609_v21 = vpop.permute.xlu0 %4608 }
 0x124   : > { %5298 = vmatpush3.msk.msra.mxu1 %vm391_vm1, %v4609_v21  ;;  %v4611_v33 = vsel %vm1681_vm10, %v4607_v31, %v4609_v21 }
 0x125   : > { %5060 = vmatmul.mubr.msk.f32.vlgmr.msra.gmra.mrb[0].mxu0 %vm387_vm3, %v6040_v42  ;;  %5300 = vmatmul.mubr.msk.f32.vlgmr.msra.gmra.mrb[52].mxu1 %vm387_vm3, %v5105_v19  ;;  %v4605_v34 = vpop.permute.xlu1 %4604 }
 0x126   : > { %5065 = vmatpush1.msk.msra.mxu0 %vm391_vm1, %v3469_v20  ;;  %3544 = vmatprep.mubr.f32.mxu0 %v5455_v0  ;;  %v4610_v35 = vsel %vm1681_vm10, %v4605_v34, %v4607_v31 }
 0x127   : > { %5070 = vmatprep.subr.msk.mxu0 %vm391_vm1, %v3633_v7 }
 0x12d   : > { %5066 = vmatmul.mubr.msk.f32.vlgmr.msra.gmra.mrb[0].mxu0 %vm387_vm3, %v6061_v44 }
 0x12e   : > { %5071 = vmatpush1.msk.msra.mxu0 %vm391_vm1, %v3632_v22  ;;  %3707 = vmatprep.mubr.f32.mxu0 %v5455_v0 }
 0x12f   : > { %5076 = vmatprep.subr.msk.mxu0 %vm391_vm1, %v3796_v23 }
 0x135   : > { %5072 = vmatmul.mubr.msk.f32.vlgmr.msra.gmra.mrb[0].mxu0 %vm387_vm3, %v6085_v50 }
 0x136   : > { %5077 = vmatpush1.msk.msra.mxu0 %vm391_vm1, %v3795_v24  ;;  %3870 = vmatprep.mubr.f32.mxu0 %v5455_v0 }
 0x137   : > { %5082 = vmatprep.subr.msk.mxu0 %vm391_vm1, %v3959_v4 }
 0x13d   : > { %5078 = vmatmul.mubr.msk.f32.vlgmr.msra.gmra.mrb[0].mxu0 %vm387_vm3, %v6106_v53 }
 0x13e   : > { %5083 = vmatpush1.msk.msra.mxu0 %vm391_vm1, %v3958_v25  ;;  %4033 = vmatprep.mubr.f32.mxu0 %v5455_v0 }
 0x13f   : > { %5088 = vmatprep.subr.msk.mxu0 %vm391_vm1, %v4122_v26 }
 0x145   : > { %5084 = vmatmul.mubr.msk.f32.vlgmr.msra.gmra.mrb[0].mxu0 %vm387_vm3, %v6133_v59 }
 0x146   : > { %5089 = vmatpush1.msk.msra.mxu0 %vm391_vm1, %v4121_v27  ;;  %4196 = vmatprep.mubr.f32.mxu0 %v5455_v0 }
 0x147   : > { %5094 = vmatprep.subr.msk.mxu0 %vm391_vm1, %v4285_v28 }
 0x14d   : > { %5090 = vmatmul.mubr.msk.f32.vlgmr.msra.gmra.mrb[0].mxu0 %vm387_vm3, %v6157_v1 }
 0x14e   : > { %5095 = vmatpush1.msk.msra.mxu0 %vm391_vm1, %v4284_v29  ;;  %4359 = vmatprep.mubr.f32.mxu0 %v5455_v0 }
 0x14f   : > { %5100 = vmatprep.subr.msk.mxu0 %vm391_vm1, %v4448_v30 }
 0x155   : > { %5096 = vmatmul.mubr.msk.f32.vlgmr.msra.gmra.mrb[0].mxu0 %vm387_vm3, %v6190_v14 }
 0x156   : > { %5101 = vmatpush1.msk.msra.mxu0 %vm391_vm1, %v4447_v32  ;;  %4522 = vmatprep.mubr.f32.mxu0 %v5455_v0 }
 0x157   : > { %5106 = vmatprep.subr.msk.mxu0 %vm391_vm1, %v4611_v33 }
 0x15d   : > { %5102 = vmatmul.mubr.msk.f32.vlgmr.msra.gmra.mrb[0].mxu0 %vm387_vm3, %v5099_v17 }
 0x15e   : > { %5107 = vmatpush1.msk.msra.mxu0 %vm391_vm1, %v4610_v35  ;;  %4685 = vmatprep.mubr.f32.mxu0 %v5455_v0 }
 0x165   : > { %5108 = vmatmul.mubr.msk.f32.vlgmr.msra.gmra.mrb[0].mxu0 %vm387_vm3, %v5105_v19 }
 0x166   : > { %v535_v36 = vpop.f32.mrb[0].mxu1 }
 0x167   : > { %v5171_v37 = vpop.f32.mrb[1].mxu1 }
 0x16c   : > { %v685_v38 = vpop.f32.mrb[2].mxu1 }
 0x16d   : > { %v686_v39 = vadd.f32 %v685_v38, %v535_v36  ;;  %v5176_v40 = vpop.f32.mrb[3].mxu1 }
 0x170   : > { %v846_v41 = vpop.f32.mrb[4].mxu1 }
 0x171   : > { %v852_v42 = vadd.f32 %v846_v41, %v686_v39  ;;  %v5181_v43 = vpop.f32.mrb[5].mxu1 }
 0x174   : > { %v1010_v8 = vpop.f32.mrb[6].mxu1 }
 0x175   : > { %v1016_v44 = vadd.f32 %v1010_v8, %v852_v42  ;;  %v5186_v45 = vpop.f32.mrb[7].mxu1 }
 0x176   : > { %v4779_v45 = vlaneseq }
 0x17a   : > { %v1174_v46 = vpop.f32.mrb[8].mxu1 }
 0x17b   : > { %v1180_v47 = vadd.f32 %v1174_v46, %v1016_v44  ;;  %v5191_v48 = vpop.f32.mrb[9].mxu1 }
 0x17e   : > { %v1338_v49 = vpop.f32.mrb[10].mxu1 }
 0x17f   : > { %v1344_v50 = vadd.f32 %v1338_v49, %v1180_v47  ;;  %v5196_v51 = vpop.f32.mrb[11].mxu1  ;;  %v4780_v49 = vshrl.u32 %v4779_v45, 7 }
 0x183   : > { %v1502_v0 = vpop.f32.mrb[12].mxu1 }
 0x184   : > { %v1508_v52 = vadd.f32 %v1502_v0, %v1344_v50  ;;  %v5201_v53 = vpop.f32.mrb[13].mxu1  ;;  %v4789_v50 = vsub.s32 2, %v4780_v49  ;;  %v4777_v0 = vld [vmem:[%s6320_s5] sm:$0x7] }
 0x187   : > { %v1666_v54 = vpop.f32.mrb[14].mxu1 }
 0x188   : > { %v1672_v55 = vadd.f32 %v1666_v54, %v1508_v52  ;;  %v5206_v56 = vpop.f32.mrb[15].mxu1  ;;  %v4769_v52 = vpop.permute.xlu0 %4768 }
 0x18e   : > { %v1830_v57 = vpop.f32.mrb[16].mxu1 }
 0x18f   : > { %v1836_v58 = vadd.f32 %v1830_v57, %v1672_v55  ;;  %v5211_v59 = vpop.f32.mrb[17].mxu1  ;;  %v4790_v55 = vrot.slane %v4777_v0, %v4789_v50 }
 0x190   : > { %v4781_v59 = vsub.s32 0, %v4780_v49 }
 0x192   : > { %v1990_v60 = vpop.f32.mrb[18].mxu1 }
 0x193   : > { %v1996_v61 = vadd.f32 %v1990_v60, %v1836_v58  ;;  %v5216_v62 = vpop.f32.mrb[19].mxu1  ;;  %v4785_v60 = vsub.s32 1, %v4780_v49 }
 0x196   : > { %v2153_v63 = vpop.f32.mrb[20].mxu1 }
 0x197   : > { %v2159_v1 = vadd.f32 %v2153_v63, %v1996_v61  ;;  %v5221_v2 = vpop.f32.mrb[21].mxu1  ;;  %v4782_v63 = vrot.slane %v4777_v0, %v4781_v59 }
 0x19b   : > { %v2316_v3 = vpop.f32.mrb[22].mxu1 }
 0x19c   : > { %v2322_v5 = vadd.f32 %v2316_v3, %v2159_v1  ;;  %v5226_v10 = vpop.f32.mrb[23].mxu1  ;;  %v4786_v3 = vrot.slane %v4777_v0, %v4785_v60 }
 0x19f   : > { %v2479_v11 = vpop.f32.mrb[24].mxu1 }
 0x1a0   : > { %v2485_v12 = vadd.f32 %v2479_v11, %v2322_v5  ;;  %v5231_v13 = vpop.f32.mrb[25].mxu1 }
 0x1a6   : > { %v2642_v14 = vpop.f32.mrb[26].mxu1 }
 0x1a7   : > { %v2648_v15 = vadd.f32 %v2642_v14, %v2485_v12  ;;  %v5236_v16 = vpop.f32.mrb[27].mxu1 }
 0x1aa   : > { %v2805_v17 = vpop.f32.mrb[28].mxu1 }
 0x1ab   : > { %v2811_v18 = vadd.f32 %v2805_v17, %v2648_v15  ;;  %v5241_v9 = vpop.f32.mrb[29].mxu1 }
 0x1b3   : > { %v2968_v6 = vpop.f32.mrb[30].mxu1 }
 0x1b4   : > { %v2974_v19 = vadd.f32 %v2968_v6, %v2811_v18  ;;  %v5246_v20 = vpop.f32.mrb[31].mxu1 }
 0x1b7   : > { %v3131_v21 = vpop.f32.mrb[32].mxu1 }
 0x1b8   : > { %v3137_v7 = vadd.f32 %v3131_v21, %v2974_v19  ;;  %v5251_v22 = vpop.f32.mrb[33].mxu1 }
 0x1be   : > { %v3294_v23 = vpop.f32.mrb[34].mxu1 }
 0x1bf   : > { %v3300_v24 = vadd.f32 %v3294_v23, %v3137_v7  ;;  %v5256_v4 = vpop.f32.mrb[35].mxu1 }
 0x1c2   : > { %v3454_v25 = vpop.f32.mrb[36].mxu1 }
 0x1c3   : > { %v3460_v26 = vadd.f32 %v3454_v25, %v3300_v24  ;;  %v5261_v27 = vpop.f32.mrb[37].mxu1 }
 0x1c6   : > { %v3617_v28 = vpop.f32.mrb[38].mxu1 }
 0x1c7   : > { %v3623_v29 = vadd.f32 %v3617_v28, %v3460_v26  ;;  %v5266_v30 = vpop.f32.mrb[39].mxu1 }
 0x1cb   : > { %v3780_v31 = vpop.f32.mrb[40].mxu1 }
 0x1cc   : > { %v3786_v32 = vadd.f32 %v3780_v31, %v3623_v29  ;;  %v5271_v33 = vpop.f32.mrb[41].mxu1 }
 0x1cf   : > { %v3943_v34 = vpop.f32.mrb[42].mxu1 }
 0x1d0   : > { %v3949_v35 = vadd.f32 %v3943_v34, %v3786_v32  ;;  %v5276_v36 = vpop.f32.mrb[43].mxu1 }
 0x1d6   : > { %v4106_v37 = vpop.f32.mrb[44].mxu1 }
 0x1d7   : > { %v4112_v38 = vadd.f32 %v4106_v37, %v3949_v35  ;;  %v5281_v39 = vpop.f32.mrb[45].mxu1 }
 0x1da   : > { %v4269_v40 = vpop.f32.mrb[46].mxu1 }
 0x1db   : > { %v4275_v41 = vadd.f32 %v4269_v40, %v4112_v38  ;;  %v5286_v42 = vpop.f32.mrb[47].mxu1 }
 0x1ec   : > { %v4432_v43 = vpop.f32.mrb[48].mxu1 }
 0x1ed   : > { %v4438_v8 = vadd.f32 %v4432_v43, %v4275_v41  ;;  %v5291_v44 = vpop.f32.mrb[49].mxu1 }
 0x1f0   : > { %v4595_v46 = vpop.f32.mrb[50].mxu1 }
 0x1f1   : > { %v4601_v47 = vadd.f32 %v4595_v46, %v4438_v8  ;;  %v5296_v48 = vpop.f32.mrb[51].mxu1 }
 0x1f8   : > { %v4758_v51 = vpop.f32.mrb[52].mxu1 }
 0x1f9   : > { %v4764_v53 = vadd.f32 %v4758_v51, %v4601_v47  ;;  %v5301_v54 = vpop.f32.mrb[53].mxu1 }
 0x1fb   : > { %v4773_v56 = vadd.f32 %v4769_v52, %v4764_v53 }
 0x1fd   : > { %v4776_v57 = vmax.f32 %v4773_v56, 0.0 }
 0x1ff   : > { %v4796_v58 = vmul.f32 %v4790_v55, %v4776_v57 }
 0x201   : > { %4803 = vst.msk [vmem:[%s369_s7 + $0x8] sm:$0xf] %vm4802_vm11, %v4796_v58 }
 0x238   : > { %v4687_v61 = vpop.f32.mrb[0].mxu0 }
 0x239   : > { %v4771_v62 = vadd.f32 %v4769_v52, %v4687_v61  ;;  %v4689_v1 = vpop.f32.mrb[1].mxu0 }
 0x23a   : > { %v4772_v2 = vadd.f32 %v4769_v52, %v4689_v1 }
 0x23b   : > { %v4774_v5 = vmax.f32 %v4771_v62, 0.0 }
 0x23c   : > { %v4775_v10 = vmax.f32 %v4772_v2, 0.0 }
 0x23d   : > { %v4794_v11 = vmul.f32 %v4782_v63, %v4774_v5 }
 0x23e   : > { %v4795_v12 = vmul.f32 %v4786_v3, %v4775_v10 }
 0x240   : > { %v4799_v13 = vcombine.low %v4794_v11, %v4795_v12 }
 0x242   : > { %4801 = vst [vmem:[%s369_s7] sm:$0xff] %v4799_v13 }
 0x243 PF: > { %s16_s25 = sadd.s32 1, %s5453_s25   ;;  %s6322_s21 = smov %s5445_s23 }
 0x244   : > { %p13_p10 = scmp.ge.s32.totalorder %s16_s25, 18   ;;  %s6323_s22 = smov %s5449_s24 }
 0x245   : > { %s6324_s23 = smov %s6327_s26  ;;  %s6325_s24 = smov %s6331_s27 }
 0x246   :  { %15 = sbr.rel (!%p13_p10) target bundleno = 3 (0x3), region = 106 }

// kernel: d3block_forward.4
= control target key start
LH: loop header
LB: loop body
LE: loop exit
PB: predicated region body
PF: predicated region fallthrough
CT: control target
= control target key end

     0   :  { %s5495_s21 = smov 0   ;;  %s5497_s22 = smov 0   ;;  %s6317_s0 = inlined_call_operand.vmem [shape: f32[2,10,4,362], index: 0, kind: input, shape index: {}, may-alias: {0,1,2}]   ;;  %s6318_s1 = inlined_call_operand.vmem [shape: f32[2,10,4,362], index: 1, kind: input, shape index: {}, may-alias: {0,1,2}]   ;;  %s6319_s2 = inlined_call_operand.vmem [shape: f32[2,10,4,362], index: 2, kind: input, shape index: {}, may-alias: {0,1,2}]   ;;  %s6320_s3 = inlined_call_operand.vmem [shape: f32[27,8,4], index: 3, kind: input, shape index: {}]   ;;  %s6321_s4 = inlined_call_operand.vmem [shape: f32[8,1], index: 4, kind: input, shape index: {}]   ;;  %s6322_s5 = inlined_call_operand.vmem [shape: f32[1,324], index: 5, kind: input, shape index: {}]   ;;  %s6323_s6 = inlined_call_operand.vmem [shape: f32[2,8,8,324], index: 6, kind: output, shape index: {}]  }
   0x1   :  { %s5499_s23 = smov 0   ;;  %s5501_s24 = smov 0  }
   0x2   :  { %s5503_s25 = smov 0  }
   0x3 LB: > { %s25_s26 = sadd.s32 1, %s5439_s23  ;;  %s28_s27 = sadd.s32 1, %s5443_s24  ;;  %s5447_s25 = sphi %s5503_s25, %s16_s25   ;;  %s5443_s24 = sphi %s5501_s24, %s6327_s24   ;;  %s5439_s23 = sphi %s5499_s23, %s6326_s23   ;;  %s5435_s22 = sphi %s5497_s22, %s6325_s22   ;;  %s5431_s21 = sphi %s5495_s21, %s6324_s21  }
   0x4   : > { %p26_p0 = scmp.ge.s32.totalorder %s25_s26, 8  ;;  %p4939_p1 = scmp.ge.s32.totalorder %s5447_s25, 1 }
   0x5   : > { %p272_p2 = scmp.lt.s32.totalorder %s5447_s25, 17 }
   0x6   : > { %s6329_s26 = smov (%p26_p0, %s25_s26), 0  ;;  %s6331_s27 = smov (!%p26_p0, %s28_s27), %s5443_s24 }
   0x7   : > { %p273_p3 = pnand %p4939_p1, %p272_p2  ;;  %p30_p4 = scmp.ge.s32.totalorder %s6331_s27, 2 }
   0x8   : > { %p330_p5 = scmp.lt.s32.totalorder (!%p273_p3), %s5435_s22, 1  ;;  %p332_p6 = scmp.lt.s32.totalorder (!%p273_p3), %s5431_s21, 9  ;;  %v5449_v0 = vmov (!%p273_p3), 0.0   ;;  %vm5450_vm0 = vmmov (!%p273_p3), 0   ;;  %vm391_vm1 = vcmask (!%p273_p3), 1043456   ;;  %vm384_vm2 = vcmask (!%p273_p3), 1039360  }
   0x9   : > { %s6333_s27 = smov (%p30_p4, %s6331_s27), 0  ;;  %276 = sbr.rel (%p273_p3) target bundleno = 575 (0x23f), region = 44 }
   0xa   : > { %5161 = vmatprep.subr.mxu1 (!%p273_p3), %v5449_v0  ;;  %462 = vmatprep.mubr.f32.mxu0 (!%p273_p3), %v5449_v0  ;;  %s5451_s12 = smov (!%p273_p3), 127   ;;  %s5452_s13 = smov (!%p273_p3), 126   ;;  %v4944_v15 = vld [vmem:[%s6320_s3 + $0x8] sm:$0xff] (!%p273_p3)  ;;  %vm387_vm3 = vcmask (!%p273_p3), 31744   ;;  %vm697_vm4 = vcmask (!%p273_p3), 1031168   ;;  %v372_v21 = vld [vmem:[%s6320_s3] sm:$0xff] (!%p273_p3) }
   0xb   : > { %5163 = vmatprep.mubr.msk.f32.mxu1 (!%p273_p3), %vm5450_vm0, %v5449_v0  ;;  %s5453_s14 = smov (!%p273_p3), 110   ;;  %s5454_s15 = smov (!%p273_p3), 109   ;;  %vm861_vm5 = vcmask (!%p273_p3), 900096   ;;  %v4955_v26 = vld [vmem:[%s6320_s3 + $0x10] sm:$0xff] (!%p273_p3)  ;;  %v4961_v29 = vld [vmem:[%s6320_s3 + $0x18] sm:$0xff] (!%p273_p3)  ;;  %vm1025_vm6 = vcmask (!%p273_p3), 891904  }
   0xc   : > { %s339_s16 = sadd.s32 (!%p273_p3), 1, %s5431_s21  ;;  %s5455_s17 = smov (!%p273_p3), 108   ;;  %v4967_v34 = vld [vmem:[%s6320_s3 + $0x20] sm:$0xff] (!%p273_p3)  ;;  %vm1189_vm7 = vcmask (!%p273_p3), 883712   ;;  %v4973_v38 = vld [vmem:[%s6320_s3 + $0x28] sm:$0xff] (!%p273_p3)  ;;  %v4979_v44 = vld [vmem:[%s6320_s3 + $0x30] sm:$0xff] (!%p273_p3) }
   0xd   : > { %p342_p7 = scmp.lt.s32.totalorder (!%p273_p3), %s339_s16, 9  ;;  %s5456_s18 = smov (!%p273_p3), 92   ;;  %vm1353_vm8 = vcmask (!%p273_p3), 752640   ;;  %v4985_v49 = vld [vmem:[%s6320_s3 + $0x38] sm:$0xff] (!%p273_p3)  ;;  %vm1517_vm9 = vcmask (!%p273_p3), 744448   ;;  %v5825_v53 = vld [vmem:[%s6320_s3 + $0x40] sm:$0xff] (!%p273_p3) }
   0xe   : > { %s5458_s10 = smov (!%p273_p3), 90   ;;  %v5845_v58 = vld [vmem:[%s6320_s3 + $0x48] sm:$0xff] (!%p273_p3)  ;;  %vm1681_vm10 = vcmask (!%p273_p3), 736256   ;;  %v5859_v61 = vld [vmem:[%s6320_s3 + $0x50] sm:$0xff] (!%p273_p3)  ;;  %p363_p9 = scmp.lt.s32.totalorder (!%p273_p3), %s5431_s21, 7  ;;  %vm4796_vm11 = vcmask (!%p273_p3), 556032  }
  0x10   : > { %s6335_s22 = smov (!%p330_p5, %s5435_s22), 1  ;;  %s6337_s16 = smov (!%p342_p7, %s339_s16), 9 }
  0x11   : > { %s333_s28 = scalar_select %p332_p6, %s5431_s21, 9 }
  0x12   : > { %s5534_s29 = smul.u32 30, %s6335_s22 }
  0x13   : > { %s5348_s30 = smul.u32 3, %s333_s28  ;;  %s5457_s28 = smov 91  }
  0x14   : > { %s5350_s19 = smul.u32 3, %s6337_s16 }
  0x15   : > { %s336_s7 = sadd.s32 %s5534_s29, %s5348_s30 }
  0x16   : > { %s4940_s8 = sshll.u32 %s336_s7, 2  ;;  %s346_s20 = sadd.s32 %s5350_s19, %s5534_s29 }
  0x17   : > { %s338_s11 = scalar_lea.vmem %s6317_s0, %s4940_s8  ;;  %s4941_s30 = sshll.u32 %s346_s20, 2 }
  0x18   : > { %v5542_v1 = vld [vmem:[%s338_s11] sm:$0xff]  ;;  %v5552_v3 = vld [vmem:[%s338_s11 + $0x8] sm:$0xf]  ;;  %s348_s9 = scalar_lea.vmem %s6318_s1, %s4941_s30  ;;  %s350_s11 = sadd.s32 2, %s5431_s21 }
  0x19   : > { %378 = vrot.lane.b32.xlu1 %v5542_v1, %s5451_s12  ;;  %v5548_v2 = vcombine.high %v5542_v1, %v5542_v1  ;;  %v5599_v4 = vld [vmem:[%s348_s9] sm:$0xff]  ;;  %v5603_v5 = vld [vmem:[%s348_s9 + $0x8] sm:$0xf]  ;;  %p353_p8 = scmp.lt.s32.totalorder %s350_s11, 9  ;;  %s6341_s21 = smov (!%p363_p9, %s5431_s21), 7 }
  0x1a   : > { %v5609_v6 = vcombine.high %v5599_v4, %v5599_v4 }
  0x1b   : > { %380 = vrot.lane.b32.xlu0 %v5548_v2, %s5451_s12  ;;  %s6339_s11 = smov (!%p353_p8, %s350_s11), 9 }
  0x1c   : > { %s5351_s16 = smul.u32 3, %s6339_s11 }
  0x1d   : > { %693 = vrot.lane.b32.xlu1 %v5548_v2, %s5452_s13 }
  0x1e   : > { %s357_s19 = sadd.s32 %s5351_s16, %s5534_s29  ;;  %s5353_s16 = smul.u32 24, %s6335_s22 }
  0x1f   : > { %382 = vrot.lane.b32.xlu0 %v5552_v3, %s5451_s12  ;;  %s4942_s20 = sshll.u32 %s357_s19, 2 }
  0x20   : > { %s359_s8 = scalar_lea.vmem %s6319_s2, %s4942_s20 }
  0x21   : > { %691 = vrot.lane.b32.xlu1 %v5542_v1, %s5452_s13  ;;  %v5660_v7 = vld [vmem:[%s359_s8] sm:$0xff]  ;;  %v5664_v8 = vld [vmem:[%s359_s8 + $0x8] sm:$0xf] }
  0x22   : > { %v5670_v9 = vcombine.high %v5660_v7, %v5660_v7 }
  0x23   : > { %695 = vrot.lane.b32.xlu0 %v5552_v3, %s5452_s13 }
  0x25   : > { %859 = vrot.lane.b32.xlu1 %v5552_v3, %s5453_s14 }
  0x27   : > { %857 = vrot.lane.b32.xlu0 %v5548_v2, %s5453_s14 }
  0x29   : > { %1021 = vrot.lane.b32.xlu1 %v5548_v2, %s5454_s15 }
  0x2b   : > { %855 = vrot.lane.b32.xlu0 %v5542_v1, %s5453_s14 }
  0x2d   : > { %1019 = vrot.lane.b32.xlu1 %v5542_v1, %s5454_s15 }
  0x2f   : > { %1023 = vrot.lane.b32.xlu0 %v5552_v3, %s5454_s15 }
  0x31   : > { %1187 = vrot.lane.b32.xlu1 %v5552_v3, %s5455_s17 }
  0x33   : > { %1185 = vrot.lane.b32.xlu0 %v5548_v2, %s5455_s17 }
  0x35   : > { %1349 = vrot.lane.b32.xlu1 %v5548_v2, %s5456_s18 }
  0x37   : > { %1183 = vrot.lane.b32.xlu0 %v5542_v1, %s5455_s17 }
  0x39   : > { %1347 = vrot.lane.b32.xlu1 %v5542_v1, %s5456_s18 }
  0x3b   : > { %1351 = vrot.lane.b32.xlu0 %v5552_v3, %s5456_s18 }
  0x3d   : > { %1515 = vrot.lane.b32.xlu1 %v5552_v3, %s5457_s28 }
  0x3f   : > { %1513 = vrot.lane.b32.xlu0 %v5548_v2, %s5457_s28 }
  0x41   : > { %1677 = vrot.lane.b32.xlu1 %v5548_v2, %s5458_s10 }
  0x43   : > { %1511 = vrot.lane.b32.xlu0 %v5542_v1, %s5457_s28 }
  0x45   : > { %1675 = vrot.lane.b32.xlu1 %v5542_v1, %s5458_s10 }
  0x47   : > { %1679 = vrot.lane.b32.xlu0 %v5552_v3, %s5458_s10 }
  0x49   : > { %2003 = vrot.lane.b32.xlu1 %v5603_v5, %s5451_s12 }
  0x4b   : > { %2001 = vrot.lane.b32.xlu0 %v5609_v6, %s5451_s12 }
  0x4d   : > { %2164 = vrot.lane.b32.xlu1 %v5609_v6, %s5452_s13 }
  0x4f   : > { %1999 = vrot.lane.b32.xlu0 %v5599_v4, %s5451_s12 }
  0x51   : > { %2162 = vrot.lane.b32.xlu1 %v5599_v4, %s5452_s13 }
  0x53   : > { %2166 = vrot.lane.b32.xlu0 %v5603_v5, %s5452_s13 }
  0x55   : > { %2329 = vrot.lane.b32.xlu1 %v5603_v5, %s5453_s14 }
  0x57   : > { %2327 = vrot.lane.b32.xlu0 %v5609_v6, %s5453_s14 }
  0x59   : > { %2490 = vrot.lane.b32.xlu1 %v5609_v6, %s5454_s15 }
  0x5b   : > { %2325 = vrot.lane.b32.xlu0 %v5599_v4, %s5453_s14 }
  0x5d   : > { %2488 = vrot.lane.b32.xlu1 %v5599_v4, %s5454_s15 }
  0x5f   : > { %2492 = vrot.lane.b32.xlu0 %v5603_v5, %s5454_s15 }
  0x61   : > { %2655 = vrot.lane.b32.xlu1 %v5603_v5, %s5455_s17 }
  0x63   : > { %2653 = vrot.lane.b32.xlu0 %v5609_v6, %s5455_s17 }
  0x65   : > { %2816 = vrot.lane.b32.xlu1 %v5609_v6, %s5456_s18 }
  0x67   : > { %2651 = vrot.lane.b32.xlu0 %v5599_v4, %s5455_s17 }
  0x69   : > { %2814 = vrot.lane.b32.xlu1 %v5599_v4, %s5456_s18 }
  0x6b   : > { %2818 = vrot.lane.b32.xlu0 %v5603_v5, %s5456_s18 }
  0x6d   : > { %2981 = vrot.lane.b32.xlu1 %v5603_v5, %s5457_s28 }
  0x6f   : > { %2979 = vrot.lane.b32.xlu0 %v5609_v6, %s5457_s28 }
  0x71   : > { %3142 = vrot.lane.b32.xlu1 %v5609_v6, %s5458_s10 }
  0x73   : > { %2977 = vrot.lane.b32.xlu0 %v5599_v4, %s5457_s28 }
  0x75   : > { %3140 = vrot.lane.b32.xlu1 %v5599_v4, %s5458_s10 }
  0x77   : > { %3144 = vrot.lane.b32.xlu0 %v5603_v5, %s5458_s10 }
  0x79   : > { %3467 = vrot.lane.b32.xlu1 %v5664_v8, %s5451_s12 }
  0x7b   : > { %3465 = vrot.lane.b32.xlu0 %v5670_v9, %s5451_s12 }
  0x7d   : > { %3628 = vrot.lane.b32.xlu1 %v5670_v9, %s5452_s13 }
  0x7f   : > { %3463 = vrot.lane.b32.xlu0 %v5660_v7, %s5451_s12 }
  0x81   : > { %3626 = vrot.lane.b32.xlu1 %v5660_v7, %s5452_s13 }
  0x83   : > { %3630 = vrot.lane.b32.xlu0 %v5664_v8, %s5452_s13 }
  0x85   : > { %3793 = vrot.lane.b32.xlu1 %v5664_v8, %s5453_s14 }
  0x87   : > { %3791 = vrot.lane.b32.xlu0 %v5670_v9, %s5453_s14 }
  0x89   : > { %3954 = vrot.lane.b32.xlu1 %v5670_v9, %s5454_s15 }
  0x8b   : > { %v379_v10 = vpop.permute.xlu1 %378  ;;  %3789 = vrot.lane.b32.xlu0 %v5660_v7, %s5453_s14 }
  0x8d   : > { %v381_v11 = vpop.permute.xlu0 %380  ;;  %3952 = vrot.lane.b32.xlu1 %v5660_v7, %s5454_s15 }
  0x8e   : > { %v385_v16 = vsel %vm384_vm2, %v379_v10, %v381_v11 }
  0x8f   : > { %v694_v12 = vpop.permute.xlu1 %693  ;;  %3956 = vrot.lane.b32.xlu0 %v5664_v8, %s5454_s15 }
  0x91   : > { %v383_v13 = vpop.permute.xlu0 %382  ;;  %4119 = vrot.lane.b32.xlu1 %v5664_v8, %s5455_s17 }
  0x92   : > { %5162 = vmatpush3.msk.msra.mxu1 %vm391_vm1, %v383_v13  ;;  %v386_v14 = vsel %vm384_vm2, %v381_v11, %v383_v13  ;;  %v5890_v11 = vld [vmem:[%s6320_s3 + $0x60] sm:$0xff] }
  0x93   : > { %4945 = vmatprep.subr.msk.mxu0 %vm391_vm1, %v386_v14  ;;  %v692_v17 = vpop.permute.xlu1 %691  ;;  %5164 = vmatmul.mubr.msk.f32.vlgmr.msra.gmra.mrb[0].mxu1 %vm387_vm3, %v4944_v15 }
  0x94   : > { %4946 = vmatpush1.msk.msra.mxu0 %vm391_vm1, %v385_v16  ;;  %5166 = vmatprep.subr.mxu1 %v5449_v0  ;;  %v698_v23 = vsel %vm697_vm4, %v692_v17, %v694_v12  ;;  %v5912_v16 = vld [vmem:[%s6320_s3 + $0x68] sm:$0xff] }
  0x95   : > { %4947 = vmatmul.mubr.msk.f32.vlgmr.msra.gmra.mrb[0].mxu0 %vm387_vm3, %v4944_v15  ;;  %4950 = vmatprep.subr.msk.mxu0 %vm391_vm1, %v5548_v2  ;;  %v696_v18 = vpop.permute.xlu0 %695 }
  0x96   : > { %4951 = vmatpush1.msk.msra.mxu0 %vm391_vm1, %v5542_v1  ;;  %v699_v19 = vsel %vm697_vm4, %v694_v12, %v696_v18  ;;  %5167 = vmatpush3.msk.msra.mxu1 %vm391_vm1, %v5552_v3 }
  0x97   : > { %4956 = vmatprep.subr.msk.mxu0 %vm391_vm1, %v699_v19  ;;  %5168 = vmatprep.mubr.msk.f32.mxu1 %vm5450_vm0, %v5449_v0  ;;  %v860_v20 = vpop.permute.xlu1 %859  ;;  %v5929_v19 = vld [vmem:[%s6320_s3 + $0x70] sm:$0xff] }
  0x98   : > { %5171 = vmatprep.subr.mxu1 %v5449_v0  ;;  %612 = vmatprep.mubr.f32.mxu0 %v5449_v0 }
  0x99   : > { %5169 = vmatmul.mubr.msk.f32.vlgmr.msra.gmra.mrb[2].mxu1 %vm387_vm3, %v372_v21  ;;  %v858_v22 = vpop.permute.xlu0 %857  ;;  %4117 = vrot.lane.b32.xlu0 %v5670_v9, %s5455_s17 }
  0x9a   : > { %5172 = vmatpush3.msk.msra.mxu1 %vm391_vm1, %v696_v18  ;;  %5173 = vmatprep.mubr.msk.f32.mxu1 %vm5450_vm0, %v5449_v0  ;;  %v863_v25 = vsel %vm861_vm5, %v858_v22, %v860_v20 }
  0x9b   : > { %5176 = vmatprep.subr.mxu1 %v5449_v0  ;;  %v1022_v24 = vpop.permute.xlu1 %1021  ;;  %4280 = vrot.lane.b32.xlu1 %v5670_v9, %s5456_s18 }
  0x9d   : > { %4952 = vmatmul.mubr.msk.f32.vlgmr.msra.gmra.mrb[0].mxu0 %vm387_vm3, %v372_v21  ;;  %v856_v27 = vpop.permute.xlu0 %855  ;;  %5174 = vmatmul.mubr.msk.f32.vlgmr.msra.gmra.mrb[4].mxu1 %vm387_vm3, %v4955_v26 }
  0x9e   : > { %4957 = vmatpush1.msk.msra.mxu0 %vm391_vm1, %v698_v23  ;;  %773 = vmatprep.mubr.f32.mxu0 %v5449_v0  ;;  %v862_v31 = vsel %vm861_vm5, %v856_v27, %v858_v22 }
  0x9f   : > { %4962 = vmatprep.subr.msk.mxu0 %vm391_vm1, %v863_v25  ;;  %5177 = vmatpush3.msk.msra.mxu1 %vm391_vm1, %v860_v20  ;;  %v1020_v28 = vpop.permute.xlu1 %1019 }
  0xa0   : > { %4115 = vrot.lane.b32.xlu0 %v5660_v7, %s5455_s17  ;;  %5178 = vmatprep.mubr.msk.f32.mxu1 %vm5450_vm0, %v5449_v0  ;;  %v1026_v39 = vsel %vm1025_vm6, %v1020_v28, %v1022_v24  ;;  %s5352_s17 = smul.u32 3, %s6341_s21 }
  0xa1   : > { %v1024_v30 = vpop.permute.xlu0 %1023  ;;  %5181 = vmatprep.subr.mxu1 %v5449_v0  ;;  %5179 = vmatmul.mubr.msk.f32.vlgmr.msra.gmra.mrb[6].mxu1 %vm387_vm3, %v4961_v29 }
  0xa2   : > { %5182 = vmatpush3.msk.msra.mxu1 %vm391_vm1, %v1024_v30  ;;  %4278 = vrot.lane.b32.xlu1 %v5660_v7, %s5456_s18  ;;  %v1027_v33 = vsel %vm1025_vm6, %v1022_v24, %v1024_v30  ;;  %s367_s19 = sadd.s32 %s5353_s16, %s5352_s17 }
  0xa3   : > { %v1188_v32 = vpop.permute.xlu1 %1187  ;;  %5183 = vmatprep.mubr.msk.f32.mxu1 %vm5450_vm0, %v5449_v0  ;;  %5186 = vmatprep.subr.mxu1 %v5449_v0 }
  0xa4   : > { %4282 = vrot.lane.b32.xlu0 %v5664_v8, %s5456_s18  ;;  %s4943_s18 = sshll.u32 %s367_s19, 3 }
  0xa5   : > { %4958 = vmatmul.mubr.msk.f32.vlgmr.msra.gmra.mrb[0].mxu0 %vm387_vm3, %v4955_v26  ;;  %v1186_v35 = vpop.permute.xlu0 %1185  ;;  %5184 = vmatmul.mubr.msk.f32.vlgmr.msra.gmra.mrb[8].mxu1 %vm387_vm3, %v4967_v34  ;;  %v5961_v26 = vld [vmem:[%s6320_s3 + $0x78] sm:$0xff]  ;;  %s369_s30 = scalar_lea.vmem %s6323_s6, %s4943_s18 }
  0xa6   : > { %4963 = vmatpush1.msk.msra.mxu0 %vm391_vm1, %v862_v31  ;;  %937 = vmatprep.mubr.f32.mxu0 %v5449_v0  ;;  %v1191_v41 = vsel %vm1189_vm7, %v1186_v35, %v1188_v32 }
  0xa7   : > { %4968 = vmatprep.subr.msk.mxu0 %vm391_vm1, %v1027_v33  ;;  %v1350_v36 = vpop.permute.xlu1 %1349  ;;  %5187 = vmatpush3.msk.msra.mxu1 %vm391_vm1, %v1188_v32 }
  0xa8   : > { %4443 = vrot.lane.b32.xlu0 %v5670_v9, %s5457_s28  ;;  %4445 = vrot.lane.b32.xlu1 %v5664_v8, %s5457_s28 }
  0xa9   : > { %v1184_v37 = vpop.permute.xlu0 %1183  ;;  %5188 = vmatprep.mubr.msk.f32.mxu1 %vm5450_vm0, %v5449_v0  ;;  %5191 = vmatprep.subr.mxu1 %v5449_v0 }
  0xaa   : > { %5189 = vmatmul.mubr.msk.f32.vlgmr.msra.gmra.mrb[10].mxu1 %vm387_vm3, %v4973_v38  ;;  %v1190_v46 = vsel %vm1189_vm7, %v1184_v37, %v1186_v35  ;;  %v6011_v37 = vld [vmem:[%s6320_s3 + $0x88] sm:$0xff] }
  0xab   : > { %v1348_v40 = vpop.permute.xlu1 %1347  ;;  %5193 = vmatprep.mubr.msk.f32.mxu1 %vm5450_vm0, %v5449_v0 }
  0xac   : > { %4441 = vrot.lane.b32.xlu0 %v5660_v7, %s5457_s28  ;;  %4606 = vrot.lane.b32.xlu1 %v5670_v9, %s5458_s10  ;;  %v1354_v54 = vsel %vm1353_vm8, %v1348_v40, %v1350_v36 }
  0xad   : > { %4964 = vmatmul.mubr.msk.f32.vlgmr.msra.gmra.mrb[0].mxu0 %vm387_vm3, %v4961_v29  ;;  %v1352_v42 = vpop.permute.xlu0 %1351  ;;  %v5982_v29 = vld [vmem:[%s6320_s3 + $0x80] sm:$0xff] }
  0xae   : > { %4969 = vmatpush1.msk.msra.mxu0 %vm391_vm1, %v1026_v39  ;;  %1101 = vmatprep.mubr.f32.mxu0 %v5449_v0  ;;  %v1355_v48 = vsel %vm1353_vm8, %v1350_v36, %v1352_v42  ;;  %v5459_v36 = vmov 0  }
  0xaf   : > { %4974 = vmatprep.subr.msk.mxu0 %vm391_vm1, %v1191_v41  ;;  %5192 = vmatpush3.msk.msra.mxu1 %vm391_vm1, %v1352_v42  ;;  %v1516_v43 = vpop.permute.xlu1 %1515  ;;  %v6034_v42 = vld [vmem:[%s6320_s3 + $0x90] sm:$0xff] }
  0xb0   : > { %4608 = vrot.lane.b32.xlu0 %v5664_v8, %s5458_s10  ;;  %5196 = vmatprep.subr.mxu1 %v5449_v0 }
  0xb1   : > { %v1514_v45 = vpop.permute.xlu0 %1513  ;;  %5194 = vmatmul.mubr.msk.f32.vlgmr.msra.gmra.mrb[12].mxu1 %vm387_vm3, %v4979_v44  ;;  %4604 = vrot.lane.b32.xlu1 %v5660_v7, %s5458_s10 }
  0xb2   : > { %5197 = vmatpush3.msk.msra.mxu1 %vm391_vm1, %v1516_v43  ;;  %5198 = vmatprep.mubr.msk.f32.mxu1 %vm5450_vm0, %v5449_v0  ;;  %v1519_v56 = vsel %vm1517_vm9, %v1514_v45, %v1516_v43 }
  0xb3   : > { %v1678_v47 = vpop.permute.xlu1 %1677  ;;  %5201 = vmatprep.subr.mxu1 %v5449_v0  ;;  %5405 = vset.pattern.permute.xlu0 %v5459_v36 }
  0xb5   : > { %4970 = vmatmul.mubr.msk.f32.vlgmr.msra.gmra.mrb[0].mxu0 %vm387_vm3, %v4967_v34  ;;  %v1512_v50 = vpop.permute.xlu0 %1511  ;;  %5199 = vmatmul.mubr.msk.f32.vlgmr.msra.gmra.mrb[14].mxu1 %vm387_vm3, %v4985_v49  ;;  %v4765_v34 = vld [vmem:[%s6321_s4] sm:$0xff] }
  0xb6   : > { %4975 = vmatpush1.msk.msra.mxu0 %vm391_vm1, %v1190_v46  ;;  %1265 = vmatprep.mubr.f32.mxu0 %v5449_v0  ;;  %v1518_v62 = vsel %vm1517_vm9, %v1512_v50, %v1514_v45  ;;  %v6079_v50 = vld [vmem:[%s6320_s3 + $0xa0] sm:$0xff] }
  0xb7   : > { %4980 = vmatprep.subr.msk.mxu0 %vm391_vm1, %v1355_v48  ;;  %v1676_v51 = vpop.permute.xlu1 %1675  ;;  %5203 = vmatprep.mubr.msk.f32.mxu1 %vm5450_vm0, %v5449_v0 }
  0xb8   : > { %v1682_v12 = vsel %vm1681_vm10, %v1676_v51, %v1678_v47  ;;  %4768 = vperm.xlu0 %5405, %v4765_v34  }
  0xb9   : > { %v1680_v52 = vpop.permute.xlu0 %1679 }
  0xba   : > { %5202 = vmatpush3.msk.msra.mxu1 %vm391_vm1, %v1680_v52  ;;  %v1683_v1 = vsel %vm1681_vm10, %v1678_v47, %v1680_v52 }
  0xbb   : > { %v2004_v55 = vpop.permute.xlu1 %2003  ;;  %5204 = vmatmul.mubr.msk.f32.vlgmr.msra.gmra.mrb[16].mxu1 %vm387_vm3, %v5825_v53  ;;  %5206 = vmatprep.subr.mxu1 %v5449_v0 }
  0xbc   : > { %5207 = vmatpush3.msk.msra.mxu1 %vm391_vm1, %v5603_v5  ;;  %5208 = vmatprep.mubr.msk.f32.mxu1 %vm5450_vm0, %v5449_v0  ;;  %v5877_v5 = vld [vmem:[%s6320_s3 + $0x58] sm:$0xff] }
  0xbd   : > { %4976 = vmatmul.mubr.msk.f32.vlgmr.msra.gmra.mrb[0].mxu0 %vm387_vm3, %v4973_v38  ;;  %v5837_v57 = vpop.permute.xlu0 %2001  ;;  %5211 = vmatprep.subr.mxu1 %v5449_v0 }
  0xbe   : > { %4981 = vmatpush1.msk.msra.mxu0 %vm391_vm1, %v1354_v54  ;;  %1429 = vmatprep.mubr.f32.mxu0 %v5449_v0 }
  0xbf   : > { %4986 = vmatprep.subr.msk.mxu0 %vm391_vm1, %v1519_v56  ;;  %v5848_v59 = vpop.permute.xlu1 %2164  ;;  %5209 = vmatmul.mubr.msk.f32.vlgmr.msra.gmra.mrb[18].mxu1 %vm387_vm3, %v5845_v58 }
  0xc0   : > { %5212 = vmatpush3.msk.msra.mxu1 %vm391_vm1, %v2004_v55  ;;  %5213 = vmatprep.mubr.msk.f32.mxu1 %vm5450_vm0, %v5449_v0 }
  0xc1   : > { %v2000_v60 = vpop.permute.xlu0 %1999  ;;  %5216 = vmatprep.subr.mxu1 %v5449_v0 }
  0xc2   : > { %v2005_v23 = vsel %vm384_vm2, %v2000_v60, %v5837_v57 }
  0xc3   : > { %v5862_v63 = vpop.permute.xlu1 %2162  ;;  %5214 = vmatmul.mubr.msk.f32.vlgmr.msra.gmra.mrb[20].mxu1 %vm387_vm3, %v5859_v61 }
  0xc4   : > { %5218 = vmatprep.mubr.msk.f32.mxu1 %vm5450_vm0, %v5449_v0  ;;  %v2168_v30 = vsel %vm697_vm4, %v5862_v63, %v5848_v59 }
  0xc5   : > { %4982 = vmatmul.mubr.msk.f32.vlgmr.msra.gmra.mrb[0].mxu0 %vm387_vm3, %v4979_v44  ;;  %v2167_v2 = vpop.permute.xlu0 %2166  ;;  %v6055_v44 = vld [vmem:[%s6320_s3 + $0x98] sm:$0xff] }
  0xc6   : > { %4987 = vmatpush1.msk.msra.mxu0 %vm391_vm1, %v1518_v62  ;;  %1593 = vmatprep.mubr.f32.mxu0 %v5449_v0 }
  0xc7   : > { %4992 = vmatprep.subr.msk.mxu0 %vm391_vm1, %v1683_v1  ;;  %v2330_v3 = vpop.permute.xlu1 %2329  ;;  %5217 = vmatpush3.msk.msra.mxu1 %vm391_vm1, %v2167_v2  ;;  %v6151_v1 = vld [vmem:[%s6320_s3 + $0xb8] sm:$0xff] }
  0xc8   : > { %5221 = vmatprep.subr.mxu1 %v5449_v0  ;;  %5219 = vmatmul.mubr.msk.f32.vlgmr.msra.gmra.mrb[22].mxu1 %vm387_vm3, %v5877_v5 }
  0xc9   : > { %v5882_v10 = vpop.permute.xlu0 %2327  ;;  %5222 = vmatpush3.msk.msra.mxu1 %vm391_vm1, %v2330_v3  ;;  %5223 = vmatprep.mubr.msk.f32.mxu1 %vm5450_vm0, %v5449_v0 }
  0xca   : > { %5226 = vmatprep.subr.mxu1 %v5449_v0  ;;  %v2332_v32 = vsel %vm861_vm5, %v5882_v10, %v2330_v3 }
  0xcb   : > { %v5894_v13 = vpop.permute.xlu1 %2490 }
  0xcc   : > { %5224 = vmatmul.mubr.msk.f32.vlgmr.msra.gmra.mrb[24].mxu1 %vm387_vm3, %v5890_v11 }
  0xcd   : > { %4988 = vmatmul.mubr.msk.f32.vlgmr.msra.gmra.mrb[0].mxu0 %vm387_vm3, %v4985_v49  ;;  %v5899_v14 = vpop.permute.xlu0 %2325  ;;  %5228 = vmatprep.mubr.msk.f32.mxu1 %vm5450_vm0, %v5449_v0 }
  0xce   : > { %4993 = vmatpush1.msk.msra.mxu0 %vm391_vm1, %v1682_v12  ;;  %1757 = vmatprep.mubr.f32.mxu0 %v5449_v0  ;;  %v2331_v39 = vsel %vm861_vm5, %v5899_v14, %v5882_v10  ;;  %v6184_v14 = vld [vmem:[%s6320_s3 + $0xc0] sm:$0xff] }
  0xcf   : > { %4998 = vmatprep.subr.msk.mxu0 %vm391_vm1, %v5609_v6  ;;  %v5907_v15 = vpop.permute.xlu1 %2488  ;;  %v2006_v6 = vsel %vm384_vm2, %v5837_v57, %v2004_v55 }
  0xd0   : > { %v2494_v46 = vsel %vm1025_vm6, %v5907_v15, %v5894_v13 }
  0xd1   : > { %v2493_v17 = vpop.permute.xlu0 %2492 }
  0xd2   : > { %5227 = vmatpush3.msk.msra.mxu1 %vm391_vm1, %v2493_v17  ;;  %v2495_v41 = vsel %vm1025_vm6, %v5894_v13, %v2493_v17 }
  0xd3   : > { %v5915_v18 = vpop.permute.xlu1 %2655  ;;  %5229 = vmatmul.mubr.msk.f32.vlgmr.msra.gmra.mrb[26].mxu1 %vm387_vm3, %v5912_v16  ;;  %5231 = vmatprep.subr.mxu1 %v5449_v0 }
  0xd4   : > { %5232 = vmatpush3.msk.msra.mxu1 %vm391_vm1, %v5915_v18  ;;  %5233 = vmatprep.mubr.msk.f32.mxu1 %vm5450_vm0, %v5449_v0 }
  0xd5   : > { %4994 = vmatmul.mubr.msk.f32.vlgmr.msra.gmra.mrb[0].mxu0 %vm387_vm3, %v5825_v53  ;;  %v5933_v20 = vpop.permute.xlu0 %2653  ;;  %5236 = vmatprep.subr.mxu1 %v5449_v0  ;;  %v6100_v53 = vld [vmem:[%s6320_s3 + $0xa8] sm:$0xff] }
  0xd6   : > { %4999 = vmatpush1.msk.msra.mxu0 %vm391_vm1, %v5599_v4  ;;  %1917 = vmatprep.mubr.f32.mxu0 %v5449_v0  ;;  %v2169_v4 = vsel %vm697_vm4, %v5848_v59, %v2167_v2  ;;  %v2658_v48 = vsel %vm1189_vm7, %v5933_v20, %v5915_v18  ;;  %v6127_v59 = vld [vmem:[%s6320_s3 + $0xb0] sm:$0xff] }
  0xd7   : > { %5004 = vmatprep.subr.msk.mxu0 %vm391_vm1, %v2006_v6  ;;  %v5940_v21 = vpop.permute.xlu1 %2816  ;;  %5234 = vmatmul.mubr.msk.f32.vlgmr.msra.gmra.mrb[28].mxu1 %vm387_vm3, %v5929_v19 }
  0xd8   : > { %5238 = vmatprep.mubr.msk.f32.mxu1 %vm5450_vm0, %v5449_v0 }
  0xd9   : > { %v5946_v22 = vpop.permute.xlu0 %2651 }
  0xda   : > { %v2657_v54 = vsel %vm1189_vm7, %v5946_v22, %v5933_v20 }
  0xdb   : > { %v5950_v24 = vpop.permute.xlu1 %2814 }
  0xdd   : > { %5000 = vmatmul.mubr.msk.f32.vlgmr.msra.gmra.mrb[0].mxu0 %vm387_vm3, %v5845_v58  ;;  %v5956_v25 = vpop.permute.xlu0 %2818 }
  0xde   : > { %5005 = vmatpush1.msk.msra.mxu0 %vm391_vm1, %v2005_v23  ;;  %2080 = vmatprep.mubr.f32.mxu0 %v5449_v0  ;;  %v2821_v56 = vsel %vm1353_vm8, %v5940_v21, %v5956_v25 }
  0xdf   : > { %5010 = vmatprep.subr.msk.mxu0 %vm391_vm1, %v2169_v4  ;;  %v5966_v27 = vpop.permute.xlu1 %2981  ;;  %5237 = vmatpush3.msk.msra.mxu1 %vm391_vm1, %v5956_v25 }
  0xe0   : > { %5239 = vmatmul.mubr.msk.f32.vlgmr.msra.gmra.mrb[30].mxu1 %vm387_vm3, %v5961_v26  ;;  %5241 = vmatprep.subr.mxu1 %v5449_v0 }
  0xe1   : > { %v5973_v28 = vpop.permute.xlu0 %2979  ;;  %5242 = vmatpush3.msk.msra.mxu1 %vm391_vm1, %v5966_v27  ;;  %5243 = vmatprep.mubr.msk.f32.mxu1 %vm5450_vm0, %v5449_v0 }
  0xe2   : > { %5246 = vmatprep.subr.mxu1 %v5449_v0  ;;  %v2984_v63 = vsel %vm1517_vm9, %v5973_v28, %v5966_v27 }
  0xe3   : > { %v5988_v31 = vpop.permute.xlu1 %3142 }
  0xe4   : > { %5244 = vmatmul.mubr.msk.f32.vlgmr.msra.gmra.mrb[32].mxu1 %vm387_vm3, %v5982_v29 }
  0xe5   : > { %5006 = vmatmul.mubr.msk.f32.vlgmr.msra.gmra.mrb[0].mxu0 %vm387_vm3, %v5859_v61  ;;  %v5996_v33 = vpop.permute.xlu0 %2977  ;;  %5248 = vmatprep.mubr.msk.f32.mxu1 %vm5450_vm0, %v5449_v0  ;;  %v2820_v61 = vsel %vm1353_vm8, %v5950_v24, %v5940_v21 }
  0xe6   : > { %5011 = vmatpush1.msk.msra.mxu0 %vm391_vm1, %v2168_v30  ;;  %2243 = vmatprep.mubr.f32.mxu0 %v5449_v0  ;;  %v2983_v2 = vsel %vm1517_vm9, %v5996_v33, %v5973_v28 }
  0xe7   : > { %5016 = vmatprep.subr.msk.mxu0 %vm391_vm1, %v2332_v32  ;;  %v6006_v35 = vpop.permute.xlu1 %3140 }
  0xe8   : > { %v3146_v12 = vsel %vm1681_vm10, %v6006_v35, %v5988_v31 }
  0xe9   : > { %v6013_v38 = vpop.permute.xlu0 %3144 }
  0xea   : > { %5247 = vmatpush3.msk.msra.mxu1 %vm391_vm1, %v6013_v38  ;;  %v3147_v3 = vsel %vm1681_vm10, %v5988_v31, %v6013_v38 }
  0xeb   : > { %v6020_v40 = vpop.permute.xlu1 %3467  ;;  %5249 = vmatmul.mubr.msk.f32.vlgmr.msra.gmra.mrb[34].mxu1 %vm387_vm3, %v6011_v37  ;;  %5251 = vmatprep.subr.mxu1 %v5449_v0 }
  0xec   : > { %5252 = vmatpush3.msk.msra.mxu1 %vm391_vm1, %v5664_v8  ;;  %5253 = vmatprep.mubr.msk.f32.mxu1 %vm5450_vm0, %v5449_v0 }
  0xed   : > { %5012 = vmatmul.mubr.msk.f32.vlgmr.msra.gmra.mrb[0].mxu0 %vm387_vm3, %v5877_v5  ;;  %v6038_v43 = vpop.permute.xlu0 %3465  ;;  %5256 = vmatprep.subr.mxu1 %v5449_v0 }
  0xee   : > { %5017 = vmatpush1.msk.msra.mxu0 %vm391_vm1, %v2331_v39  ;;  %2406 = vmatprep.mubr.f32.mxu0 %v5449_v0 }
  0xef   : > { %5022 = vmatprep.subr.msk.mxu0 %vm391_vm1, %v2495_v41  ;;  %v6044_v8 = vpop.permute.xlu1 %3628  ;;  %5254 = vmatmul.mubr.msk.f32.vlgmr.msra.gmra.mrb[36].mxu1 %vm387_vm3, %v6034_v42 }
  0xf0   : > { %5257 = vmatpush3.msk.msra.mxu1 %vm391_vm1, %v6020_v40  ;;  %5258 = vmatprep.mubr.msk.f32.mxu1 %vm5450_vm0, %v5449_v0 }
  0xf1   : > { %v6057_v45 = vpop.permute.xlu0 %3463  ;;  %5261 = vmatprep.subr.mxu1 %v5449_v0 }
  0xf2   : > { %v3469_v21 = vsel %vm384_vm2, %v6057_v45, %v6038_v43 }
  0xf3   : > { %v6063_v47 = vpop.permute.xlu1 %3626  ;;  %5259 = vmatmul.mubr.msk.f32.vlgmr.msra.gmra.mrb[38].mxu1 %vm387_vm3, %v6055_v44 }
  0xf4   : > { %5263 = vmatprep.mubr.msk.f32.mxu1 %vm5450_vm0, %v5449_v0  ;;  %v3632_v22 = vsel %vm697_vm4, %v6063_v47, %v6044_v8 }
  0xf5   : > { %5018 = vmatmul.mubr.msk.f32.vlgmr.msra.gmra.mrb[0].mxu0 %vm387_vm3, %v5890_v11  ;;  %v6074_v49 = vpop.permute.xlu0 %3630 }
  0xf6   : > { %5023 = vmatpush1.msk.msra.mxu0 %vm391_vm1, %v2494_v46  ;;  %2569 = vmatprep.mubr.f32.mxu0 %v5449_v0 }
  0xf7   : > { %5028 = vmatprep.subr.msk.mxu0 %vm391_vm1, %v2658_v48  ;;  %v6084_v51 = vpop.permute.xlu1 %3793  ;;  %5262 = vmatpush3.msk.msra.mxu1 %vm391_vm1, %v6074_v49 }
  0xf8   : > { %5264 = vmatmul.mubr.msk.f32.vlgmr.msra.gmra.mrb[40].mxu1 %vm387_vm3, %v6079_v50  ;;  %5266 = vmatprep.subr.mxu1 %v5449_v0 }
  0xf9   : > { %v6091_v52 = vpop.permute.xlu0 %3791  ;;  %5267 = vmatpush3.msk.msra.mxu1 %vm391_vm1, %v6084_v51  ;;  %5268 = vmatprep.mubr.msk.f32.mxu1 %vm5450_vm0, %v5449_v0 }
  0xfa   : > { %5271 = vmatprep.subr.mxu1 %v5449_v0  ;;  %v3796_v23 = vsel %vm861_vm5, %v6091_v52, %v6084_v51 }
  0xfb   : > { %v6106_v55 = vpop.permute.xlu1 %3954 }
  0xfc   : > { %5269 = vmatmul.mubr.msk.f32.vlgmr.msra.gmra.mrb[42].mxu1 %vm387_vm3, %v6100_v53 }
  0xfd   : > { %5024 = vmatmul.mubr.msk.f32.vlgmr.msra.gmra.mrb[0].mxu0 %vm387_vm3, %v5912_v16  ;;  %v6115_v57 = vpop.permute.xlu0 %3789  ;;  %5273 = vmatprep.mubr.msk.f32.mxu1 %vm5450_vm0, %v5449_v0  ;;  %v6199_v16 = vld [vmem:[%s6320_s3 + $0xc8] sm:$0xff] }
  0xfe   : > { %5029 = vmatpush1.msk.msra.mxu0 %vm391_vm1, %v2657_v54  ;;  %2732 = vmatprep.mubr.f32.mxu0 %v5449_v0  ;;  %v3795_v24 = vsel %vm861_vm5, %v6115_v57, %v6091_v52 }
  0xff   : > { %5034 = vmatprep.subr.msk.mxu0 %vm391_vm1, %v2821_v56  ;;  %v6122_v58 = vpop.permute.xlu1 %3952 }
 0x100   : > { %v3958_v25 = vsel %vm1025_vm6, %v6122_v58, %v6106_v55 }
 0x101   : > { %v6129_v60 = vpop.permute.xlu0 %3956 }
 0x102   : > { %5272 = vmatpush3.msk.msra.mxu1 %vm391_vm1, %v6129_v60  ;;  %v3959_v4 = vsel %vm1025_vm6, %v6106_v55, %v6129_v60 }
 0x103   : > { %v6136_v62 = vpop.permute.xlu1 %4119  ;;  %5274 = vmatmul.mubr.msk.f32.vlgmr.msra.gmra.mrb[44].mxu1 %vm387_vm3, %v6127_v59  ;;  %5276 = vmatprep.subr.mxu1 %v5449_v0 }
 0x104   : > { %5277 = vmatpush3.msk.msra.mxu1 %vm391_vm1, %v6136_v62  ;;  %5278 = vmatprep.mubr.msk.f32.mxu1 %vm5450_vm0, %v5449_v0 }
 0x105   : > { %5030 = vmatmul.mubr.msk.f32.vlgmr.msra.gmra.mrb[0].mxu0 %vm387_vm3, %v5929_v19  ;;  %5281 = vmatprep.subr.mxu1 %v5449_v0  ;;  %v5099_v19 = vld [vmem:[%s6320_s3 + $0xd0] sm:$0xff] }
 0x106   : > { %5035 = vmatpush1.msk.msra.mxu0 %vm391_vm1, %v2820_v61  ;;  %2895 = vmatprep.mubr.f32.mxu0 %v5449_v0 }
 0x107   : > { %5040 = vmatprep.subr.msk.mxu0 %vm391_vm1, %v2984_v63  ;;  %5279 = vmatmul.mubr.msk.f32.vlgmr.msra.gmra.mrb[46].mxu1 %vm387_vm3, %v6151_v1 }
 0x108   : > { %5283 = vmatprep.mubr.msk.f32.mxu1 %vm5450_vm0, %v5449_v0 }
 0x10b   : > { %v4118_v5 = vpop.permute.xlu0 %4117 }
 0x10d   : > { %5036 = vmatmul.mubr.msk.f32.vlgmr.msra.gmra.mrb[0].mxu0 %vm387_vm3, %v5961_v26  ;;  %v6173_v10 = vpop.permute.xlu1 %4280  ;;  %v4122_v26 = vsel %vm1189_vm7, %v4118_v5, %v6136_v62 }
 0x10e   : > { %5041 = vmatpush1.msk.msra.mxu0 %vm391_vm1, %v2983_v2  ;;  %3058 = vmatprep.mubr.f32.mxu0 %v5449_v0 }
 0x10f   : > { %5046 = vmatprep.subr.msk.mxu0 %vm391_vm1, %v3147_v3 }
 0x112   : > { %v4116_v11 = vpop.permute.xlu0 %4115 }
 0x113   : > { %v4121_v27 = vsel %vm1189_vm7, %v4116_v11, %v4118_v5 }
 0x114   : > { %v4279_v13 = vpop.permute.xlu1 %4278 }
 0x115   : > { %5042 = vmatmul.mubr.msk.f32.vlgmr.msra.gmra.mrb[0].mxu0 %vm387_vm3, %v5982_v29  ;;  %v4284_v29 = vsel %vm1353_vm8, %v4279_v13, %v6173_v10 }
 0x116   : > { %5047 = vmatpush1.msk.msra.mxu0 %vm391_vm1, %v3146_v12  ;;  %3221 = vmatprep.mubr.f32.mxu0 %v5449_v0  ;;  %v4283_v15 = vpop.permute.xlu0 %4282 }
 0x117   : > { %5052 = vmatprep.subr.msk.mxu0 %vm391_vm1, %v5670_v9  ;;  %5282 = vmatpush3.msk.msra.mxu1 %vm391_vm1, %v4283_v15  ;;  %v3470_v9 = vsel %vm384_vm2, %v6038_v43, %v6020_v40  ;;  %v4285_v28 = vsel %vm1353_vm8, %v6173_v10, %v4283_v15 }
 0x118   : > { %5284 = vmatmul.mubr.msk.f32.vlgmr.msra.gmra.mrb[48].mxu1 %vm387_vm3, %v6184_v14  ;;  %5286 = vmatprep.subr.mxu1 %v5449_v0 }
 0x119   : > { %5288 = vmatprep.mubr.msk.f32.mxu1 %vm5450_vm0, %v5449_v0 }
 0x11a   : > { %v4444_v17 = vpop.permute.xlu0 %4443  ;;  %v4446_v18 = vpop.permute.xlu1 %4445 }
 0x11b   : > { %5287 = vmatpush3.msk.msra.mxu1 %vm391_vm1, %v4446_v18  ;;  %v4448_v30 = vsel %vm1517_vm9, %v4444_v17, %v4446_v18 }
 0x11c   : > { %5289 = vmatmul.mubr.msk.f32.vlgmr.msra.gmra.mrb[50].mxu1 %vm387_vm3, %v6199_v16  ;;  %5291 = vmatprep.subr.mxu1 %v5449_v0 }
 0x11d   : > { %5048 = vmatmul.mubr.msk.f32.vlgmr.msra.gmra.mrb[0].mxu0 %vm387_vm3, %v6011_v37  ;;  %5293 = vmatprep.mubr.msk.f32.mxu1 %vm5450_vm0, %v5449_v0 }
 0x11e   : > { %5053 = vmatpush1.msk.msra.mxu0 %vm391_vm1, %v5660_v7  ;;  %3381 = vmatprep.mubr.f32.mxu0 %v5449_v0  ;;  %v4442_v6 = vpop.permute.xlu0 %4441  ;;  %v3633_v7 = vsel %vm697_vm4, %v6044_v8, %v6074_v49  ;;  %v4607_v31 = vpop.permute.xlu1 %4606 }
 0x11f   : > { %5058 = vmatprep.subr.msk.mxu0 %vm391_vm1, %v3470_v9  ;;  %v4447_v32 = vsel %vm1517_vm9, %v4442_v6, %v4444_v17  ;;  %v4776_v6 = vlaneseq }
 0x122   : > { %v4609_v20 = vpop.permute.xlu0 %4608 }
 0x123   : > { %5292 = vmatpush3.msk.msra.mxu1 %vm391_vm1, %v4609_v20  ;;  %v4611_v33 = vsel %vm1681_vm10, %v4607_v31, %v4609_v20  ;;  %v4605_v34 = vpop.permute.xlu1 %4604 }
 0x124   : > { %5294 = vmatmul.mubr.msk.f32.vlgmr.msra.gmra.mrb[52].mxu1 %vm387_vm3, %v5099_v19  ;;  %v4610_v35 = vsel %vm1681_vm10, %v4605_v34, %v4607_v31 }
 0x125   : > { %5054 = vmatmul.mubr.msk.f32.vlgmr.msra.gmra.mrb[0].mxu0 %vm387_vm3, %v6034_v42 }
 0x126   : > { %5059 = vmatpush1.msk.msra.mxu0 %vm391_vm1, %v3469_v21  ;;  %3544 = vmatprep.mubr.f32.mxu0 %v5449_v0 }
 0x127   : > { %5064 = vmatprep.subr.msk.mxu0 %vm391_vm1, %v3633_v7  ;;  %v4777_v7 = vshrl.u32 %v4776_v6, 7 }
 0x12d   : > { %5060 = vmatmul.mubr.msk.f32.vlgmr.msra.gmra.mrb[0].mxu0 %vm387_vm3, %v6055_v44 }
 0x12e   : > { %5065 = vmatpush1.msk.msra.mxu0 %vm391_vm1, %v3632_v22  ;;  %3707 = vmatprep.mubr.f32.mxu0 %v5449_v0 }
 0x12f   : > { %5070 = vmatprep.subr.msk.mxu0 %vm391_vm1, %v3796_v23 }
 0x135   : > { %5066 = vmatmul.mubr.msk.f32.vlgmr.msra.gmra.mrb[0].mxu0 %vm387_vm3, %v6079_v50 }
 0x136   : > { %5071 = vmatpush1.msk.msra.mxu0 %vm391_vm1, %v3795_v24  ;;  %3870 = vmatprep.mubr.f32.mxu0 %v5449_v0 }
 0x137   : > { %5076 = vmatprep.subr.msk.mxu0 %vm391_vm1, %v3959_v4  ;;  %v4782_v4 = vsub.s32 1, %v4777_v7 }
 0x13d   : > { %5072 = vmatmul.mubr.msk.f32.vlgmr.msra.gmra.mrb[0].mxu0 %vm387_vm3, %v6100_v53 }
 0x13e   : > { %5077 = vmatpush1.msk.msra.mxu0 %vm391_vm1, %v3958_v25  ;;  %4033 = vmatprep.mubr.f32.mxu0 %v5449_v0  ;;  %v4774_v25 = vld [vmem:[%s6322_s5] sm:$0x7] }
 0x13f   : > { %5082 = vmatprep.subr.msk.mxu0 %vm391_vm1, %v4122_v26  ;;  %v4783_v26 = vrot.slane %v4774_v25, %v4782_v4 }
 0x145   : > { %5078 = vmatmul.mubr.msk.f32.vlgmr.msra.gmra.mrb[0].mxu0 %vm387_vm3, %v6127_v59 }
 0x146   : > { %5083 = vmatpush1.msk.msra.mxu0 %vm391_vm1, %v4121_v27  ;;  %4196 = vmatprep.mubr.f32.mxu0 %v5449_v0 }
 0x147   : > { %5088 = vmatprep.subr.msk.mxu0 %vm391_vm1, %v4285_v28 }
 0x14d   : > { %5084 = vmatmul.mubr.msk.f32.vlgmr.msra.gmra.mrb[0].mxu0 %vm387_vm3, %v6151_v1 }
 0x14e   : > { %5089 = vmatpush1.msk.msra.mxu0 %vm391_vm1, %v4284_v29  ;;  %4359 = vmatprep.mubr.f32.mxu0 %v5449_v0 }
 0x14f   : > { %5094 = vmatprep.subr.msk.mxu0 %vm391_vm1, %v4448_v30 }
 0x155   : > { %5090 = vmatmul.mubr.msk.f32.vlgmr.msra.gmra.mrb[0].mxu0 %vm387_vm3, %v6184_v14 }
 0x156   : > { %5095 = vmatpush1.msk.msra.mxu0 %vm391_vm1, %v4447_v32  ;;  %4522 = vmatprep.mubr.f32.mxu0 %v5449_v0 }
 0x157   : > { %5100 = vmatprep.subr.msk.mxu0 %vm391_vm1, %v4611_v33 }
 0x15d   : > { %5096 = vmatmul.mubr.msk.f32.vlgmr.msra.gmra.mrb[0].mxu0 %vm387_vm3, %v6199_v16 }
 0x15e   : > { %5101 = vmatpush1.msk.msra.mxu0 %vm391_vm1, %v4610_v35  ;;  %4685 = vmatprep.mubr.f32.mxu0 %v5449_v0 }
 0x165   : > { %5102 = vmatmul.mubr.msk.f32.vlgmr.msra.gmra.mrb[0].mxu0 %vm387_vm3, %v5099_v19 }
 0x166   : > { %v535_v36 = vpop.f32.mrb[0].mxu1 }
 0x167   : > { %v5165_v37 = vpop.f32.mrb[1].mxu1 }
 0x16c   : > { %v685_v38 = vpop.f32.mrb[2].mxu1 }
 0x16d   : > { %v686_v39 = vadd.f32 %v685_v38, %v535_v36  ;;  %v5170_v40 = vpop.f32.mrb[3].mxu1 }
 0x170   : > { %v846_v41 = vpop.f32.mrb[4].mxu1 }
 0x171   : > { %v852_v42 = vadd.f32 %v846_v41, %v686_v39  ;;  %v5175_v43 = vpop.f32.mrb[5].mxu1 }
 0x174   : > { %v1010_v8 = vpop.f32.mrb[6].mxu1 }
 0x175   : > { %v1016_v44 = vadd.f32 %v1010_v8, %v852_v42  ;;  %v5180_v45 = vpop.f32.mrb[7].mxu1 }
 0x178   : > { %v1174_v46 = vpop.f32.mrb[8].mxu1 }
 0x179   : > { %v1180_v47 = vadd.f32 %v1174_v46, %v1016_v44  ;;  %v5185_v48 = vpop.f32.mrb[9].mxu1 }
 0x17d   : > { %v1338_v49 = vpop.f32.mrb[10].mxu1 }
 0x17e   : > { %v1344_v50 = vadd.f32 %v1338_v49, %v1180_v47  ;;  %v5190_v51 = vpop.f32.mrb[11].mxu1 }
 0x184   : > { %v1502_v0 = vpop.f32.mrb[12].mxu1 }
 0x185   : > { %v1508_v52 = vadd.f32 %v1502_v0, %v1344_v50  ;;  %v5195_v53 = vpop.f32.mrb[13].mxu1 }
 0x188   : > { %v1666_v54 = vpop.f32.mrb[14].mxu1 }
 0x189   : > { %v1672_v55 = vadd.f32 %v1666_v54, %v1508_v52  ;;  %v5200_v56 = vpop.f32.mrb[15].mxu1  ;;  %v4786_v52 = vsub.s32 2, %v4777_v7  ;;  %v4769_v54 = vpop.permute.xlu0 %4768 }
 0x18b   : > { %v4787_v56 = vrot.slane %v4774_v25, %v4786_v52 }
 0x18e   : > { %v1830_v57 = vpop.f32.mrb[16].mxu1 }
 0x18f   : > { %v1836_v58 = vadd.f32 %v1830_v57, %v1672_v55  ;;  %v5205_v59 = vpop.f32.mrb[17].mxu1 }
 0x192   : > { %v1990_v60 = vpop.f32.mrb[18].mxu1 }
 0x193   : > { %v1996_v61 = vadd.f32 %v1990_v60, %v1836_v58  ;;  %v5210_v62 = vpop.f32.mrb[19].mxu1  ;;  %v4778_v60 = vsub.s32 0, %v4777_v7 }
 0x196   : > { %v2153_v63 = vpop.f32.mrb[20].mxu1 }
 0x197   : > { %v2159_v1 = vadd.f32 %v2153_v63, %v1996_v61  ;;  %v5215_v2 = vpop.f32.mrb[21].mxu1  ;;  %v4779_v61 = vrot.slane %v4774_v25, %v4778_v60 }
 0x19b   : > { %v2316_v3 = vpop.f32.mrb[22].mxu1 }
 0x19c   : > { %v2322_v5 = vadd.f32 %v2316_v3, %v2159_v1  ;;  %v5220_v10 = vpop.f32.mrb[23].mxu1 }
 0x19f   : > { %v2479_v11 = vpop.f32.mrb[24].mxu1 }
 0x1a0   : > { %v2485_v12 = vadd.f32 %v2479_v11, %v2322_v5  ;;  %v5225_v13 = vpop.f32.mrb[25].mxu1 }
 0x1a6   : > { %v2642_v14 = vpop.f32.mrb[26].mxu1 }
 0x1a7   : > { %v2648_v15 = vadd.f32 %v2642_v14, %v2485_v12  ;;  %v5230_v16 = vpop.f32.mrb[27].mxu1 }
 0x1aa   : > { %v2805_v17 = vpop.f32.mrb[28].mxu1 }
 0x1ab   : > { %v2811_v18 = vadd.f32 %v2805_v17, %v2648_v15  ;;  %v5235_v9 = vpop.f32.mrb[29].mxu1 }
 0x1b3   : > { %v2968_v19 = vpop.f32.mrb[30].mxu1 }
 0x1b4   : > { %v2974_v20 = vadd.f32 %v2968_v19, %v2811_v18  ;;  %v5240_v21 = vpop.f32.mrb[31].mxu1 }
 0x1b7   : > { %v3131_v22 = vpop.f32.mrb[32].mxu1 }
 0x1b8   : > { %v3137_v23 = vadd.f32 %v3131_v22, %v2974_v20  ;;  %v5245_v24 = vpop.f32.mrb[33].mxu1 }
 0x1be   : > { %v3294_v27 = vpop.f32.mrb[34].mxu1 }
 0x1bf   : > { %v3300_v28 = vadd.f32 %v3294_v27, %v3137_v23  ;;  %v5250_v29 = vpop.f32.mrb[35].mxu1 }
 0x1c2   : > { %v3454_v30 = vpop.f32.mrb[36].mxu1 }
 0x1c3   : > { %v3460_v31 = vadd.f32 %v3454_v30, %v3300_v28  ;;  %v5255_v32 = vpop.f32.mrb[37].mxu1 }
 0x1c6   : > { %v3617_v33 = vpop.f32.mrb[38].mxu1 }
 0x1c7   : > { %v3623_v34 = vadd.f32 %v3617_v33, %v3460_v31  ;;  %v5260_v35 = vpop.f32.mrb[39].mxu1 }
 0x1cb   : > { %v3780_v36 = vpop.f32.mrb[40].mxu1 }
 0x1cc   : > { %v3786_v37 = vadd.f32 %v3780_v36, %v3623_v34  ;;  %v5265_v38 = vpop.f32.mrb[41].mxu1 }
 0x1cf   : > { %v3943_v39 = vpop.f32.mrb[42].mxu1 }
 0x1d0   : > { %v3949_v40 = vadd.f32 %v3943_v39, %v3786_v37  ;;  %v5270_v41 = vpop.f32.mrb[43].mxu1 }
 0x1d6   : > { %v4106_v42 = vpop.f32.mrb[44].mxu1 }
 0x1d7   : > { %v4112_v43 = vadd.f32 %v4106_v42, %v3949_v40  ;;  %v5275_v8 = vpop.f32.mrb[45].mxu1 }
 0x1da   : > { %v4269_v44 = vpop.f32.mrb[46].mxu1 }
 0x1db   : > { %v4275_v45 = vadd.f32 %v4269_v44, %v4112_v43  ;;  %v5280_v46 = vpop.f32.mrb[47].mxu1 }
 0x1eb   : > { %v4432_v47 = vpop.f32.mrb[48].mxu1 }
 0x1ec   : > { %v4438_v48 = vadd.f32 %v4432_v47, %v4275_v45  ;;  %v5285_v49 = vpop.f32.mrb[49].mxu1 }
 0x1ef   : > { %v4595_v50 = vpop.f32.mrb[50].mxu1 }
 0x1f0   : > { %v4601_v51 = vadd.f32 %v4595_v50, %v4438_v48  ;;  %v5290_v0 = vpop.f32.mrb[51].mxu1 }
 0x1f7   : > { %v4758_v53 = vpop.f32.mrb[52].mxu1 }
 0x1f8   : > { %v4764_v55 = vadd.f32 %v4758_v53, %v4601_v51  ;;  %v5295_v57 = vpop.f32.mrb[53].mxu1 }
 0x1fa   : > { %v4773_v58 = vadd.f32 %v4769_v54, %v4764_v55 }
 0x1fc   : > { %v4793_v59 = vmul.f32 %v4787_v56, %v4773_v58 }
 0x1fe   : > { %4797 = vst.msk [vmem:[%s369_s30 + $0x10] sm:$0xff] %vm4796_vm11, %v4793_v59 }
 0x238   : > { %v4687_v62 = vpop.f32.mrb[0].mxu0 }
 0x239   : > { %v4771_v63 = vadd.f32 %v4769_v54, %v4687_v62  ;;  %v4689_v1 = vpop.f32.mrb[1].mxu0 }
 0x23a   : > { %v4772_v2 = vadd.f32 %v4769_v54, %v4689_v1 }
 0x23b   : > { %v4791_v3 = vmul.f32 %v4779_v61, %v4771_v63 }
 0x23c   : > { %v4792_v5 = vmul.f32 %v4783_v26, %v4772_v2 }
 0x23d   : > { %4794 = vst [vmem:[%s369_s30] sm:$0xff] %v4791_v3 }
 0x23e   : > { %4795 = vst [vmem:[%s369_s30 + $0x8] sm:$0xff] %v4792_v5 }
 0x23f PF: > { %s16_s25 = sadd.s32 1, %s5447_s25   ;;  %s6324_s21 = smov %s5439_s23 }
 0x240   : > { %p13_p10 = scmp.ge.s32.totalorder %s16_s25, 18   ;;  %s6325_s22 = smov %s5443_s24 }
 0x241   : > { %s6326_s23 = smov %s6329_s26  ;;  %s6327_s24 = smov %s6333_s27 }
 0x242   :  { %15 = sbr.rel (!%p13_p10) target bundleno = 3 (0x3), region = 106 }

// kernel: d3block_forward.5
= control target key start
LH: loop header
LB: loop body
LE: loop exit
PB: predicated region body
PF: predicated region fallthrough
CT: control target
= control target key end

     0   :  { %s566_s15 = smov 0   ;;  %s568_s16 = smov 0   ;;  %s633_s0 = inlined_call_operand.vmem [shape: f32[8,8,512], index: 0, kind: input, shape index: {}]   ;;  %s634_s1 = inlined_call_operand.vmem [shape: f32[4,512], index: 1, kind: input, shape index: {}]   ;;  %s635_s2 = inlined_call_operand.vmem [shape: f32[8,4], index: 2, kind: input, shape index: {}]   ;;  %s636_s3 = inlined_call_operand.vmem [shape: f32[8,1], index: 3, kind: input, shape index: {}]   ;;  %s637_s4 = inlined_call_operand.vmem [shape: f32[8,512], index: 4, kind: output, shape index: {}]  }
   0x1   :  { %s570_s17 = smov 0  }
   0x2 LB: > { %s458_s18 = sadd.s32 4294967295, %s536_s17   ;;  %s583_s19 = sadd.s32 1, %s536_s17   ;;  %s536_s17 = sphi %s570_s17, %s640_s17   ;;  %s532_s16 = sphi %s568_s16, %s639_s16   ;;  %s528_s15 = sphi %s566_s15, %s638_s15  }
   0x3   : > { %s18_s20 = ssub.s32 %s536_s17, %s583_s19  ;;  %s21_s21 = sadd.s32 1, %s532_s16 }
   0x4   : > { %p19_p0 = scmp.eq.s32.totalorder %s18_s20, 0  ;;  %p28_p1 = scmp.ne.s32.totalorder %s532_s16, %s528_s15 }
   0x5   : > { %p29_p2 = scmp.eq.s32.totalorder %s536_s17, 0  ;;  %p461_p4 = scmp.ge.s32.totalorder %s536_s17, 4 }
   0x6   : > { %s592_s22 = scalar_select %p19_p0, %s532_s16, %s21_s21  }
   0x7   : > { %p30_p3 = por %p29_p2, %p28_p1  ;;  %154 = sbr.rel (%p461_p4) target bundleno = 26 (0x1a), region = 24 }
   0xe   : > { %157 = sbr.rel (!%p30_p3) target bundleno = 26 (0x1a), region = 28  ;;  %s159_s23 = sand.u32 (%p30_p3), 1, %s532_s16  }
   0xf   : > { %s463_s24 = sshll.u32 (%p30_p3), %s536_s17, 3  ;;  %s462_s25 = sshll.u32 (%p30_p3), %s159_s23, 6 }
  0x10   : > { %s163_s28 = scalar_lea.vmem (%p30_p3), %s633_s0, %s463_s24  ;;  %s161_s29 = scalar_lea.vmem (%p30_p3), [#allocation2], %s462_s25 }
  0x11   : > { %v205_v0 = vld [vmem:[%s163_s28] sm:$0xff] (%p30_p3) }
  0x12   : > { %v207_v1 = vld [vmem:[%s163_s28 + $0x20] sm:$0xff] (%p30_p3)  ;;  %206 = vst [vmem:[%s161_s29] sm:$0xff] (%p30_p3), %v205_v0 }
  0x13   : > { %v209_v2 = vld [vmem:[%s163_s28 + $0x40] sm:$0xff] (%p30_p3)  ;;  %208 = vst [vmem:[%s161_s29 + $0x8] sm:$0xff] (%p30_p3), %v207_v1 }
  0x14   : > { %210 = vst [vmem:[%s161_s29 + $0x10] sm:$0xff] (%p30_p3), %v209_v2  ;;  %v211_v3 = vld [vmem:[%s163_s28 + $0x60] sm:$0xff] (%p30_p3) }
  0x15   : > { %v213_v4 = vld [vmem:[%s163_s28 + $0x80] sm:$0xff]  ;;  %212 = vst [vmem:[%s161_s29 + $0x18] sm:$0xff] %v211_v3 }
  0x16   : > { %v215_v5 = vld [vmem:[%s163_s28 + $0xa0] sm:$0xff]  ;;  %214 = vst [vmem:[%s161_s29 + $0x20] sm:$0xff] %v213_v4 }
  0x17   : > { %216 = vst [vmem:[%s161_s29 + $0x28] sm:$0xff] %v215_v5  ;;  %v217_v6 = vld [vmem:[%s163_s28 + $0xc0] sm:$0xff] }
  0x18   : > { %v219_v7 = vld [vmem:[%s163_s28 + $0xe0] sm:$0xff]  ;;  %218 = vst [vmem:[%s161_s29 + $0x30] sm:$0xff] %v217_v6 }
  0x19   : > { %220 = vst [vmem:[%s161_s29 + $0x38] sm:$0xff] %v219_v7 }
  0x1a PF: > { %p464_p5 = scmp.ge.s32.totalorder %s536_s17, 1  ;;  %p232_p6 = scmp.lt.s32.totalorder %s536_s17, 5 }
  0x1c   : > { %p233_p7 = pnand %p464_p5, %p232_p6 }
  0x1d   : > { %p267_p8 = scmp.lt.s32.totalorder (!%p233_p7), %s458_s18, 3  ;;  %v538_v8 = vmov (!%p233_p7), 0.0   ;;  %vm539_vm0 = vmmov (!%p233_p7), 0   ;;  %v379_v9 = vld [vmem:[%s636_s3] sm:$0xff] (!%p233_p7)  ;;  %v540_v10 = vmov (!%p233_p7), 0   ;;  %vm303_vm1 = vcmask (!%p233_p7), 1043456  }
  0x1e   : > { %236 = sbr.rel (%p233_p7) target bundleno = 259 (0x103), region = 70  ;;  %481 = vmatprep.subr.mxu0 (!%p233_p7), %v538_v8  ;;  %483 = vmatprep.mubr.msk.f32.mxu0 (!%p233_p7), %vm539_vm0, %v538_v8  ;;  %v297_v11 = vld [vmem:[%s635_s2] sm:$0xff] (!%p233_p7)  ;;  %vm299_vm2 = vcmask (!%p233_p7), 31744   ;;  %s239_s12 = sand.u32 (!%p233_p7), 1, %s528_s15  }
  0x1f   : > { %513 = vset.pattern.permute.xlu0 (!%p233_p7), %v540_v10  ;;  %s465_s13 = sshll.u32 (!%p233_p7), %s239_s12, 6 }
  0x20   : > { %382 = vperm.xlu0 (!%p233_p7), %513, %v379_v9   ;;  %s241_s14 = scalar_lea.vmem (!%p233_p7), [#allocation2], %s465_s13 }
  0x21   : > { %v275_v13 = vld [vmem:[%s241_s14] sm:$0xff] (!%p233_p7)  ;;  %v468_v14 = vld [vmem:[%s241_s14 + $0x8] sm:$0xff] (!%p233_p7)  ;;  %v469_v16 = vld [vmem:[%s241_s14 + $0x10] sm:$0xff] (!%p233_p7) }
  0x22   : > { %v278_v15 = vadd.f32 (!%p233_p7), %v468_v14, %v275_v13  ;;  %v470_v18 = vld [vmem:[%s241_s14 + $0x18] sm:$0xff] (!%p233_p7)  ;;  %v471_v20 = vld [vmem:[%s241_s14 + $0x20] sm:$0xff] (!%p233_p7)  ;;  %v472_v22 = vld [vmem:[%s241_s14 + $0x28] sm:$0xff] (!%p233_p7) }
  0x23   : > { %v473_v24 = vld [vmem:[%s241_s14 + $0x30] sm:$0xff] (!%p233_p7)  ;;  %v474_v26 = vld [vmem:[%s241_s14 + $0x38] sm:$0xff] (!%p233_p7) }
  0x24   : > { %v281_v17 = vadd.f32 (!%p233_p7), %v469_v16, %v278_v15 }
  0x25   : > { %s642_s18 = smov (!%p267_p8, %s458_s18), 3 }
  0x26   : > { %s466_s6 = sshll.u32 %s642_s18, 2  ;;  %v284_v19 = vadd.f32 %v470_v18, %v281_v17  ;;  %s467_s15 = sshll.u32 %s642_s18, 3 }
  0x27   : > { %s270_s9 = scalar_lea.vmem %s634_s1, %s466_s6  ;;  %s274_s21 = scalar_lea.vmem %s637_s4, %s467_s15 }
  0x28   : > { %v298_v12 = vld [vmem:[%s270_s9] sm:$0xf]  ;;  %v287_v21 = vadd.f32 %v471_v20, %v284_v19 }
  0x29   : > { %482 = vmatpush3.msk.msra.mxu0 %vm303_vm1, %v298_v12 }
  0x2a   : > { %484 = vmatmul.mubr.msk.f32.vlgmr.msra.gmra.mrb[0].mxu0 %vm299_vm2, %v297_v11  ;;  %v290_v23 = vadd.f32 %v472_v22, %v287_v21 }
  0x2c   : > { %v293_v25 = vadd.f32 %v473_v24, %v290_v23 }
  0x2e   : > { %v296_v27 = vadd.f32 %v474_v26, %v293_v25 }
  0x30   : > { %v377_v28 = vmul.f32 0.125, %v296_v27 }
  0x9f   : > { %v383_v30 = vpop.permute.xlu0 %382 }
  0xfd   : > { %v373_v29 = vpop.f32.mrb[0].mxu0 }
  0xfe   : > { %v378_v31 = vadd.f32 %v377_v28, %v373_v29  ;;  %v485_v32 = vpop.f32.mrb[1].mxu0 }
 0x100   : > { %v385_v33 = vadd.f32 %v383_v30, %v378_v31 }
 0x102   : > { %386 = vst [vmem:[%s274_s21] sm:$0xff] %v385_v33 }
 0x103 PF: > { %p11_p9 = scmp.ge.s32.totalorder %s583_s19, 6   ;;  %s638_s15 = smov %s532_s16 }
 0x104   : > { %s639_s16 = smov %s592_s22  ;;  %s640_s17 = smov %s583_s19 }
 0x105   :  { %13 = sbr.rel (!%p11_p9) target bundleno = 2 (0x2), region = 119 }

</bundles_post_ra>
